<compile_context>
chip_gen: v7x
topology: tpu7x:2x2x1
jax: 0.10.0
libtpu: 0.0.40
codegen_flags: <defaults>
</compile_context>

<pallas_src>
import functools

import jax
import jax.numpy as jnp
from jax import lax
from jax.experimental import pallas as pl
from jax.experimental.pallas import tpu as pltpu

BN_EPS = 1e-5


def _round_up(x, m):
    return ((x + m - 1) // m) * m


# ---------------------------------------------------------------------------
# Pallas kernel: fused 3x3 conv (tap-decomposed) + bias + eval BN + ReLU
# ---------------------------------------------------------------------------
def _conv3x3_bn_relu_kernel(x_ref, w_ref, s_ref, b_ref, m_ref, o_ref, *acc_scratch,
                            taps, m_rows, out_off, relu, multi_k):
    """One (batch, Cout-tile, Cin-tile) grid step.

    x_ref : (1, Mx, tk)    f32/bf16 flattened, spatially padded input slab
    w_ref : (9, tk, tn)    bf16 per-tap weight matrices
    s_ref : (1, tn)        f32 folded BN scale
    b_ref : (1, tn)        f32 folded conv-bias + BN shift
    m_ref : (m_rows, 1)    f32 validity mask (0 on the spatial halo ring)
    o_ref : (1, Mo, tn)    f32/bf16 output slab, same flattened padded layout
    acc_scratch : optional (m_rows, tn) f32 accumulator (only when the Cin axis has >1 step)
    """
    # One slab-wide cast (a no-op when the activation already arrives in bf16); the nine
    # 3x3 taps are static shifted windows of this single VMEM-resident value.
    a_all = x_ref[0].astype(jnp.bfloat16)

    # Local f32 accumulation over the nine taps: one value chain feeding the MXU and a single
    # store of the output tile per grid step (no per-tap read-modify-write of o_ref).
    acc = jnp.dot(a_all[taps[0]:taps[0] + m_rows, :], w_ref[0],
                  preferred_element_type=jnp.float32)
    for t in range(1, len(taps)):
        off = taps[t]
        acc = acc + jnp.dot(a_all[off:off + m_rows, :], w_ref[t],
                            preferred_element_type=jnp.float32)

    tn = o_ref.shape[2]
    tail = o_ref.shape[1] - (out_off + m_rows)

    def finalize(total):
        y = total * s_ref[...] + b_ref[...]
        if relu:
            y = jnp.maximum(y, 0.0)
        y = y * m_ref[...]                                    # zero the spatial halo ring
        # Zero the untouched leading/trailing rows of the padded layout, then one lane-dense,
        # tile-aligned store of the computed window.
        o_ref[0, :out_off, :] = jnp.zeros((out_off, tn), o_ref.dtype)
        if tail > 0:
            o_ref[0, out_off + m_rows:, :] = jnp.zeros((tail, tn), o_ref.dtype)
        o_ref[0, out_off:out_off + m_rows, :] = y.astype(o_ref.dtype)

    if not multi_k:
        finalize(acc)
    else:
        acc_ref = acc_scratch[0]
        k = pl.program_id(2)

        @pl.when(k == 0)
        def _():
            acc_ref[...] = jnp.zeros_like(acc_ref)

        acc_ref[...] = acc_ref[...] + acc

        @pl.when(k == pl.num_programs(2) - 1)
        def _():
            finalize(acc_ref[...])


def conv3x3_bn_relu(x, w, conv_b, bn, *, relu=True, out_dtype=jnp.float32,
                    hw=None, lead_in=0):
    """Fused Conv2d(3x3, pad=1, bias=True) + eval-mode BatchNorm + ReLU.

    If hw is None, x is (B, H, W, Cx) NHWC (Cx >= Cin; extra channels must be zero) and is
    padded/flattened here (lead_in is forced to 0).  Otherwise x is already a (B, Mx, Cx)
    flattened spatially-padded slab with `lead_in` leading zero rows (as produced by a
    previous call) and hw = (H, W).

    Returns (y, lead_out): y is (B, Mo, Cop) `out_dtype` in the same flattened padded layout
    with `lead_out` leading zero rows, Cop = round_up(Cout, 128); channels >= Cout and the
    spatial halo ring are zero, so y can directly feed the next conv3x3_bn_relu call.
    """
    kh, kw, Cin, Cout = w.shape
    assert (kh, kw) == (3, 3)

    if hw is None:
        B, H, W, Cx = x.shape
        assert Cx >= Cin
        lead_in = 0
        Wp, Hq = W + 2, H + 4
        Cp = _round_up(Cx, 128)
        # Single pad pass: 3x3 halo + one extra zero row top/bottom (keeps every shifted tap
        # window in bounds) + channel lane padding; then a free reshape to the flat layout.
        xq = jnp.pad(x, ((0, 0), (2, 2), (1, 1), (0, Cp - Cx)))
        Mx = Hq * Wp
        xf = xq.reshape(B, Mx, Cp)
    else:
        H, W = hw
        B, Mx, Cp = x.shape
        Wp, Hq = W + 2, H + 4
        assert Cp % 128 == 0 and Cp >= Cin
        assert Mx >= lead_in + Hq * Wp
        xf = x

    assert W >= 7, "flattened-tap kernel assumes W >= 7"
    Cop = _round_up(Cout, 128)

    # Rows of the flat input for which a conv value is computed (leading garbage rows are
    # masked away); computed row m is stored at flat output index m + out_off.  lead_out is
    # chosen so out_off is a multiple of 16 -> every store starts on a native (8,128)/(16,128)
    # tile boundary for both f32 and bf16 outputs.
    m_rows = _round_up(lead_in + (H + 1) * Wp, 8)
    lead_out = lead_in + (-(Wp + 1)) % 16
    out_off = (lead_out - lead_in) + Wp + 1
    Mo = _round_up(lead_out + Hq * Wp, 8)
    assert out_off % 16 == 0
    assert m_rows + 2 * Wp + 2 <= Mx        # every shifted tap read stays inside xf
    assert out_off + m_rows <= Mo           # every store stays inside the output slab

    # Weights -> (9, Cp, Cop) bf16, zero padded on both channel axes (built once, tiny).
    wp = jnp.zeros((3, 3, Cp, Cop), jnp.float32).at[:, :, :Cin, :Cout].set(w)
    wp = wp.reshape(9, Cp, Cop).astype(jnp.bfloat16)

    # Fold conv bias + eval-mode BN into one per-channel affine applied in the epilogue:
    #   y = conv * s + (beta - mean * s + conv_b * s),  s = gamma / sqrt(var + eps)
    gamma, beta, mean, var = bn
    s = gamma / jnp.sqrt(var + BN_EPS)
    b = beta - mean * s + conv_b * s
    s_p = jnp.zeros((1, Cop), jnp.float32).at[0, :Cout].set(s)
    b_p = jnp.zeros((1, Cop), jnp.float32).at[0, :Cout].set(b)

    # Validity mask over computed rows: row m is a real output pixel iff
    # m - lead_in = (i + 1) * Wp + j with 0 <= i < H, 0 <= j < W.
    q = jnp.arange(m_rows, dtype=jnp.int32) - lead_in
    r = q // Wp
    c = q - r * Wp
    valid = (r >= 1) & (r <= H) & (c < W)
    mask = valid.astype(jnp.float32)[:, None]                 # (m_rows, 1)

    tk = 256 if Cp % 256 == 0 else 128
    tn = 256 if Cop % 256 == 0 else 128
    nk = Cp // tk
    multi_k = nk > 1
    # Tap t = 3*di + dj reads flat position m + di*Wp + dj for computed row m.
    taps = tuple(di * Wp + dj for di in range(3) for dj in range(3))

    out = pl.pallas_call(
        functools.partial(_conv3x3_bn_relu_kernel, taps=taps, m_rows=m_rows,
                          out_off=out_off, relu=relu, multi_k=multi_k),
        out_shape=jax.ShapeDtypeStruct((B, Mo, Cop), out_dtype),
        grid_spec=pltpu.PrefetchScalarGridSpec(
            num_scalar_prefetch=0,
            grid=(B, Cop // tn, nk),
            in_specs=[
                pl.BlockSpec((1, Mx, tk), lambda bi, n, k: (bi, 0, k)),
                pl.BlockSpec((9, tk, tn), lambda bi, n, k: (0, k, n)),
                pl.BlockSpec((1, tn), lambda bi, n, k: (0, n)),
                pl.BlockSpec((1, tn), lambda bi, n, k: (0, n)),
                pl.BlockSpec((m_rows, 1), lambda bi, n, k: (0, 0)),
            ],
            out_specs=pl.BlockSpec((1, Mo, tn), lambda bi, n, k: (bi, 0, n)),
            scratch_shapes=([pltpu.VMEM((m_rows, tn), jnp.float32)] if multi_k else []),
        ),
        compiler_params=pltpu.CompilerParams(
            dimension_semantics=("parallel", "parallel", "arbitrary"),
            vmem_limit_bytes=32 * 1024 * 1024,
        ),
    )(xf, wp, s_p, b_p, mask)
    return out, lead_out


def _flat_to_nhwc(y, H, W, channels, lead):
    """Extract the (B, H, W, channels) image from the flattened padded layout."""
    B = y.shape[0]
    Wp = W + 2
    y = y[:, lead + 2 * Wp: lead + (H + 2) * Wp, :].reshape(B, H, Wp, y.shape[-1])
    return y[:, :, 1:W + 1, :channels]


# ---------------------------------------------------------------------------
# Decoder_No_Upsample forward (inference mode)
# ---------------------------------------------------------------------------
def decoder_no_upsample_forward(x, params):
    """x: (B, in_channels, H, W) NCHW f32 -> (B, out_channels, H, W) f32."""
    out_channels = params["w2"].shape[-1]
    _, _, H, W = x.shape
    h = jnp.transpose(x, (0, 2, 3, 1)).astype(jnp.float32)               # NCHW -> NHWC
    # Conv1 + BN + ReLU.  The intermediate activation is kept in bf16 and is emitted directly
    # in the flattened, spatially padded layout the second conv consumes (no XLA glue).
    h, lead = conv3x3_bn_relu(h, params["w1"], params["b1"], params["bn1"],
                              relu=True, out_dtype=jnp.bfloat16)
    # Dropout(0.5): identity at inference time.
    h, lead = conv3x3_bn_relu(h, params["w2"], params["b2"], params["bn2"],
                              relu=True, out_dtype=jnp.float32,
                              hw=(H, W), lead_in=lead)
    h = _flat_to_nhwc(h, H, W, out_channels, lead)
    return jnp.transpose(h, (0, 3, 1, 2))                                # NHWC -> NCHW


# ---------------------------------------------------------------------------
# Pure-JAX reference (f32) for a correctness cross-check
# ---------------------------------------------------------------------------
def _reference_forward(x, params):
    h = jnp.transpose(x, (0, 2, 3, 1)).astype(jnp.float32)

    def block(h, w, cb, bn):
        y = lax.conv_general_dilated(h, w, (1, 1), ((1, 1), (1, 1)),
                                     dimension_numbers=("NHWC", "HWIO", "NHWC"))
        y = y + cb
        gamma, beta, mean, var = bn
        y = (y - mean) / jnp.sqrt(var + BN_EPS) * gamma + beta
        return jnp.maximum(y, 0.0)

    h = block(h, params["w1"], params["b1"], params["bn1"])
    h = block(h, params["w2"], params["b2"], params["bn2"])
    return jnp.transpose(h, (0, 3, 1, 2))


# ---------------------------------------------------------------------------
# Deterministic synthetic parameters
# ---------------------------------------------------------------------------
def build_params(key, cin, cmid, cout):
    def nrm(i, shape):
        return jax.random.normal(jax.random.fold_in(key, i), shape, jnp.float32)

    def bn(i, c):
        gamma = 1.0 + 0.05 * nrm(i, (c,))
        beta = 0.05 * nrm(i + 1, (c,))
        mean = 0.05 * nrm(i + 2, (c,))
        var = 1.0 + 0.05 * jnp.abs(nrm(i + 3, (c,)))
        return (gamma, beta, mean, var)

    return {
        "w1": nrm(0, (3, 3, cin, cmid)) * (2.0 / (9 * cin)) ** 0.5,
        "b1": 0.01 * nrm(1, (cmid,)),
        "bn1": bn(10, cmid),
        "w2": nrm(2, (3, 3, cmid, cout)) * (2.0 / (9 * cmid)) ** 0.5,
        "b2": 0.01 * nrm(3, (cout,)),
        "bn2": bn(20, cout),
    }


if __name__ == "__main__":
    B, Cin, H, W = 2, 4, 16, 16
    mid_channels, out_channels = 32, 16

    key = jax.random.PRNGKey(0)
    params = build_params(jax.random.fold_in(key, 1), Cin, mid_channels, out_channels)
    x = jax.random.normal(jax.random.fold_in(key, 2), (B, Cin, H, W), jnp.float32)

    forward = jax.jit(decoder_no_upsample_forward)
    out = jax.block_until_ready(forward(x, params))

    assert out.shape == (B, out_channels, H, W), out.shape
    assert out.dtype == jnp.float32
    assert bool(jnp.all(jnp.isfinite(out)))

    ref = _reference_forward(x, params)
    rel = float(jnp.linalg.norm(out - ref) / (jnp.linalg.norm(ref) + 1e-12))
    assert rel < 3e-2, f"relative error too large: {rel}"

    print("KERNEL_OK")
</pallas_src>

<mosaic_0001>
module attributes {stable_mosaic.version = 11 : i64} {
  func.func @_conv3x3_bn_relu_kernel(%arg0: i32, %arg1: i32, %arg2: i32, %arg3: memref<1x360x128xf32, #tpu.memory_space<vmem>>, %arg4: memref<9x128x128xbf16, #tpu.memory_space<vmem>>, %arg5: memref<1x128xf32, #tpu.memory_space<vmem>>, %arg6: memref<1x128xf32, #tpu.memory_space<vmem>>, %arg7: memref<312x1xf32, #tpu.memory_space<vmem>>, %arg8: memref<1x376x128xbf16, #tpu.memory_space<vmem>>) attributes {dimension_semantics = [#tpu.dimension_semantics<parallel>, #tpu.dimension_semantics<parallel>, #tpu.dimension_semantics<arbitrary>], iteration_bounds = array<i64: 2, 1, 1>, scalar_prefetch = 0 : i64, scratch_operands = 0 : i64, tpu.core_type = #tpu.core_type<tc>, window_params = [{transform_indices = @transform_0, window_bounds = array<i64: 1, 360, 128>}, {transform_indices = @transform_1, window_bounds = array<i64: 9, 128, 128>}, {transform_indices = @transform_2, window_bounds = array<i64: 1, 128>}, {transform_indices = @transform_3, window_bounds = array<i64: 1, 128>}, {pipeline_mode = #tpu.pipeline_mode<synchronous>, transform_indices = @transform_4, window_bounds = array<i64: 312, 1>}, {transform_indices = @transform_5, window_bounds = array<i64: 1, 376, 128>}]} {
    %c0 = arith.constant 0 : index
    %c0_0 = arith.constant 0 : index
    %c0_1 = arith.constant 0 : index
    %0 = vector.load %arg3[%c0, %c0_0, %c0_1] : memref<1x360x128xf32, #tpu.memory_space<vmem>>, vector<1x360x128xf32>
    %1 = vector.shape_cast %0 : vector<1x360x128xf32> to vector<360x128xf32>
    %2 = arith.truncf %1 : vector<360x128xf32> to vector<360x128xbf16>
    %3 = vector.extract_strided_slice %2 {offsets = [0, 0], sizes = [312, 128], strides = [1, 1]} : vector<360x128xbf16> to vector<312x128xbf16>
    %c0_2 = arith.constant 0 : index
    %c0_3 = arith.constant 0 : index
    %c0_4 = arith.constant 0 : index
    %4 = vector.load %arg4[%c0_2, %c0_3, %c0_4] : memref<9x128x128xbf16, #tpu.memory_space<vmem>>, vector<1x128x128xbf16>
    %5 = vector.shape_cast %4 : vector<1x128x128xbf16> to vector<128x128xbf16>
    %cst = arith.constant dense<0.000000e+00> : vector<312x128xf32>
    %6 = tpu.matmul %3, %5, %cst {dimension_numbers = #tpu.dot_dimension_numbers<[1], [0], [0], [1], [0, 0, 1, 1], [], []>} : vector<312x128xbf16>, vector<128x128xbf16>, vector<312x128xf32> -> vector<312x128xf32>
    %7 = vector.extract_strided_slice %2 {offsets = [1, 0], sizes = [312, 128], strides = [1, 1]} : vector<360x128xbf16> to vector<312x128xbf16>
    %c1 = arith.constant 1 : index
    %c0_5 = arith.constant 0 : index
    %c0_6 = arith.constant 0 : index
    %8 = vector.load %arg4[%c1, %c0_5, %c0_6] : memref<9x128x128xbf16, #tpu.memory_space<vmem>>, vector<1x128x128xbf16>
    %9 = vector.shape_cast %8 : vector<1x128x128xbf16> to vector<128x128xbf16>
    %cst_7 = arith.constant dense<0.000000e+00> : vector<312x128xf32>
    %10 = tpu.matmul %7, %9, %cst_7 {dimension_numbers = #tpu.dot_dimension_numbers<[1], [0], [0], [1], [0, 0, 1, 1], [], []>} : vector<312x128xbf16>, vector<128x128xbf16>, vector<312x128xf32> -> vector<312x128xf32>
    %11 = arith.addf %6, %10 : vector<312x128xf32>
    %12 = vector.extract_strided_slice %2 {offsets = [2, 0], sizes = [312, 128], strides = [1, 1]} : vector<360x128xbf16> to vector<312x128xbf16>
    %c2 = arith.constant 2 : index
    %c0_8 = arith.constant 0 : index
    %c0_9 = arith.constant 0 : index
    %13 = vector.load %arg4[%c2, %c0_8, %c0_9] : memref<9x128x128xbf16, #tpu.memory_space<vmem>>, vector<1x128x128xbf16>
    %14 = vector.shape_cast %13 : vector<1x128x128xbf16> to vector<128x128xbf16>
    %cst_10 = arith.constant dense<0.000000e+00> : vector<312x128xf32>
    %15 = tpu.matmul %12, %14, %cst_10 {dimension_numbers = #tpu.dot_dimension_numbers<[1], [0], [0], [1], [0, 0, 1, 1], [], []>} : vector<312x128xbf16>, vector<128x128xbf16>, vector<312x128xf32> -> vector<312x128xf32>
    %16 = arith.addf %11, %15 : vector<312x128xf32>
    %17 = vector.extract_strided_slice %2 {offsets = [18, 0], sizes = [312, 128], strides = [1, 1]} : vector<360x128xbf16> to vector<312x128xbf16>
    %c3 = arith.constant 3 : index
    %c0_11 = arith.constant 0 : index
    %c0_12 = arith.constant 0 : index
    %18 = vector.load %arg4[%c3, %c0_11, %c0_12] : memref<9x128x128xbf16, #tpu.memory_space<vmem>>, vector<1x128x128xbf16>
    %19 = vector.shape_cast %18 : vector<1x128x128xbf16> to vector<128x128xbf16>
    %cst_13 = arith.constant dense<0.000000e+00> : vector<312x128xf32>
    %20 = tpu.matmul %17, %19, %cst_13 {dimension_numbers = #tpu.dot_dimension_numbers<[1], [0], [0], [1], [0, 0, 1, 1], [], []>} : vector<312x128xbf16>, vector<128x128xbf16>, vector<312x128xf32> -> vector<312x128xf32>
    %21 = arith.addf %16, %20 : vector<312x128xf32>
    %22 = vector.extract_strided_slice %2 {offsets = [19, 0], sizes = [312, 128], strides = [1, 1]} : vector<360x128xbf16> to vector<312x128xbf16>
    %c4 = arith.constant 4 : index
    %c0_14 = arith.constant 0 : index
    %c0_15 = arith.constant 0 : index
    %23 = vector.load %arg4[%c4, %c0_14, %c0_15] : memref<9x128x128xbf16, #tpu.memory_space<vmem>>, vector<1x128x128xbf16>
    %24 = vector.shape_cast %23 : vector<1x128x128xbf16> to vector<128x128xbf16>
    %cst_16 = arith.constant dense<0.000000e+00> : vector<312x128xf32>
    %25 = tpu.matmul %22, %24, %cst_16 {dimension_numbers = #tpu.dot_dimension_numbers<[1], [0], [0], [1], [0, 0, 1, 1], [], []>} : vector<312x128xbf16>, vector<128x128xbf16>, vector<312x128xf32> -> vector<312x128xf32>
    %26 = arith.addf %21, %25 : vector<312x128xf32>
    %27 = vector.extract_strided_slice %2 {offsets = [20, 0], sizes = [312, 128], strides = [1, 1]} : vector<360x128xbf16> to vector<312x128xbf16>
    %c5 = arith.constant 5 : index
    %c0_17 = arith.constant 0 : index
    %c0_18 = arith.constant 0 : index
    %28 = vector.load %arg4[%c5, %c0_17, %c0_18] : memref<9x128x128xbf16, #tpu.memory_space<vmem>>, vector<1x128x128xbf16>
    %29 = vector.shape_cast %28 : vector<1x128x128xbf16> to vector<128x128xbf16>
    %cst_19 = arith.constant dense<0.000000e+00> : vector<312x128xf32>
    %30 = tpu.matmul %27, %29, %cst_19 {dimension_numbers = #tpu.dot_dimension_numbers<[1], [0], [0], [1], [0, 0, 1, 1], [], []>} : vector<312x128xbf16>, vector<128x128xbf16>, vector<312x128xf32> -> vector<312x128xf32>
    %31 = arith.addf %26, %30 : vector<312x128xf32>
    %32 = vector.extract_strided_slice %2 {offsets = [36, 0], sizes = [312, 128], strides = [1, 1]} : vector<360x128xbf16> to vector<312x128xbf16>
    %c6 = arith.constant 6 : index
    %c0_20 = arith.constant 0 : index
    %c0_21 = arith.constant 0 : index
    %33 = vector.load %arg4[%c6, %c0_20, %c0_21] : memref<9x128x128xbf16, #tpu.memory_space<vmem>>, vector<1x128x128xbf16>
    %34 = vector.shape_cast %33 : vector<1x128x128xbf16> to vector<128x128xbf16>
    %cst_22 = arith.constant dense<0.000000e+00> : vector<312x128xf32>
    %35 = tpu.matmul %32, %34, %cst_22 {dimension_numbers = #tpu.dot_dimension_numbers<[1], [0], [0], [1], [0, 0, 1, 1], [], []>} : vector<312x128xbf16>, vector<128x128xbf16>, vector<312x128xf32> -> vector<312x128xf32>
    %36 = arith.addf %31, %35 : vector<312x128xf32>
    %37 = vector.extract_strided_slice %2 {offsets = [37, 0], sizes = [312, 128], strides = [1, 1]} : vector<360x128xbf16> to vector<312x128xbf16>
    %c7 = arith.constant 7 : index
    %c0_23 = arith.constant 0 : index
    %c0_24 = arith.constant 0 : index
    %38 = vector.load %arg4[%c7, %c0_23, %c0_24] : memref<9x128x128xbf16, #tpu.memory_space<vmem>>, vector<1x128x128xbf16>
    %39 = vector.shape_cast %38 : vector<1x128x128xbf16> to vector<128x128xbf16>
    %cst_25 = arith.constant dense<0.000000e+00> : vector<312x128xf32>
    %40 = tpu.matmul %37, %39, %cst_25 {dimension_numbers = #tpu.dot_dimension_numbers<[1], [0], [0], [1], [0, 0, 1, 1], [], []>} : vector<312x128xbf16>, vector<128x128xbf16>, vector<312x128xf32> -> vector<312x128xf32>
    %41 = arith.addf %36, %40 : vector<312x128xf32>
    %42 = vector.extract_strided_slice %2 {offsets = [38, 0], sizes = [312, 128], strides = [1, 1]} : vector<360x128xbf16> to vector<312x128xbf16>
    %c8 = arith.constant 8 : index
    %c0_26 = arith.constant 0 : index
    %c0_27 = arith.constant 0 : index
    %43 = vector.load %arg4[%c8, %c0_26, %c0_27] : memref<9x128x128xbf16, #tpu.memory_space<vmem>>, vector<1x128x128xbf16>
    %44 = vector.shape_cast %43 : vector<1x128x128xbf16> to vector<128x128xbf16>
    %cst_28 = arith.constant dense<0.000000e+00> : vector<312x128xf32>
    %45 = tpu.matmul %42, %44, %cst_28 {dimension_numbers = #tpu.dot_dimension_numbers<[1], [0], [0], [1], [0, 0, 1, 1], [], []>} : vector<312x128xbf16>, vector<128x128xbf16>, vector<312x128xf32> -> vector<312x128xf32>
    %46 = arith.addf %41, %45 : vector<312x128xf32>
    %c0_29 = arith.constant 0 : index
    %c0_30 = arith.constant 0 : index
    %47 = vector.load %arg5[%c0_29, %c0_30] : memref<1x128xf32, #tpu.memory_space<vmem>>, vector<1x128xf32>
    %48 = vector.broadcast %47 : vector<1x128xf32> to vector<312x128xf32>
    %49 = arith.mulf %46, %48 : vector<312x128xf32>
    %c0_31 = arith.constant 0 : index
    %c0_32 = arith.constant 0 : index
    %50 = vector.load %arg6[%c0_31, %c0_32] : memref<1x128xf32, #tpu.memory_space<vmem>>, vector<1x128xf32>
    %51 = vector.broadcast %50 : vector<1x128xf32> to vector<312x128xf32>
    %52 = arith.addf %49, %51 : vector<312x128xf32>
    %cst_33 = arith.constant 0.000000e+00 : f32
    %53 = vector.broadcast %cst_33 : f32 to vector<312x128xf32>
    %54 = arith.maximumf %52, %53 : vector<312x128xf32>
    %c0_34 = arith.constant 0 : index
    %c0_35 = arith.constant 0 : index
    %55 = vector.load %arg7[%c0_34, %c0_35] : memref<312x1xf32, #tpu.memory_space<vmem>>, vector<312x1xf32>
    %56 = vector.broadcast %55 : vector<312x1xf32> to vector<312x128xf32>
    %57 = arith.mulf %54, %56 : vector<312x128xf32>
    %cst_36 = arith.constant 0.000000e+00 : bf16
    %58 = vector.broadcast %cst_36 : bf16 to vector<32x128xbf16>
    %c0_37 = arith.constant 0 : index
    %c0_38 = arith.constant 0 : index
    %c0_39 = arith.constant 0 : index
    %59 = vector.load %arg8[%c0_37, %c0_38, %c0_39] : memref<1x376x128xbf16, #tpu.memory_space<vmem>>, vector<1x32x128xbf16>
    %60 = vector.shape_cast %59 : vector<1x32x128xbf16> to vector<32x128xbf16>
    %61 = vector.shape_cast %58 : vector<32x128xbf16> to vector<1x32x128xbf16>
    tpu.vector_store %arg8[%c0_37, %c0_38, %c0_39], %61 {strides = array<i32>} : memref<1x376x128xbf16, #tpu.memory_space<vmem>>, vector<1x32x128xbf16>,
    %cst_40 = arith.constant 0.000000e+00 : bf16
    %62 = vector.broadcast %cst_40 : bf16 to vector<32x128xbf16>
    %c0_41 = arith.constant 0 : index
    %c344 = arith.constant 344 : index
    %c0_42 = arith.constant 0 : index
    %63 = vector.load %arg8[%c0_41, %c344, %c0_42] : memref<1x376x128xbf16, #tpu.memory_space<vmem>>, vector<1x32x128xbf16>
    %64 = vector.shape_cast %63 : vector<1x32x128xbf16> to vector<32x128xbf16>
    %65 = vector.shape_cast %62 : vector<32x128xbf16> to vector<1x32x128xbf16>
    tpu.vector_store %arg8[%c0_41, %c344, %c0_42], %65 {strides = array<i32>} : memref<1x376x128xbf16, #tpu.memory_space<vmem>>, vector<1x32x128xbf16>,
    %66 = arith.truncf %57 : vector<312x128xf32> to vector<312x128xbf16>
    %c0_43 = arith.constant 0 : index
    %c32 = arith.constant 32 : index
    %c0_44 = arith.constant 0 : index
    %67 = vector.load %arg8[%c0_43, %c32, %c0_44] : memref<1x376x128xbf16, #tpu.memory_space<vmem>>, vector<1x312x128xbf16>
    %68 = vector.shape_cast %67 : vector<1x312x128xbf16> to vector<312x128xbf16>
    %69 = vector.shape_cast %66 : vector<312x128xbf16> to vector<1x312x128xbf16>
    tpu.vector_store %arg8[%c0_43, %c32, %c0_44], %69 {strides = array<i32>} : memref<1x376x128xbf16, #tpu.memory_space<vmem>>, vector<1x312x128xbf16>,
    return
  }
  func.func @transform_0(%arg0: i32, %arg1: i32, %arg2: i32) -> (i32, i32, i32) {
    %c0_i32 = arith.constant 0 : i32
    %c0_i32_0 = arith.constant 0 : i32
    return %arg0, %c0_i32, %arg2 : i32, i32, i32
  }
  func.func @transform_1(%arg0: i32, %arg1: i32, %arg2: i32) -> (i32, i32, i32) {
    %c0_i32 = arith.constant 0 : i32
    %c0_i32_0 = arith.constant 0 : i32
    return %c0_i32, %arg2, %arg1 : i32, i32, i32
  }
  func.func @transform_2(%arg0: i32, %arg1: i32, %arg2: i32) -> (i32, i32) {
    %c0_i32 = arith.constant 0 : i32
    %c0_i32_0 = arith.constant 0 : i32
    return %c0_i32, %arg1 : i32, i32
  }
  func.func @transform_3(%arg0: i32, %arg1: i32, %arg2: i32) -> (i32, i32) {
    %c0_i32 = arith.constant 0 : i32
    %c0_i32_0 = arith.constant 0 : i32
    return %c0_i32, %arg1 : i32, i32
  }
  func.func @transform_4(%arg0: i32, %arg1: i32, %arg2: i32) -> (i32, i32) {
    %c0_i32 = arith.constant 0 : i32
    %c0_i32_0 = arith.constant 0 : i32
    %c0_i32_1 = arith.constant 0 : i32
    return %c0_i32, %c0_i32_0 : i32, i32
  }
  func.func @transform_5(%arg0: i32, %arg1: i32, %arg2: i32) -> (i32, i32, i32) {
    %c0_i32 = arith.constant 0 : i32
    %c0_i32_0 = arith.constant 0 : i32
    return %arg0, %c0_i32, %arg1 : i32, i32, i32
  }
}

module attributes {stable_mosaic.version = 11 : i64} {
  func.func @_conv3x3_bn_relu_kernel(%arg0: i32, %arg1: i32, %arg2: i32, %arg3: memref<1x376x128xbf16, #tpu.memory_space<vmem>>, %arg4: memref<9x128x128xbf16, #tpu.memory_space<vmem>>, %arg5: memref<1x128xf32, #tpu.memory_space<vmem>>, %arg6: memref<1x128xf32, #tpu.memory_space<vmem>>, %arg7: memref<320x1xf32, #tpu.memory_space<vmem>>, %arg8: memref<1x392x128xf32, #tpu.memory_space<vmem>>) attributes {dimension_semantics = [#tpu.dimension_semantics<parallel>, #tpu.dimension_semantics<parallel>, #tpu.dimension_semantics<arbitrary>], iteration_bounds = array<i64: 2, 1, 1>, scalar_prefetch = 0 : i64, scratch_operands = 0 : i64, tpu.core_type = #tpu.core_type<tc>, window_params = [{transform_indices = @transform_0, window_bounds = array<i64: 1, 376, 128>}, {transform_indices = @transform_1, window_bounds = array<i64: 9, 128, 128>}, {transform_indices = @transform_2, window_bounds = array<i64: 1, 128>}, {transform_indices = @transform_3, window_bounds = array<i64: 1, 128>}, {pipeline_mode = #tpu.pipeline_mode<synchronous>, transform_indices = @transform_4, window_bounds = array<i64: 320, 1>}, {transform_indices = @transform_5, window_bounds = array<i64: 1, 392, 128>}]} {
    %c0 = arith.constant 0 : index
    %c0_0 = arith.constant 0 : index
    %c0_1 = arith.constant 0 : index
    %0 = vector.load %arg3[%c0, %c0_0, %c0_1] : memref<1x376x128xbf16, #tpu.memory_space<vmem>>, vector<1x376x128xbf16>
    %1 = vector.shape_cast %0 : vector<1x376x128xbf16> to vector<376x128xbf16>
    %2 = vector.extract_strided_slice %1 {offsets = [0, 0], sizes = [320, 128], strides = [1, 1]} : vector<376x128xbf16> to vector<320x128xbf16>
    %c0_2 = arith.constant 0 : index
    %c0_3 = arith.constant 0 : index
    %c0_4 = arith.constant 0 : index
    %3 = vector.load %arg4[%c0_2, %c0_3, %c0_4] : memref<9x128x128xbf16, #tpu.memory_space<vmem>>, vector<1x128x128xbf16>
    %4 = vector.shape_cast %3 : vector<1x128x128xbf16> to vector<128x128xbf16>
    %cst = arith.constant dense<0.000000e+00> : vector<320x128xf32>
    %5 = tpu.matmul %2, %4, %cst {dimension_numbers = #tpu.dot_dimension_numbers<[1], [0], [0], [1], [0, 0, 1, 1], [], []>} : vector<320x128xbf16>, vector<128x128xbf16>, vector<320x128xf32> -> vector<320x128xf32>
    %6 = vector.extract_strided_slice %1 {offsets = [1, 0], sizes = [320, 128], strides = [1, 1]} : vector<376x128xbf16> to vector<320x128xbf16>
    %c1 = arith.constant 1 : index
    %c0_5 = arith.constant 0 : index
    %c0_6 = arith.constant 0 : index
    %7 = vector.load %arg4[%c1, %c0_5, %c0_6] : memref<9x128x128xbf16, #tpu.memory_space<vmem>>, vector<1x128x128xbf16>
    %8 = vector.shape_cast %7 : vector<1x128x128xbf16> to vector<128x128xbf16>
    %cst_7 = arith.constant dense<0.000000e+00> : vector<320x128xf32>
    %9 = tpu.matmul %6, %8, %cst_7 {dimension_numbers = #tpu.dot_dimension_numbers<[1], [0], [0], [1], [0, 0, 1, 1], [], []>} : vector<320x128xbf16>, vector<128x128xbf16>, vector<320x128xf32> -> vector<320x128xf32>
    %10 = arith.addf %5, %9 : vector<320x128xf32>
    %11 = vector.extract_strided_slice %1 {offsets = [2, 0], sizes = [320, 128], strides = [1, 1]} : vector<376x128xbf16> to vector<320x128xbf16>
    %c2 = arith.constant 2 : index
    %c0_8 = arith.constant 0 : index
    %c0_9 = arith.constant 0 : index
    %12 = vector.load %arg4[%c2, %c0_8, %c0_9] : memref<9x128x128xbf16, #tpu.memory_space<vmem>>, vector<1x128x128xbf16>
    %13 = vector.shape_cast %12 : vector<1x128x128xbf16> to vector<128x128xbf16>
    %cst_10 = arith.constant dense<0.000000e+00> : vector<320x128xf32>
    %14 = tpu.matmul %11, %13, %cst_10 {dimension_numbers = #tpu.dot_dimension_numbers<[1], [0], [0], [1], [0, 0, 1, 1], [], []>} : vector<320x128xbf16>, vector<128x128xbf16>, vector<320x128xf32> -> vector<320x128xf32>
    %15 = arith.addf %10, %14 : vector<320x128xf32>
    %16 = vector.extract_strided_slice %1 {offsets = [18, 0], sizes = [320, 128], strides = [1, 1]} : vector<376x128xbf16> to vector<320x128xbf16>
    %c3 = arith.constant 3 : index
    %c0_11 = arith.constant 0 : index
    %c0_12 = arith.constant 0 : index
    %17 = vector.load %arg4[%c3, %c0_11, %c0_12] : memref<9x128x128xbf16, #tpu.memory_space<vmem>>, vector<1x128x128xbf16>
    %18 = vector.shape_cast %17 : vector<1x128x128xbf16> to vector<128x128xbf16>
    %cst_13 = arith.constant dense<0.000000e+00> : vector<320x128xf32>
    %19 = tpu.matmul %16, %18, %cst_13 {dimension_numbers = #tpu.dot_dimension_numbers<[1], [0], [0], [1], [0, 0, 1, 1], [], []>} : vector<320x128xbf16>, vector<128x128xbf16>, vector<320x128xf32> -> vector<320x128xf32>
    %20 = arith.addf %15, %19 : vector<320x128xf32>
    %21 = vector.extract_strided_slice %1 {offsets = [19, 0], sizes = [320, 128], strides = [1, 1]} : vector<376x128xbf16> to vector<320x128xbf16>
    %c4 = arith.constant 4 : index
    %c0_14 = arith.constant 0 : index
    %c0_15 = arith.constant 0 : index
    %22 = vector.load %arg4[%c4, %c0_14, %c0_15] : memref<9x128x128xbf16, #tpu.memory_space<vmem>>, vector<1x128x128xbf16>
    %23 = vector.shape_cast %22 : vector<1x128x128xbf16> to vector<128x128xbf16>
    %cst_16 = arith.constant dense<0.000000e+00> : vector<320x128xf32>
    %24 = tpu.matmul %21, %23, %cst_16 {dimension_numbers = #tpu.dot_dimension_numbers<[1], [0], [0], [1], [0, 0, 1, 1], [], []>} : vector<320x128xbf16>, vector<128x128xbf16>, vector<320x128xf32> -> vector<320x128xf32>
    %25 = arith.addf %20, %24 : vector<320x128xf32>
    %26 = vector.extract_strided_slice %1 {offsets = [20, 0], sizes = [320, 128], strides = [1, 1]} : vector<376x128xbf16> to vector<320x128xbf16>
    %c5 = arith.constant 5 : index
    %c0_17 = arith.constant 0 : index
    %c0_18 = arith.constant 0 : index
    %27 = vector.load %arg4[%c5, %c0_17, %c0_18] : memref<9x128x128xbf16, #tpu.memory_space<vmem>>, vector<1x128x128xbf16>
    %28 = vector.shape_cast %27 : vector<1x128x128xbf16> to vector<128x128xbf16>
    %cst_19 = arith.constant dense<0.000000e+00> : vector<320x128xf32>
    %29 = tpu.matmul %26, %28, %cst_19 {dimension_numbers = #tpu.dot_dimension_numbers<[1], [0], [0], [1], [0, 0, 1, 1], [], []>} : vector<320x128xbf16>, vector<128x128xbf16>, vector<320x128xf32> -> vector<320x128xf32>
    %30 = arith.addf %25, %29 : vector<320x128xf32>
    %31 = vector.extract_strided_slice %1 {offsets = [36, 0], sizes = [320, 128], strides = [1, 1]} : vector<376x128xbf16> to vector<320x128xbf16>
    %c6 = arith.constant 6 : index
    %c0_20 = arith.constant 0 : index
    %c0_21 = arith.constant 0 : index
    %32 = vector.load %arg4[%c6, %c0_20, %c0_21] : memref<9x128x128xbf16, #tpu.memory_space<vmem>>, vector<1x128x128xbf16>
    %33 = vector.shape_cast %32 : vector<1x128x128xbf16> to vector<128x128xbf16>
    %cst_22 = arith.constant dense<0.000000e+00> : vector<320x128xf32>
    %34 = tpu.matmul %31, %33, %cst_22 {dimension_numbers = #tpu.dot_dimension_numbers<[1], [0], [0], [1], [0, 0, 1, 1], [], []>} : vector<320x128xbf16>, vector<128x128xbf16>, vector<320x128xf32> -> vector<320x128xf32>
    %35 = arith.addf %30, %34 : vector<320x128xf32>
    %36 = vector.extract_strided_slice %1 {offsets = [37, 0], sizes = [320, 128], strides = [1, 1]} : vector<376x128xbf16> to vector<320x128xbf16>
    %c7 = arith.constant 7 : index
    %c0_23 = arith.constant 0 : index
    %c0_24 = arith.constant 0 : index
    %37 = vector.load %arg4[%c7, %c0_23, %c0_24] : memref<9x128x128xbf16, #tpu.memory_space<vmem>>, vector<1x128x128xbf16>
    %38 = vector.shape_cast %37 : vector<1x128x128xbf16> to vector<128x128xbf16>
    %cst_25 = arith.constant dense<0.000000e+00> : vector<320x128xf32>
    %39 = tpu.matmul %36, %38, %cst_25 {dimension_numbers = #tpu.dot_dimension_numbers<[1], [0], [0], [1], [0, 0, 1, 1], [], []>} : vector<320x128xbf16>, vector<128x128xbf16>, vector<320x128xf32> -> vector<320x128xf32>
    %40 = arith.addf %35, %39 : vector<320x128xf32>
    %41 = vector.extract_strided_slice %1 {offsets = [38, 0], sizes = [320, 128], strides = [1, 1]} : vector<376x128xbf16> to vector<320x128xbf16>
    %c8 = arith.constant 8 : index
    %c0_26 = arith.constant 0 : index
    %c0_27 = arith.constant 0 : index
    %42 = vector.load %arg4[%c8, %c0_26, %c0_27] : memref<9x128x128xbf16, #tpu.memory_space<vmem>>, vector<1x128x128xbf16>
    %43 = vector.shape_cast %42 : vector<1x128x128xbf16> to vector<128x128xbf16>
    %cst_28 = arith.constant dense<0.000000e+00> : vector<320x128xf32>
    %44 = tpu.matmul %41, %43, %cst_28 {dimension_numbers = #tpu.dot_dimension_numbers<[1], [0], [0], [1], [0, 0, 1, 1], [], []>} : vector<320x128xbf16>, vector<128x128xbf16>, vector<320x128xf32> -> vector<320x128xf32>
    %45 = arith.addf %40, %44 : vector<320x128xf32>
    %c0_29 = arith.constant 0 : index
    %c0_30 = arith.constant 0 : index
    %46 = vector.load %arg5[%c0_29, %c0_30] : memref<1x128xf32, #tpu.memory_space<vmem>>, vector<1x128xf32>
    %47 = vector.broadcast %46 : vector<1x128xf32> to vector<320x128xf32>
    %48 = arith.mulf %45, %47 : vector<320x128xf32>
    %c0_31 = arith.constant 0 : index
    %c0_32 = arith.constant 0 : index
    %49 = vector.load %arg6[%c0_31, %c0_32] : memref<1x128xf32, #tpu.memory_space<vmem>>, vector<1x128xf32>
    %50 = vector.broadcast %49 : vector<1x128xf32> to vector<320x128xf32>
    %51 = arith.addf %48, %50 : vector<320x128xf32>
    %cst_33 = arith.constant 0.000000e+00 : f32
    %52 = vector.broadcast %cst_33 : f32 to vector<320x128xf32>
    %53 = arith.maximumf %51, %52 : vector<320x128xf32>
    %c0_34 = arith.constant 0 : index
    %c0_35 = arith.constant 0 : index
    %54 = vector.load %arg7[%c0_34, %c0_35] : memref<320x1xf32, #tpu.memory_space<vmem>>, vector<320x1xf32>
    %55 = vector.broadcast %54 : vector<320x1xf32> to vector<320x128xf32>
    %56 = arith.mulf %53, %55 : vector<320x128xf32>
    %cst_36 = arith.constant 0.000000e+00 : f32
    %57 = vector.broadcast %cst_36 : f32 to vector<32x128xf32>
    %c0_37 = arith.constant 0 : index
    %c0_38 = arith.constant 0 : index
    %c0_39 = arith.constant 0 : index
    %58 = vector.load %arg8[%c0_37, %c0_38, %c0_39] : memref<1x392x128xf32, #tpu.memory_space<vmem>>, vector<1x32x128xf32>
    %59 = vector.shape_cast %58 : vector<1x32x128xf32> to vector<32x128xf32>
    %60 = vector.shape_cast %57 : vector<32x128xf32> to vector<1x32x128xf32>
    tpu.vector_store %arg8[%c0_37, %c0_38, %c0_39], %60 {strides = array<i32>} : memref<1x392x128xf32, #tpu.memory_space<vmem>>, vector<1x32x128xf32>,
    %cst_40 = arith.constant 0.000000e+00 : f32
    %61 = vector.broadcast %cst_40 : f32 to vector<40x128xf32>
    %c0_41 = arith.constant 0 : index
    %c352 = arith.constant 352 : index
    %c0_42 = arith.constant 0 : index
    %62 = vector.load %arg8[%c0_41, %c352, %c0_42] : memref<1x392x128xf32, #tpu.memory_space<vmem>>, vector<1x40x128xf32>
    %63 = vector.shape_cast %62 : vector<1x40x128xf32> to vector<40x128xf32>
    %64 = vector.shape_cast %61 : vector<40x128xf32> to vector<1x40x128xf32>
    tpu.vector_store %arg8[%c0_41, %c352, %c0_42], %64 {strides = array<i32>} : memref<1x392x128xf32, #tpu.memory_space<vmem>>, vector<1x40x128xf32>,
    %c0_43 = arith.constant 0 : index
    %c32 = arith.constant 32 : index
    %c0_44 = arith.constant 0 : index
    %65 = vector.load %arg8[%c0_43, %c32, %c0_44] : memref<1x392x128xf32, #tpu.memory_space<vmem>>, vector<1x320x128xf32>
    %66 = vector.shape_cast %65 : vector<1x320x128xf32> to vector<320x128xf32>
    %67 = vector.shape_cast %56 : vector<320x128xf32> to vector<1x320x128xf32>
    tpu.vector_store %arg8[%c0_43, %c32, %c0_44], %67 {strides = array<i32>} : memref<1x392x128xf32, #tpu.memory_space<vmem>>, vector<1x320x128xf32>,
    return
  }
  func.func @transform_0(%arg0: i32, %arg1: i32, %arg2: i32) -> (i32, i32, i32) {
    %c0_i32 = arith.constant 0 : i32
    %c0_i32_0 = arith.constant 0 : i32
    return %arg0, %c0_i32, %arg2 : i32, i32, i32
  }
  func.func @transform_1(%arg0: i32, %arg1: i32, %arg2: i32) -> (i32, i32, i32) {
    %c0_i32 = arith.constant 0 : i32
    %c0_i32_0 = arith.constant 0 : i32
    return %c0_i32, %arg2, %arg1 : i32, i32, i32
  }
  func.func @transform_2(%arg0: i32, %arg1: i32, %arg2: i32) -> (i32, i32) {
    %c0_i32 = arith.constant 0 : i32
    %c0_i32_0 = arith.constant 0 : i32
    return %c0_i32, %arg1 : i32, i32
  }
  func.func @transform_3(%arg0: i32, %arg1: i32, %arg2: i32) -> (i32, i32) {
    %c0_i32 = arith.constant 0 : i32
    %c0_i32_0 = arith.constant 0 : i32
    return %c0_i32, %arg1 : i32, i32
  }
  func.func @transform_4(%arg0: i32, %arg1: i32, %arg2: i32) -> (i32, i32) {
    %c0_i32 = arith.constant 0 : i32
    %c0_i32_0 = arith.constant 0 : i32
    %c0_i32_1 = arith.constant 0 : i32
    return %c0_i32, %c0_i32_0 : i32, i32
  }
  func.func @transform_5(%arg0: i32, %arg1: i32, %arg2: i32) -> (i32, i32, i32) {
    %c0_i32 = arith.constant 0 : i32
    %c0_i32_0 = arith.constant 0 : i32
    return %arg0, %c0_i32, %arg1 : i32, i32, i32
  }
}

</mosaic_0001>

<bundles_post_ra>
// kernel: decoder_no_upsample_forward.2
= control target key start
LH: loop header
LB: loop body
LE: loop exit
PB: predicated region body
PF: predicated region fallthrough
CT: control target
= control target key end

     0   :  { %s5974_s18 = smov 0   ;;  %s5976_s19 = smov 0   ;;  %s7306_s0 = inlined_call_operand.vmem [shape: f32[2,360,128], index: 0, kind: input, shape index: {}]   ;;  %s7307_s1 = inlined_call_operand.vmem [shape: bf16[9,128,128], index: 1, kind: input, shape index: {}]   ;;  %s7308_s2 = inlined_call_operand.vmem [shape: f32[1,128], index: 2, kind: input, shape index: {}]   ;;  %s7309_s3 = inlined_call_operand.vmem [shape: f32[1,128], index: 3, kind: input, shape index: {}]   ;;  %s7310_s4 = inlined_call_operand.vmem [shape: f32[312,1], index: 4, kind: input, shape index: {}]   ;;  %s7311_s5 = inlined_call_operand.vmem [shape: bf16[2,376,128], index: 5, kind: output, shape index: {}]  }
   0x1   :  { %s5978_s20 = smov 0  }
   0x2 LB: > { %s34_s21 = sadd.s32 1, %s5937_s19  ;;  %p4320_p0 = scmp.ge.s32.totalorder %s5941_s20, 1  ;;  %s5941_s20 = sphi %s5978_s20, %s15_s20   ;;  %s5937_s19 = sphi %s5976_s19, %s7392_s19   ;;  %s5933_s18 = sphi %s5974_s18, %s7391_s18  }
   0x3   : > { %p36_p1 = scmp.ge.s32.totalorder %s34_s21, 2  ;;  %p245_p2 = scmp.lt.s32.totalorder %s5941_s20, 3 }
   0x5   : > { %s7394_s21 = smov (%p36_p1, %s34_s21), 0  ;;  %p246_p3 = pnand %p4320_p0, %p245_p2 }
   0x7   : > { %249 = sbr.rel (%p246_p3) target bundleno = 628 (0x274), region = 40 }
   0xe   : > { %v5839_v0 = vld [vmem:[%s7307_s1 + $0x40] sm:$0xff]   ;;  %p293_p4 = scmp.lt.s32.totalorder %s5933_s18, 1  ;;  %v5841_v2 = vld [vmem:[%s7307_s1 + $0x48] sm:$0xff]   ;;  %v5843_v4 = vld [vmem:[%s7307_s1 + $0x50] sm:$0xff]   ;;  %vm424_vm0 = vsmask.f32 7424 }
   0xf   : > { %v5840_v1 = vld [vmem:[%s7307_s1 + $0x100] sm:$0xff]   ;;  %4971 = vmatprep.subr.bf16.mxu1 %v5839_v0  ;;  %v5842_v3 = vld [vmem:[%s7307_s1 + $0x108] sm:$0xff]   ;;  %v5844_v5 = vld [vmem:[%s7307_s1 + $0x110] sm:$0xff]   ;;  %vm1778_vm1 = vsmask.f32 6400  ;;  %vm2179_vm2 = vcmask 1045504  }
  0x10   : > { %5195 = vmatprep.subr.bf16.mxu0 %v5840_v1  ;;  %4972 = vmatpush3.bf16.msra.mxu1 %v5839_v0  ;;  %s7396_s18 = smov (!%p293_p4, %s5933_s18), 1  ;;  %v5845_v6 = vld [vmem:[%s7307_s1 + $0x58] sm:$0xff]   ;;  %v5847_v8 = vld [vmem:[%s7307_s1 + $0x60] sm:$0xff]   ;;  %v5849_v10 = vld [vmem:[%s7307_s1 + $0x68] sm:$0xff]   ;;  %vm1121_vm3 = vcmask 1046528   ;;  %vm3237_vm5 = vcmask 1044480  }
  0x11   : > { %5196 = vmatpush3.bf16.msra.mxu0 %v5840_v1  ;;  %4973 = vmatprep.subr.bf16.mxu1 %v5841_v2  ;;  %v5846_v7 = vld [vmem:[%s7307_s1 + $0x118] sm:$0xff]   ;;  %s5810_s13 = smul.u32 360, %s7396_s18  ;;  %v5848_v9 = vld [vmem:[%s7307_s1 + $0x120] sm:$0xff]   ;;  %v5850_v11 = vld [vmem:[%s7307_s1 + $0x128] sm:$0xff]   ;;  %vm2836_vm4 = vsmask.f32 5376 }
  0x12   : > { %5197 = vmatprep.subr.bf16.mxu0 %v5842_v3  ;;  %v5851_v19 = vld [vmem:[%s7307_s1 + $0x70] sm:$0xff]   ;;  %v5853_v33 = vld [vmem:[%s7307_s1 + $0x78] sm:$0xff]   ;;  %v5855_v59 = vld [vmem:[%s7307_s1] sm:$0xff]   ;;  %s5811_s22 = smul.u32 188, %s7396_s18 }
  0x13   : > { %s6028_s24 = scalar_lea.vmem %s7306_s0, %s5810_s13  ;;  %v5852_v30 = vld [vmem:[%s7307_s1 + $0x130] sm:$0xff]   ;;  %v5854_v48 = vld [vmem:[%s7307_s1 + $0x138] sm:$0xff]   ;;  %v5856_v0 = vld [vmem:[%s7307_s1 + $0x140] sm:$0xff]  }
  0x14   : > { %4974 = vmatpush3.bf16.msra.mxu1 %v5841_v2  ;;  %v325_v12 = vld [vmem:[%s6028_s24] sm:$0xff]  ;;  %v326_v13 = vld [vmem:[%s6028_s24 + $0x8] sm:$0xff]  ;;  %v327_v14 = vld [vmem:[%s6028_s24 + $0x10] sm:$0xff]  ;;  %s6627_s18 = scalar_lea.vmem %s7311_s5, %s5811_s22 }
  0x15   : > { %5198 = vmatpush3.bf16.msra.mxu0 %v5842_v3  ;;  %4975 = vmatprep.subr.bf16.mxu1 %v5843_v4  ;;  %v328_v15 = vld [vmem:[%s6028_s24 + $0x18] sm:$0xff]  ;;  %v6040_v16 = vpack.c.bf16 %v326_v13, %v325_v12  ;;  %v329_v17 = vld [vmem:[%s6028_s24 + $0x20] sm:$0xff]  ;;  %v330_v18 = vld [vmem:[%s6028_s24 + $0x28] sm:$0xff] }
  0x16   : > { %5199 = vmatprep.subr.bf16.mxu0 %v5844_v5  ;;  %v6047_v20 = vpack.c.bf16 %v328_v15, %v327_v14  ;;  %v6049_v21 = vpack.c.bf16 %v330_v18, %v329_v17  ;;  %v331_v24 = vld [vmem:[%s6028_s24 + $0x30] sm:$0xff]  ;;  %v332_v25 = vld [vmem:[%s6028_s24 + $0x38] sm:$0xff]  ;;  %v333_v38 = vld [vmem:[%s6028_s24 + $0x40] sm:$0xff] }
  0x17   : > { %v426_v22 = vshrl.u32 %v6040_v16, 16  ;;  %v428_v23 = vshll.u32 %v6040_v16, 16  ;;  %v6066_v32 = vpack.c.bf16 %v332_v25, %v331_v24  ;;  %v334_v42 = vld [vmem:[%s6028_s24 + $0x48] sm:$0xff]  ;;  %v335_v43 = vld [vmem:[%s6028_s24 + $0x50] sm:$0xff]  ;;  %v336_v47 = vld [vmem:[%s6028_s24 + $0x58] sm:$0xff] }
  0x18   : > { %4976 = vmatpush3.bf16.msra.mxu1 %v5843_v4  ;;  %v433_v26 = vshll.u32 %v6047_v20, 16  ;;  %v437_v27 = vshrl.u32 %v6047_v20, 16  ;;  %v6058_v28 = vshll.u32 %v6049_v21, 16  ;;  %v6061_v29 = vshrl.u32 %v6049_v21, 16  ;;  %v337_v56 = vld [vmem:[%s6028_s24 + $0x60] sm:$0xff]  ;;  %v338_v57 = vld [vmem:[%s6028_s24 + $0x68] sm:$0xff] }
  0x19   : > { %5200 = vmatpush3.bf16.msra.mxu0 %v5844_v5  ;;  %4977 = vmatprep.subr.bf16.mxu1 %v5845_v6  ;;  %v430_v31 = vrot.slane %v428_v23, 1  ;;  %v6075_v41 = vshll.u32 %v6066_v32, 16  ;;  %v6080_v45 = vshrl.u32 %v6066_v32, 16  ;;  %v6082_v46 = vpack.c.bf16 %v334_v42, %v333_v38  ;;  %v5857_v15 = vld [vmem:[%s7307_s1 + $0x148] sm:$0xff]   ;;  %v341_v25 = vld [vmem:[%s6028_s24 + $0x80] sm:$0xff]  ;;  %v343_v42 = vld [vmem:[%s6028_s24 + $0x90] sm:$0xff] }
  0x1a   : > { %5201 = vmatprep.subr.bf16.mxu0 %v5846_v7  ;;  %v435_v34 = vrot.slane %v433_v26, 1  ;;  %v1779_v35 = vrot.slane %v437_v27, 1  ;;  %v1780_v36 = vrot.slane %v433_v26, 2  ;;  %v1782_v37 = vrot.slane %v6061_v29, 1  ;;  %v342_v26 = vld [vmem:[%s6028_s24 + $0x88] sm:$0xff] }
  0x1b   : > { %v431_v39 = vor.u32 %v430_v31, %v426_v22  ;;  %v1783_v40 = vrot.slane %v6058_v28, 2  ;;  %v1787_v51 = vrot.slane %v6075_v41, 2  ;;  %v443_v53 = vrot.slane %v6058_v28, 1 }
  0x1c   : > { %4978 = vmatpush3.bf16.msra.mxu1 %v5845_v6  ;;  %v1781_v44 = vor.u32 %v1780_v36, %v1779_v35  ;;  %v439_v52 = vor.u32 %v437_v27, %v435_v34  ;;  %v1786_v54 = vrot.slane %v6080_v45, 1  ;;  %v6093_v55 = vshll.u32 %v6082_v46, 16  ;;  %v5859_v36 = vld [vmem:[%s7307_s1 + $0x150] sm:$0xff]  }
  0x1d   : > { %5202 = vmatpush3.bf16.msra.mxu0 %v5846_v7  ;;  %4979 = vmatprep.subr.bf16.mxu1 %v5847_v8  ;;  %v436_v49 = vsel %vm424_vm0, %v431_v39, %v435_v34  ;;  %v1784_v50 = vor.u32 %v1783_v40, %v1782_v37  ;;  %v6102_v60 = vshrl.u32 %v6082_v46, 16  ;;  %v6104_v61 = vpack.c.bf16 %v336_v47, %v335_v43  ;;  %v339_v7 = vld [vmem:[%s6028_s24 + $0x70] sm:$0xff] }
  0x1e   : > { %5203 = vmatprep.subr.bf16.mxu0 %v5848_v9  ;;  %4987 = vmatprep.mubr.bf16.mxu1 %v436_v49  ;;  %v6106_v62 = vpack.c.bf16 %v338_v57, %v337_v56  ;;  %v1788_v63 = vor.u32 %v1787_v51, %v1786_v54  ;;  %v447_v1 = vor.u32 %v6061_v29, %v443_v53  ;;  %v1791_v2 = vrot.slane %v6093_v55, 2  ;;  %v5861_v39 = vld [vmem:[%s7307_s1 + $0x10] sm:$0xff]   ;;  %v345_v49 = vld [vmem:[%s6028_s24 + $0xa0] sm:$0xff] }
  0x1f   : > { %v1785_v58 = vsel %vm1778_vm1, %v1781_v44, %v1784_v50  ;;  %v451_v3 = vrot.slane %v6075_v41, 1  ;;  %v1790_v4 = vrot.slane %v6102_v60, 1  ;;  %v6116_v5 = vshll.u32 %v6104_v61, 16  ;;  %v344_v44 = vld [vmem:[%s6028_s24 + $0x98] sm:$0xff] }
  0x20   : > { %4980 = vmatpush3.bf16.msra.mxu1 %v5847_v8  ;;  %5211 = vmatprep.mubr.bf16.mxu0 %v1785_v58  ;;  %v6119_v6 = vshrl.u32 %v6104_v61, 16  ;;  %v340_v8 = vld [vmem:[%s6028_s24 + $0x78] sm:$0xff]  ;;  %v459_v13 = vrot.slane %v6093_v55, 1  ;;  %v1789_v14 = vsel %vm1778_vm1, %v1784_v50, %v1788_v63  ;;  %v6163_v40 = vpack.c.bf16 %v342_v26, %v341_v25  ;;  %v346_v50 = vld [vmem:[%s6028_s24 + $0xa8] sm:$0xff] }
  0x21   : > { %5204 = vmatpush3.bf16.msra.mxu0 %v5848_v9  ;;  %4981 = vmatprep.subr.bf16.mxu1 %v5849_v10  ;;  %v6124_v9 = vshll.u32 %v6106_v62, 16  ;;  %v1792_v12 = vor.u32 %v1791_v2, %v1790_v4  ;;  %v1795_v18 = vrot.slane %v6116_v5, 2  ;;  %v452_v22 = vsel %vm424_vm0, %v447_v1, %v451_v3 }
  0x22   : > { %5205 = vmatprep.subr.bf16.mxu0 %v5850_v11  ;;  %v1794_v17 = vrot.slane %v6119_v6, 1  ;;  %v455_v31 = vor.u32 %v6080_v45, %v451_v3  ;;  %v467_v34 = vrot.slane %v6116_v5, 1  ;;  %v6168_v47 = vshll.u32 %v6163_v40, 16  ;;  %v5864_v3 = vld [vmem:[%s7307_s1 + $0x18] sm:$0xff]  }
  0x23   : > { %v1799_v24 = vrot.slane %v6124_v9, 2  ;;  %v1793_v27 = vsel %vm1778_vm1, %v1788_v63, %v1792_v12  ;;  %v6181_v58 = vpack.c.bf16 %v344_v44, %v343_v42  ;;  %v5860_v63 = vld [vmem:[%s7307_s1 + $0x158] sm:$0xff]   ;;  %v6189_v2 = vpack.c.bf16 %v346_v50, %v345_v49 }
  0x24   : > { %4982 = vmatpush3.bf16.msra.mxu1 %v5849_v10  ;;  %v6127_v10 = vshrl.u32 %v6106_v62, 16  ;;  %v1796_v35 = vor.u32 %v1795_v18, %v1794_v17  ;;  %v460_v51 = vsel %vm424_vm0, %v455_v31, %v459_v13  ;;  %v1807_v1 = vrot.slane %v6168_v47, 2  ;;  %v348_v17 = vld [vmem:[%s6028_s24 + $0xb8] sm:$0xff] }
  0x25   : > { %5206 = vmatpush3.bf16.msra.mxu0 %v5850_v11  ;;  %4983 = vmatprep.subr.bf16.mxu1 %v5851_v19  ;;  %v444_v11 = vsel %vm424_vm0, %v439_v52, %v443_v53  ;;  %v475_v53 = vrot.slane %v6124_v9, 1  ;;  %v471_v4 = vor.u32 %v6119_v6, %v467_v34  ;;  %v491_v42 = vrot.slane %v6168_v47, 1 }
  0x26   : > { %5207 = vmatprep.subr.bf16.mxu0 %v5852_v30  ;;  %v1798_v23 = vrot.slane %v6127_v10, 1  ;;  %v1797_v54 = vsel %vm1778_vm1, %v1792_v12, %v1796_v35 }
  0x27   : > { %v476_v25 = vsel %vm424_vm0, %v471_v4, %v475_v53 }
  0x28   : > { %4984 = vmatpush3.bf16.msra.mxu1 %v5851_v19  ;;  %v6137_v19 = vpack.c.bf16 %v340_v8, %v339_v7  ;;  %v1800_v43 = vor.u32 %v1799_v24, %v1798_v23  ;;  %v5862_v7 = vld [vmem:[%s7307_s1 + $0x160] sm:$0xff]   ;;  %v479_v8 = vor.u32 %v6127_v10, %v475_v53  ;;  %v6212_v23 = vshrl.u32 %v6189_v2, 16 }
  0x29   : > { %5208 = vmatpush3.bf16.msra.mxu0 %v5852_v30  ;;  %4985 = vmatprep.subr.bf16.mxu1 %v5853_v33  ;;  %v5858_v30 = vld [vmem:[%s7307_s1 + $0x8] sm:$0xff]   ;;  %v5867_v24 = vld [vmem:[%s7307_s1 + $0x20] sm:$0xff]  }
  0x2a   : > { %5209 = vmatprep.subr.bf16.mxu0 %v5854_v48  ;;  %v6155_v37 = vshll.u32 %v6137_v19, 16  ;;  %v6158_v38 = vshrl.u32 %v6137_v19, 16 }
  0x2c   : > { %4986 = vmatpush3.bf16.msra.mxu1 %v5853_v33  ;;  %v463_v33 = vor.u32 %v6102_v60, %v459_v13  ;;  %v1802_v56 = vrot.slane %v6158_v38, 1  ;;  %v1803_v57 = vrot.slane %v6155_v37, 2  ;;  %v6201_v13 = vshll.u32 %v6181_v58, 16 }
  0x2d   : > { %5210 = vmatpush3.bf16.msra.mxu0 %v5854_v48  ;;  %5027 = vmatprep.subr.bf16.mxu1 %v5855_v59  ;;  %v6171_v48 = vshrl.u32 %v6163_v40, 16 }
  0x2e   : > { %5251 = vmatprep.subr.bf16.mxu0 %v5856_v0  ;;  %v468_v52 = vsel %vm424_vm0, %v463_v33, %v467_v34  ;;  %v1804_v12 = vor.u32 %v1803_v57, %v1802_v56  ;;  %v1811_v31 = vrot.slane %v6201_v13, 2  ;;  %v499_v49 = vrot.slane %v6201_v13, 1  ;;  %v349_v57 = vld [vmem:[%s6028_s24 + $0xc0] sm:$0xff] }
  0x2f   : > { %4988 = vmatmul.mubr.bf16.vlgmr.msra.gmra.mrb[0].mxu1 %v444_v11  ;;  %v483_v11 = vrot.slane %v6155_v37, 1 }
  0x30   : > { %5212 = vmatmul.mubr.bf16.vlgmr.msra.gmra.mrb[0].mxu0 %v1789_v14  ;;  %5028 = vmatpush3.bf16.msra.mxu1 %v5855_v59  ;;  %v1801_v59 = vsel %vm1778_vm1, %v1796_v35, %v1800_v43  ;;  %v6204_v14 = vshrl.u32 %v6181_v58, 16  ;;  %v5863_v35 = vld [vmem:[%s7307_s1 + $0x168] sm:$0xff]  }
  0x31   : > { %5252 = vmatpush3.bf16.msra.mxu0 %v5856_v0  ;;  %4991 = vmatprep.mubr.bf16.mxu1 %v452_v22  ;;  %v1806_v0 = vrot.slane %v6171_v48, 1  ;;  %v6209_v22 = vshll.u32 %v6189_v2, 16  ;;  %v484_v26 = vsel %vm424_vm0, %v479_v8, %v483_v11  ;;  %v487_v44 = vor.u32 %v6158_v38, %v483_v11 }
  0x32   : > { %5253 = vmatprep.subr.bf16.mxu0 %v5857_v15  ;;  %5215 = vmatprep.mubr.bf16.mxu0 %v1793_v27  ;;  %v1805_v27 = vsel %vm1778_vm1, %v1800_v43, %v1804_v12  ;;  %v5869_v43 = vld [vmem:[%s7307_s1 + $0x28] sm:$0xff]  }
  0x33   : > { %5029 = vmatprep.subr.bf16.mxu1 %v5858_v30  ;;  %v1808_v18 = vor.u32 %v1807_v1, %v1806_v0  ;;  %v492_v0 = vsel %vm424_vm0, %v487_v44, %v491_v42  ;;  %v351_v1 = vld [vmem:[%s6028_s24 + $0xd0] sm:$0xff] }
  0x34   : > { %5030 = vmatpush3.bf16.msra.mxu1 %v5858_v30  ;;  %v1810_v30 = vrot.slane %v6204_v14, 1 }
  0x35   : > { %5254 = vmatpush3.bf16.msra.mxu0 %v5857_v15  ;;  %5031 = vmatprep.subr.bf16.mxu1 %v5861_v39  ;;  %v347_v15 = vld [vmem:[%s6028_s24 + $0xb0] sm:$0xff]  ;;  %v1809_v34 = vsel %vm1778_vm1, %v1804_v12, %v1808_v18 }
  0x36   : > { %5255 = vmatprep.subr.bf16.mxu0 %v5859_v36  ;;  %v6222_v33 = vpack.c.bf16 %v348_v17, %v347_v15  ;;  %v1812_v50 = vor.u32 %v1811_v31, %v1810_v30  ;;  %v5866_v15 = vld [vmem:[%s7307_s1 + $0x178] sm:$0xff]   ;;  %v507_v17 = vrot.slane %v6209_v22, 1 }
  0x37   : > { %4992 = vmatmul.mubr.bf16.gmra.mrb[4].mxu1 %v460_v51  ;;  %v5865_v51 = vld [vmem:[%s7307_s1 + $0x170] sm:$0xff]  }
  0x38   : > { %5216 = vmatmul.mubr.bf16.gmra.mrb[4].mxu0 %v1797_v54  ;;  %4995 = vmatprep.mubr.bf16.mxu1 %v468_v52  ;;  %v495_v52 = vor.u32 %v6171_v48, %v491_v42  ;;  %v6241_v53 = vshll.u32 %v6222_v33, 16  ;;  %v6244_v54 = vshrl.u32 %v6222_v33, 16  ;;  %v1813_v4 = vsel %vm1778_vm1, %v1808_v18, %v1812_v50  ;;  %v5873_v18 = vld [vmem:[%s7307_s1 + $0x38] sm:$0xff]   ;;  %v6286_v42 = vld [vmem:[%s7307_s1 + $0x80] sm:$0xff]  }
  0x39   : > { %5256 = vmatpush3.bf16.msra.mxu0 %v5859_v36  ;;  %5219 = vmatprep.mubr.bf16.mxu0 %v1801_v59  ;;  %v1814_v36 = vrot.slane %v6212_v23, 1  ;;  %v350_v59 = vld [vmem:[%s6028_s24 + $0xc8] sm:$0xff]  ;;  %v511_v30 = vor.u32 %v6212_v23, %v507_v17 }
  0x3a   : > { %5257 = vmatprep.subr.bf16.mxu0 %v5860_v63  ;;  %5032 = vmatpush3.bf16.msra.mxu1 %v5861_v39  ;;  %v1815_v39 = vrot.slane %v6209_v22, 2  ;;  %7349 = vst [vmem:[#allocation2_spill] sm:$0xff] %v6241_v53  ;;  %7350 = vst [vmem:[#allocation3_spill] sm:$0xff] %v6244_v54  ;;  %v1818_v8 = vrot.slane %v6244_v54, 1  ;;  %v1819_v11 = vrot.slane %v6241_v53, 2  ;;  %v515_v31 = vrot.slane %v6241_v53, 1 }
  0x3b   : > { %5033 = vmatprep.subr.bf16.mxu1 %v5864_v3 }
  0x3c   : > { %v1816_v56 = vor.u32 %v1815_v39, %v1814_v36  ;;  %v5868_v36 = vld [vmem:[%s7307_s1 + $0x180] sm:$0xff]  }
  0x3d   : > { %5258 = vmatpush3.bf16.msra.mxu0 %v5860_v63  ;;  %v5871_v63 = vld [vmem:[%s7307_s1 + $0x30] sm:$0xff]  }
  0x3e   : > { %5259 = vmatprep.subr.bf16.mxu0 %v5862_v7  ;;  %5034 = vmatpush3.bf16.msra.mxu1 %v5864_v3  ;;  %v352_v3 = vld [vmem:[%s6028_s24 + $0xd8] sm:$0xff]  ;;  %v1817_v12 = vsel %vm1778_vm1, %v1812_v50, %v1816_v56  ;;  %v354_v50 = vld [vmem:[%s6028_s24 + $0xe8] sm:$0xff] }
  0x3f   : > { %4996 = vmatmul.mubr.bf16.gmra.mrb[8].mxu1 %v476_v25  ;;  %5035 = vmatprep.subr.bf16.mxu1 %v5867_v24  ;;  %v503_v25 = vor.u32 %v6204_v14, %v499_v49 }
  0x40   : > { %5220 = vmatmul.mubr.bf16.gmra.mrb[8].mxu0 %v1805_v27  ;;  %4999 = vmatprep.mubr.bf16.mxu1 %v484_v26  ;;  %v6269_v26 = vpack.c.bf16 %v352_v3, %v351_v1  ;;  %v6271_v27 = vor.u32 %v1819_v11, %v1818_v8  ;;  %v357_v1 = vld [vmem:[%s6028_s24 + $0x100] sm:$0xff]  ;;  %v2183_v8 = vrot.slane %v6066_v32, 2 }
  0x41   : > { %5260 = vmatpush3.bf16.msra.mxu0 %v5862_v7  ;;  %5223 = vmatprep.mubr.bf16.mxu0 %v1809_v34  ;;  %v500_v7 = vsel %vm424_vm0, %v495_v52, %v499_v49  ;;  %v2180_v34 = vrot.slane %v6047_v20, 2  ;;  %v353_v49 = vld [vmem:[%s6028_s24 + $0xe0] sm:$0xff]  ;;  %v516_v52 = vsel %vm424_vm0, %v511_v30, %v515_v31 }
  0x42   : > { %5261 = vmatprep.subr.bf16.mxu0 %v5863_v35  ;;  %5036 = vmatpush3.bf16.msra.mxu1 %v5867_v24  ;;  %v6263_v24 = vpack.c.bf16 %v350_v59, %v349_v57  ;;  %7351 = vst [vmem:[#allocation4_spill] sm:$0xff] %v6271_v27  ;;  %v6290_v44 = vshll.u32 %v6269_v26, 16  ;;  %v355_v59 = vld [vmem:[%s6028_s24 + $0xf0] sm:$0xff] }
  0x43   : > { %5037 = vmatprep.subr.bf16.mxu1 %v5869_v43 }
  0x44   : > { %v6281_v39 = vshll.u32 %v6263_v24, 16  ;;  %7353 = vst [vmem:[#allocation6_spill] sm:$0xff] %v6290_v44  ;;  %v6298_v57 = vshrl.u32 %v6263_v24, 16  ;;  %v531_v11 = vrot.slane %v6290_v44, 1 }
  0x45   : > { %5262 = vmatpush3.bf16.msra.mxu0 %v5863_v35  ;;  %v2181_v35 = vrot.slane %v6049_v21, 2 }
  0x46   : > { %5263 = vmatprep.subr.bf16.mxu0 %v5865_v51  ;;  %5038 = vmatpush3.bf16.msra.mxu1 %v5869_v43  ;;  %7352 = vst [vmem:[#allocation5_spill] sm:$0xff] %v6281_v39  ;;  %v508_v43 = vsel %vm424_vm0, %v503_v25, %v507_v17  ;;  %7354 = vst [vmem:[#allocation7_spill] sm:$0xff] %v6298_v57  ;;  %v523_v3 = vrot.slane %v6281_v39, 1  ;;  %v2185_v17 = vrot.slane %v6082_v46, 2  ;;  %v359_v25 = vld [vmem:[%s6028_s24 + $0x110] sm:$0xff] }
  0x47   : > { %5000 = vmatmul.mubr.bf16.gmra.mrb[12].mxu1 %v492_v0  ;;  %5039 = vmatprep.subr.bf16.mxu1 %v5871_v63  ;;  %v2182_v0 = vsel %vm2179_vm2, %v2180_v34, %v2181_v35  ;;  %v360_v34 = vld [vmem:[%s6028_s24 + $0x118] sm:$0xff] }
  0x48   : > { %5224 = vmatmul.mubr.bf16.gmra.mrb[12].mxu0 %v1813_v4  ;;  %5003 = vmatprep.mubr.bf16.mxu1 %v500_v7  ;;  %v6305_v4 = vpack.c.bf16 %v354_v50, %v353_v49  ;;  %v519_v7 = vor.u32 %v6244_v54, %v515_v31  ;;  %v6331_v50 = vsel %vm2179_vm2, %v2181_v35, %v2183_v8 }
  0x49   : > { %5227 = vmatprep.mubr.bf16.mxu0 %v1817_v12  ;;  %5264 = vmatpush3.bf16.msra.mxu0 %v5865_v51  ;;  %v1821_v51 = vsel %vm1778_vm1, %v1816_v56, %v6271_v27  ;;  %v358_v56 = vld [vmem:[%s6028_s24 + $0x108] sm:$0xff]  ;;  %v6347_v35 = vpack.c.bf16 %v360_v34, %v359_v25  ;;  %v5872_v25 = vld [vmem:[%s7307_s1 + $0x190] sm:$0xff]  }
  0x4a   : > { %5265 = vmatprep.subr.bf16.mxu0 %v5866_v15  ;;  %5040 = vmatpush3.bf16.msra.mxu1 %v5871_v63  ;;  %v356_v63 = vld [vmem:[%s6028_s24 + $0xf8] sm:$0xff]  ;;  %v6320_v30 = vshll.u32 %v6305_v4, 16  ;;  %v524_v31 = vsel %vm424_vm0, %v519_v7, %v523_v3  ;;  %v361_v7 = vld [vmem:[%s6028_s24 + $0x120] sm:$0xff]  ;;  %v363_v34 = vld [vmem:[%s6028_s24 + $0x130] sm:$0xff] }
  0x4b   : > { %5041 = vmatprep.subr.bf16.mxu1 %v5873_v18  ;;  %v6312_v12 = vpack.c.bf16 %v356_v63, %v355_v59  ;;  %v6338_v59 = vshrl.u32 %v6305_v4, 16  ;;  %v6341_v63 = vsel %vm2179_vm2, %v2183_v8, %v2185_v17 }
  0x4c   : > { %7355 = vst [vmem:[#allocation8_spill] sm:$0xff] %v6320_v30 }
  0x4d   : > { %5266 = vmatpush3.bf16.msra.mxu0 %v5866_v15  ;;  %v527_v15 = vor.u32 %v6298_v57, %v523_v3  ;;  %v6328_v49 = vshll.u32 %v6312_v12, 16  ;;  %7358 = vst [vmem:[#allocation11_spill] sm:$0xff] %v6338_v59  ;;  %v539_v3 = vrot.slane %v6320_v30, 1  ;;  %v6357_v44 = vshrl.u32 %v6312_v12, 16 }
  0x4e   : > { %5307 = vmatprep.subr.bf16.mxu0 %v5868_v36  ;;  %5042 = vmatpush3.bf16.msra.mxu1 %v5873_v18  ;;  %v6316_v18 = vpack.c.bf16 %v358_v56, %v357_v1  ;;  %v2189_v56 = vrot.slane %v6106_v62, 2 }
  0x4f   : > { %5004 = vmatmul.mubr.bf16.gmra.mrb[16].mxu1 %v508_v43  ;;  %5083 = vmatprep.subr.bf16.mxu1 %v6286_v42  ;;  %v6325_v43 = vshrl.u32 %v6269_v26, 16  ;;  %7357 = vst [vmem:[#allocation10_spill] sm:$0xff] %v6328_v49  ;;  %v547_v27 = vrot.slane %v6328_v49, 1  ;;  %7360 = vst [vmem:[#allocation13_spill] sm:$0xff] %v6357_v44  ;;  %v543_v30 = vor.u32 %v6338_v59, %v539_v3 }
  0x50   : > { %5228 = vmatmul.mubr.bf16.gmra.mrb[16].mxu0 %v1821_v51  ;;  %5007 = vmatprep.mubr.bf16.mxu1 %v516_v52  ;;  %v532_v51 = vsel %vm424_vm0, %v527_v15, %v531_v11  ;;  %v5870_v52 = vld [vmem:[%s7307_s1 + $0x188] sm:$0xff]   ;;  %v6345_v1 = vshll.u32 %v6316_v18, 16 }
  0x51   : > { %5267 = vmatprep.mubr.bf16.mxu0 %v2182_v0  ;;  %7356 = vst [vmem:[#allocation9_spill] sm:$0xff] %v6325_v43  ;;  %v2187_v0 = vrot.slane %v6104_v61, 2  ;;  %v362_v15 = vld [vmem:[%s6028_s24 + $0x128] sm:$0xff]  ;;  %v535_v8 = vor.u32 %v6325_v43, %v531_v11  ;;  %v6368_v11 = vshrl.u32 %v6316_v18, 16  ;;  %v6372_v43 = vshll.u32 %v6347_v35, 16 }
  0x52   : > { %7359 = vst [vmem:[#allocation12_spill] sm:$0xff] %v6345_v1  ;;  %v555_v49 = vrot.slane %v6345_v1, 1  ;;  %v6375_v57 = vpack.c.bf16 %v362_v15, %v361_v7  ;;  %v548_v53 = vsel %vm424_vm0, %v543_v30, %v547_v27 }
  0x53   : > { %7361 = vst [vmem:[#allocation14_spill] sm:$0xff] %v6368_v11  ;;  %7362 = vst [vmem:[#allocation15_spill] sm:$0xff] %v6372_v43  ;;  %v540_v39 = vsel %vm424_vm0, %v535_v8, %v539_v3  ;;  %v6381_v59 = vsel %vm2179_vm2, %v2185_v17, %v2187_v0  ;;  %v6387_v1 = vsel %vm2179_vm2, %v2187_v0, %v2189_v56  ;;  %v563_v7 = vrot.slane %v6372_v43, 1  ;;  %v5876_v0 = vld [vmem:[%s7307_s1 + $0x1a0] sm:$0xff]  }
  0x54   : > { %7363 = vst [vmem:[#allocation16_spill] sm:$0xff] %v6375_v57  ;;  %v551_v3 = vor.u32 %v6357_v44, %v547_v27  ;;  %v2193_v17 = vrot.slane %v6163_v40, 2  ;;  %v6397_v30 = vshll.u32 %v6375_v57, 16  ;;  %v559_v27 = vor.u32 %v6368_v11, %v555_v49 }
  0x56   : > { %7366 = vst [vmem:[#allocation19_spill] sm:$0xff] %v6397_v30  ;;  %v556_v15 = vsel %vm424_vm0, %v551_v3, %v555_v49  ;;  %v571_v43 = vrot.slane %v6397_v30, 1  ;;  %v2197_v3 = vrot.slane %v6189_v2, 2 }
  0x57   : > { %5008 = vmatmul.mubr.bf16.gmra.mrb[20].mxu1 %v524_v31  ;;  %v364_v31 = vld [vmem:[%s6028_s24 + $0x138] sm:$0xff] }
  0x58   : > { %5268 = vmatmul.mubr.bf16.vlgmr.msra.gmra.mrb[0].mxu0 %v6331_v50  ;;  %5011 = vmatprep.mubr.bf16.mxu1 %v532_v51  ;;  %v2191_v51 = vrot.slane %v6137_v19, 2  ;;  %v6384_v54 = vpack.c.bf16 %v364_v31, %v363_v34  ;;  %v564_v34 = vsel %vm424_vm0, %v559_v27, %v563_v7  ;;  %v5880_v27 = vld [vmem:[%s7307_s1 + $0x1b0] sm:$0xff]  }
  0x59   : > { %5308 = vmatpush3.bf16.msra.mxu0 %v5868_v36  ;;  %5271 = vmatprep.mubr.bf16.mxu0 %v6341_v63  ;;  %v5874_v36 = vld [vmem:[%s7307_s1 + $0x198] sm:$0xff]  }
  0x5a   : > { %5309 = vmatprep.subr.bf16.mxu0 %v5870_v52  ;;  %7364 = vst [vmem:[#allocation17_spill] sm:$0xff] %v6384_v54  ;;  %v6412_v8 = vsel %vm2179_vm2, %v2189_v56, %v2191_v51  ;;  %v6416_v31 = vsel %vm2179_vm2, %v2191_v51, %v2193_v17  ;;  %v2195_v56 = vrot.slane %v6181_v58, 2 }
  0x5c   : > { %v6438_v30 = vsel %vm2179_vm2, %v2195_v56, %v2197_v3 }
  0x5d   : > { %5310 = vmatpush3.bf16.msra.mxu0 %v5870_v52  ;;  %v6394_v52 = vshrl.u32 %v6347_v35, 16 }
  0x5e   : > { %5311 = vmatprep.subr.bf16.mxu0 %v5872_v25 }
  0x5f   : > { %5012 = vmatmul.mubr.bf16.gmra.mrb[24].mxu1 %v540_v39  ;;  %7365 = vst [vmem:[#allocation18_spill] sm:$0xff] %v6394_v52  ;;  %v6408_v39 = vshll.u32 %v6384_v54, 16  ;;  %v567_v49 = vor.u32 %v6394_v52, %v563_v7  ;;  %v6434_v7 = vsel %vm2179_vm2, %v2193_v17, %v2195_v56  ;;  %v2201_v17 = vrot.slane %v6263_v24, 2 }
  0x60   : > { %5272 = vmatmul.mubr.bf16.gmra.mrb[4].mxu0 %v6381_v59  ;;  %5015 = vmatprep.mubr.bf16.mxu1 %v548_v53  ;;  %v6405_v53 = vshrl.u32 %v6375_v57, 16 }
  0x61   : > { %5275 = vmatprep.mubr.bf16.mxu0 %v6387_v1  ;;  %5312 = vmatpush3.bf16.msra.mxu0 %v5872_v25  ;;  %7368 = vst [vmem:[#allocation21_spill] sm:$0xff] %v6408_v39  ;;  %v5878_v25 = vld [vmem:[%s7307_s1 + $0x1a8] sm:$0xff]  }
  0x62   : > { %7367 = vst [vmem:[#allocation20_spill] sm:$0xff] %v6405_v53  ;;  %5313 = vmatprep.subr.bf16.mxu0 %v5874_v36  ;;  %v575_v51 = vor.u32 %v6405_v53, %v571_v43  ;;  %v366_v53 = vld [vmem:[%s6028_s24 + $0x148] sm:$0xff] }
  0x65   : > { %5314 = vmatpush3.bf16.msra.mxu0 %v5874_v36  ;;  %v579_v36 = vrot.slane %v6408_v39, 1  ;;  %v6444_v39 = vshrl.u32 %v6384_v54, 16 }
  0x66   : > { %5315 = vmatprep.subr.bf16.mxu0 %v5876_v0 }
  0x67   : > { %5016 = vmatmul.mubr.bf16.gmra.mrb[28].mxu1 %v556_v15  ;;  %v572_v15 = vsel %vm424_vm0, %v567_v49, %v571_v43  ;;  %7369 = vst [vmem:[#allocation22_spill] sm:$0xff] %v6444_v39  ;;  %v2199_v43 = vrot.slane %v6222_v33, 2  ;;  %v583_v49 = vor.u32 %v6444_v39, %v579_v36  ;;  %v365_v39 = vld [vmem:[%s6028_s24 + $0x140] sm:$0xff] }
  0x68   : > { %5276 = vmatmul.mubr.bf16.gmra.mrb[8].mxu0 %v6412_v8  ;;  %5019 = vmatprep.mubr.bf16.mxu1 %v564_v34  ;;  %v580_v34 = vsel %vm424_vm0, %v575_v51, %v579_v36  ;;  %v2205_v36 = vrot.slane %v6305_v4, 2  ;;  %v6513_v44 = vpack.c.bf16 %v366_v53, %v365_v39  ;;  %v5887_v53 = vld [vmem:[%s7307_s1 + $0xb0] sm:$0xff]  }
  0x69   : > { %5279 = vmatprep.mubr.bf16.mxu0 %v6416_v31  ;;  %5316 = vmatpush3.bf16.msra.mxu0 %v5876_v0  ;;  %v5882_v0 = vld [vmem:[%s7307_s1 + $0x1b8] sm:$0xff]   ;;  %v6457_v56 = vsel %vm2179_vm2, %v2197_v3, %v2199_v43  ;;  %v6460_v51 = vsel %vm2179_vm2, %v2199_v43, %v2201_v17  ;;  %v5879_v43 = vld [vmem:[%s7307_s1 + $0x90] sm:$0xff]  }
  0x6a   : > { %5317 = vmatprep.subr.bf16.mxu0 %v5878_v25 }
  0x6d   : > { %5318 = vmatpush3.bf16.msra.mxu0 %v5878_v25  ;;  %v6453_v25 = vld [vmem:[%s7307_s1 + $0x1c0] sm:$0xff]  }
  0x6e   : > { %5319 = vmatprep.subr.bf16.mxu0 %v5880_v27 }
  0x6f   : > { %5020 = vmatmul.mubr.bf16.gmra.mrb[32].mxu1 %v572_v15 }
  0x70   : > { %5280 = vmatmul.mubr.bf16.gmra.mrb[12].mxu0 %v6434_v7  ;;  %5023 = vmatprep.mubr.bf16.mxu1 %v580_v34  ;;  %v5877_v34 = vld [vmem:[%s7307_s1 + $0x88] sm:$0xff]  }
  0x71   : > { %5283 = vmatprep.mubr.bf16.mxu0 %v6438_v30  ;;  %5320 = vmatpush3.bf16.msra.mxu0 %v5880_v27  ;;  %v2203_v27 = vrot.slane %v6269_v26, 2 }
  0x72   : > { %5321 = vmatprep.subr.bf16.mxu0 %v5882_v0 }
  0x73   : > { %v6469_v3 = vsel %vm2179_vm2, %v2201_v17, %v2203_v27  ;;  %v6472_v15 = vsel %vm2179_vm2, %v2203_v27, %v2205_v36  ;;  %v2209_v17 = vrot.slane %v6316_v18, 2  ;;  %v5881_v27 = vld [vmem:[%s7307_s1 + $0x98] sm:$0xff]  }
  0x75   : > { %5322 = vmatpush3.bf16.msra.mxu0 %v5882_v0  ;;  %v2207_v0 = vrot.slane %v6312_v12, 2 }
  0x76   : > { %5363 = vmatprep.subr.bf16.mxu0 %v6453_v25 }
  0x77   : > { %5024 = vmatmul.mubr.bf16.gmra.mrb[36].mxu1 %v583_v49  ;;  %v6488_v49 = vsel %vm2179_vm2, %v2205_v36, %v2207_v0  ;;  %v2213_v36 = vrot.slane %v6375_v57, 2 }
  0x78   : > { %5284 = vmatmul.mubr.bf16.gmra.mrb[16].mxu0 %v6457_v56  ;;  %5043 = vmatprep.mubr.bf16.mxu1 %v6040_v16 }
  0x79   : > { %5287 = vmatprep.mubr.bf16.mxu0 %v6460_v51 }
  0x7f   : > { %5044 = vmatmul.mubr.bf16.vlgmr.msra.gmra.mrb[0].mxu1 %v6047_v20 }
  0x80   : > { %5288 = vmatmul.mubr.bf16.gmra.mrb[20].mxu0 %v6469_v3  ;;  %5084 = vmatpush3.bf16.msra.mxu1 %v6286_v42  ;;  %v6491_v42 = vsel %vm2179_vm2, %v2207_v0, %v2209_v17  ;;  %v5883_v0 = vld [vmem:[%s7307_s1 + $0xa0] sm:$0xff]  }
  0x81   : > { %5047 = vmatprep.mubr.bf16.mxu1 %v6049_v21  ;;  %5291 = vmatprep.mubr.bf16.mxu0 %v6472_v15 }
  0x82   : > { %5085 = vmatprep.subr.bf16.mxu1 %v5877_v34 }
  0x84   : > { %5086 = vmatpush3.bf16.msra.mxu1 %v5877_v34  ;;  %v2211_v34 = vrot.slane %v6347_v35, 2 }
  0x85   : > { %5087 = vmatprep.subr.bf16.mxu1 %v5879_v43 }
  0x86   : > { %v6508_v52 = vsel %vm2179_vm2, %v2209_v17, %v2211_v34  ;;  %v6511_v11 = vsel %vm2179_vm2, %v2211_v34, %v2213_v36  ;;  %v2215_v17 = vrot.slane %v6384_v54, 2 }
  0x87   : > { %5048 = vmatmul.mubr.bf16.gmra.mrb[4].mxu1 %v6066_v32 }
  0x88   : > { %5292 = vmatmul.mubr.bf16.gmra.mrb[24].mxu0 %v6488_v49  ;;  %5051 = vmatprep.mubr.bf16.mxu1 %v6082_v46  ;;  %v6530_v39 = vsel %vm2179_vm2, %v2213_v36, %v2215_v17  ;;  %v5891_v36 = vld [vmem:[%s7307_s1 + $0xc0] sm:$0xff]  }
  0x89   : > { %5295 = vmatprep.mubr.bf16.mxu0 %v6491_v42  ;;  %5088 = vmatpush3.bf16.msra.mxu1 %v5879_v43  ;;  %v5885_v43 = vld [vmem:[%s7307_s1 + $0xa8] sm:$0xff]  }
  0x8a   : > { %5089 = vmatprep.subr.bf16.mxu1 %v5881_v27 }
  0x8d   : > { %5090 = vmatpush3.bf16.msra.mxu1 %v5881_v27  ;;  %v6524_v27 = vrot.slane %v6513_v44, 2 }
  0x8e   : > { %5091 = vmatprep.subr.bf16.mxu1 %v5883_v0 }
  0x8f   : > { %5052 = vmatmul.mubr.bf16.gmra.mrb[8].mxu1 %v6104_v61  ;;  %v6534_v34 = vsel %vm2179_vm2, %v2215_v17, %v6524_v27  ;;  %v5888_v17 = vld [vmem:[%s7307_s1 + $0x1d0] sm:$0xff]  }
  0x90   : > { %5296 = vmatmul.mubr.bf16.gmra.mrb[28].mxu0 %v6508_v52  ;;  %5055 = vmatprep.mubr.bf16.mxu1 %v6106_v62 }
  0x91   : > { %5299 = vmatprep.mubr.bf16.mxu0 %v6511_v11  ;;  %5092 = vmatpush3.bf16.msra.mxu1 %v5883_v0  ;;  %v5889_v0 = vld [vmem:[%s7307_s1 + $0xb8] sm:$0xff]  }
  0x92   : > { %5093 = vmatprep.subr.bf16.mxu1 %v5885_v43 }
  0x95   : > { %5094 = vmatpush3.bf16.msra.mxu1 %v5885_v43  ;;  %v5886_v43 = vld [vmem:[%s7307_s1 + $0x1c8] sm:$0xff]  }
  0x96   : > { %5095 = vmatprep.subr.bf16.mxu1 %v5887_v53 }
  0x97   : > { %5056 = vmatmul.mubr.bf16.gmra.mrb[12].mxu1 %v6137_v19 }
  0x98   : > { %5300 = vmatmul.mubr.bf16.gmra.mrb[32].mxu0 %v6530_v39  ;;  %5059 = vmatprep.mubr.bf16.mxu1 %v6163_v40 }
  0x99   : > { %5303 = vmatprep.mubr.bf16.mxu0 %v6534_v34  ;;  %5096 = vmatpush3.bf16.msra.mxu1 %v5887_v53 }
  0x9a   : > { %5097 = vmatprep.subr.bf16.mxu1 %v5889_v0 }
  0x9d   : > { %5098 = vmatpush3.bf16.msra.mxu1 %v5889_v0  ;;  %v5893_v0 = vld [vmem:[%s7307_s1 + $0xc8] sm:$0xff]  }
  0x9e   : > { %5139 = vmatprep.subr.bf16.mxu1 %v5891_v36 }
  0x9f   : > { %5060 = vmatmul.mubr.bf16.gmra.mrb[16].mxu1 %v6181_v58 }
  0xa0   : > { %5304 = vmatmul.mubr.bf16.gmra.mrb[36].mxu0 %v6524_v27  ;;  %5063 = vmatprep.mubr.bf16.mxu1 %v6189_v2 }
  0xa1   : > { %5323 = vmatprep.mubr.bf16.mxu0 %v6331_v50  ;;  %v5890_v50 = vld [vmem:[%s7307_s1 + $0x1d8] sm:$0xff]  }
  0xa7   : > { %5064 = vmatmul.mubr.bf16.gmra.mrb[20].mxu1 %v6222_v33 }
  0xa8   : > { %5324 = vmatmul.mubr.bf16.vlgmr.msra.gmra.mrb[0].mxu0 %v6341_v63  ;;  %5067 = vmatprep.mubr.bf16.mxu1 %v6263_v24  ;;  %v5894_v63 = vld [vmem:[%s7307_s1 + $0x1e8] sm:$0xff]  }
  0xa9   : > { %5364 = vmatpush3.bf16.msra.mxu0 %v6453_v25  ;;  %5327 = vmatprep.mubr.bf16.mxu0 %v6381_v59  ;;  %v5892_v59 = vld [vmem:[%s7307_s1 + $0x1e0] sm:$0xff]  }
  0xaa   : > { %5365 = vmatprep.subr.bf16.mxu0 %v5886_v43  ;;  %v6593_v25 = vld [vmem:[%s7307_s1 + $0x200] sm:$0xff]  }
  0xad   : > { %5366 = vmatpush3.bf16.msra.mxu0 %v5886_v43  ;;  %v5895_v43 = vld [vmem:[%s7307_s1 + $0xd0] sm:$0xff]  }
  0xae   : > { %5367 = vmatprep.subr.bf16.mxu0 %v5888_v17 }
  0xaf   : > { %5068 = vmatmul.mubr.bf16.gmra.mrb[24].mxu1 %v6269_v26 }
  0xb0   : > { %5328 = vmatmul.mubr.bf16.gmra.mrb[4].mxu0 %v6387_v1  ;;  %5071 = vmatprep.mubr.bf16.mxu1 %v6305_v4  ;;  %v5896_v1 = vld [vmem:[%s7307_s1 + $0x1f0] sm:$0xff]  }
  0xb1   : > { %5331 = vmatprep.mubr.bf16.mxu0 %v6412_v8  ;;  %5368 = vmatpush3.bf16.msra.mxu0 %v5888_v17  ;;  %v5898_v8 = vld [vmem:[%s7307_s1 + $0x1f8] sm:$0xff]   ;;  %v3707_v17 = vld [vmem:[%s7310_s4] sm:$0xff] }
  0xb2   : > { %5369 = vmatprep.subr.bf16.mxu0 %v5890_v50 }
  0xb5   : > { %5370 = vmatpush3.bf16.msra.mxu0 %v5890_v50  ;;  %v5897_v50 = vld [vmem:[%s7307_s1 + $0xd8] sm:$0xff]  }
  0xb6   : > { %5371 = vmatprep.subr.bf16.mxu0 %v5892_v59 }
  0xb7   : > { %5072 = vmatmul.mubr.bf16.gmra.mrb[28].mxu1 %v6312_v12 }
  0xb8   : > { %5332 = vmatmul.mubr.bf16.gmra.mrb[8].mxu0 %v6416_v31  ;;  %5075 = vmatprep.mubr.bf16.mxu1 %v6316_v18  ;;  %v1122_v31 = vrot.slane %v6040_v16, 1  ;;  %v1125_v16 = vrot.slane %v6049_v21, 1 }
  0xb9   : > { %5335 = vmatprep.mubr.bf16.mxu0 %v6434_v7  ;;  %5372 = vmatpush3.bf16.msra.mxu0 %v5892_v59  ;;  %v1123_v7 = vrot.slane %v6047_v20, 1  ;;  %v1127_v20 = vrot.slane %v6066_v32, 1  ;;  %v1133_v59 = vrot.slane %v6106_v62, 1 }
  0xba   : > { %5373 = vmatprep.subr.bf16.mxu0 %v5894_v63 }
  0xbb   : > { %v1124_v53 = vsel %vm1121_vm3, %v1122_v31, %v1123_v7  ;;  %v367_v31 = vld [vmem:[%s6028_s24 + $0x150] sm:$0xff] }
  0xbd   : > { %5374 = vmatpush3.bf16.msra.mxu0 %v5894_v63  ;;  %v3708_v63 = vld [vmem:[%s7310_s4 + $0x8] sm:$0xff] }
  0xbe   : > { %5375 = vmatprep.subr.bf16.mxu0 %v5896_v1 }
  0xbf   : > { %5076 = vmatmul.mubr.bf16.gmra.mrb[32].mxu1 %v6347_v35 }
  0xc0   : > { %5336 = vmatmul.mubr.bf16.gmra.mrb[12].mxu0 %v6438_v30  ;;  %5079 = vmatprep.mubr.bf16.mxu1 %v6375_v57  ;;  %v6603_v30 = vsel %vm1121_vm3, %v1123_v7, %v1125_v16  ;;  %v5899_v7 = vld [vmem:[%s7307_s1 + $0xe0] sm:$0xff]  }
  0xc1   : > { %5339 = vmatprep.mubr.bf16.mxu0 %v6457_v56  ;;  %5376 = vmatpush3.bf16.msra.mxu0 %v5896_v1  ;;  %v6606_v56 = vsel %vm1121_vm3, %v1125_v16, %v1127_v20  ;;  %v1135_v1 = vrot.slane %v6137_v19, 1 }
  0xc2   : > { %5377 = vmatprep.subr.bf16.mxu0 %v5898_v8 }
  0xc3   : > { %v6670_v16 = vsel %vm1121_vm3, %v1133_v59, %v1135_v1 }
  0xc5   : > { %5378 = vmatpush3.bf16.msra.mxu0 %v5898_v8  ;;  %v3709_v8 = vld [vmem:[%s7310_s4 + $0x10] sm:$0xff] }
  0xc6   : > { %5419 = vmatprep.subr.bf16.mxu0 %v6593_v25 }
  0xc7   : > { %5080 = vmatmul.mubr.bf16.gmra.mrb[36].mxu1 %v6384_v54 }
  0xc8   : > { %5340 = vmatmul.mubr.bf16.gmra.mrb[16].mxu0 %v6460_v51  ;;  %5099 = vmatprep.mubr.bf16.mxu1 %v1124_v53  ;;  %v1129_v51 = vrot.slane %v6082_v46, 1 }
  0xc9   : > { %5343 = vmatprep.mubr.bf16.mxu0 %v6469_v3  ;;  %v1131_v3 = vrot.slane %v6104_v61, 1 }
  0xcb   : > { %v6667_v53 = vsel %vm1121_vm3, %v1131_v3, %v1133_v59 }
  0xcf   : > { %5100 = vmatmul.mubr.bf16.vlgmr.msra.gmra.mrb[0].mxu1 %v6603_v30 }
  0xd0   : > { %5344 = vmatmul.mubr.bf16.gmra.mrb[20].mxu0 %v6472_v15  ;;  %5140 = vmatpush3.bf16.msra.mxu1 %v5891_v36  ;;  %v5943_v15 = vmov 0   ;;  %v6641_v36 = vsel %vm1121_vm3, %v1129_v51, %v1131_v3  ;;  %v3710_v3 = vld [vmem:[%s7310_s4 + $0x18] sm:$0xff] }
  0xd1   : > { %5103 = vmatprep.mubr.bf16.mxu1 %v6606_v56  ;;  %5347 = vmatprep.mubr.bf16.mxu0 %v6488_v49  ;;  %3980 = vst [vmem:[%s6627_s18] sm:$0xf] %v5943_v15  ;;  %3981 = vst [vmem:[%s6627_s18 + $0x4] sm:$0xf] %v5943_v15  ;;  %v6638_v49 = vsel %vm1121_vm3, %v1127_v20, %v1129_v51  ;;  %v1137_v51 = vrot.slane %v6163_v40, 1 }
  0xd2   : > { %5141 = vmatprep.subr.bf16.mxu1 %v5893_v0  ;;  %5837 = vset.pattern.permute.xlu0 %v5943_v15  ;;  %3982 = vst [vmem:[%s6627_s18 + $0x8] sm:$0xf] %v5943_v15  ;;  %3983 = vst [vmem:[%s6627_s18 + $0xc] sm:$0xf] %v5943_v15 }
  0xd3   : > { %3984 = vst [vmem:[%s6627_s18 + $0xac] sm:$0xf] %v5943_v15  ;;  %3985 = vst [vmem:[%s6627_s18 + $0xb0] sm:$0xf] %v5943_v15  ;;  %3748 = vperm.xlu0 %5837, %v3707_v17   ;;  %5838 = vset.pattern.permute.xlu1 %v5943_v15  ;;  %v1139_v17 = vrot.slane %v6181_v58, 1  ;;  %v6697_v59 = vsel %vm1121_vm3, %v1135_v1, %v1137_v51  ;;  %v2841_v1 = vrot.slane %v6075_v41, 3 }
  0xd4   : > { %3986 = vst [vmem:[%s6627_s18 + $0xb4] sm:$0xf] %v5943_v15  ;;  %3987 = vst [vmem:[%s6627_s18 + $0xb8] sm:$0xf] %v5943_v15  ;;  %5142 = vmatpush3.bf16.msra.mxu1 %v5893_v0  ;;  %3758 = vperm.xlu1 %5838, %v3709_v8   ;;  %v5901_v0 = vld [vmem:[%s7307_s1 + $0xe8] sm:$0xff]   ;;  %v3717_v41 = vld [vmem:[%s7310_s4 + $0x50] sm:$0xff] }
  0xd5   : > { %5143 = vmatprep.subr.bf16.mxu1 %v5895_v43 }
  0xd7   : > { %5104 = vmatmul.mubr.bf16.gmra.mrb[4].mxu1 %v6638_v49  ;;  %3753 = vperm.xlu0 %5837, %v3708_v63   ;;  %v6703_v63 = vsel %vm1121_vm3, %v1137_v51, %v1139_v17 }
  0xd8   : > { %5348 = vmatmul.mubr.bf16.gmra.mrb[24].mxu0 %v6491_v42  ;;  %5107 = vmatprep.mubr.bf16.mxu1 %v6641_v36  ;;  %v368_v42 = vld [vmem:[%s6028_s24 + $0x158] sm:$0xff] }
  0xd9   : > { %5351 = vmatprep.mubr.bf16.mxu0 %v6508_v52  ;;  %5144 = vmatpush3.bf16.msra.mxu1 %v5895_v43  ;;  %v3711_v52 = vld [vmem:[%s7310_s4 + $0x20] sm:$0xff]  ;;  %v6672_v20 = vpack.c.bf16 %v368_v42, %v367_v31  ;;  %v3713_v43 = vld [vmem:[%s7310_s4 + $0x30] sm:$0xff]  ;;  %v2837_v31 = vrot.slane %v6061_v29, 2  ;;  %v2838_v42 = vrot.slane %v6058_v28, 3  ;;  %v1141_v29 = vrot.slane %v6189_v2, 1  ;;  %v3714_v28 = vld [vmem:[%s7310_s4 + $0x38] sm:$0xff] }
  0xda   : > { %5145 = vmatprep.subr.bf16.mxu1 %v5897_v50  ;;  %3763 = vperm.xlu1 %5838, %v3710_v3   ;;  %v3719_v3 = vld [vmem:[%s7310_s4 + $0x60] sm:$0xff] }
  0xdb   : > { %3768 = vperm.xlu0 %5837, %v3711_v52   ;;  %v2536_v15 = vrot.slane %v6672_v20, 2  ;;  %v5905_v52 = vld [vmem:[%s7307_s1 + $0xf8] sm:$0xff]   ;;  %v6729_v51 = vsel %vm1121_vm3, %v1139_v17, %v1141_v29  ;;  %v6745_v17 = vld [vmem:[%s7307_s1 + $0x100] sm:$0xff]  }
  0xdd   : > { %5146 = vmatpush3.bf16.msra.mxu1 %v5897_v50  ;;  %v3712_v50 = vld [vmem:[%s7310_s4 + $0x28] sm:$0xff]  ;;  %v2537_v8 = vsel %vm2179_vm2, %v6524_v27, %v2536_v15  ;;  %v2839_v27 = vor.u32 %v2838_v42, %v2837_v31  ;;  %v2849_v31 = vrot.slane %v6116_v5, 3  ;;  %v3721_v5 = vld [vmem:[%s7310_s4 + $0x70] sm:$0xff]  ;;  %v1147_v42 = vrot.slane %v6269_v26, 1 }
  0xde   : > { %5147 = vmatprep.subr.bf16.mxu1 %v5899_v7  ;;  %3773 = vperm.xlu1 %5838, %v3712_v50   ;;  %v2845_v50 = vrot.slane %v6093_v55, 3  ;;  %v1145_v55 = vrot.slane %v6263_v24, 1 }
  0xdf   : > { %5108 = vmatmul.mubr.bf16.gmra.mrb[8].mxu1 %v6667_v53  ;;  %3778 = vperm.xlu0 %5837, %v3713_v43  }
  0xe0   : > { %5352 = vmatmul.mubr.bf16.gmra.mrb[28].mxu0 %v6511_v11  ;;  %5111 = vmatprep.mubr.bf16.mxu1 %v6670_v16  ;;  %v5903_v11 = vld [vmem:[%s7307_s1 + $0xf0] sm:$0xff]  }
  0xe1   : > { %5355 = vmatprep.mubr.bf16.mxu0 %v6530_v39  ;;  %5148 = vmatpush3.bf16.msra.mxu1 %v5899_v7  ;;  %v3715_v39 = vld [vmem:[%s7310_s4 + $0x40] sm:$0xff]  ;;  %v2840_v7 = vrot.slane %v6080_v45, 2  ;;  %v1143_v45 = vrot.slane %v6222_v33, 1 }
  0xe2   : > { %5149 = vmatprep.subr.bf16.mxu1 %v5901_v0  ;;  %3783 = vperm.xlu1 %5838, %v3714_v28   ;;  %v6769_v28 = vsel %vm1121_vm3, %v1145_v55, %v1147_v42 }
  0xe3   : > { %3788 = vperm.xlu0 %5837, %v3715_v39   ;;  %v6735_v43 = vsel %vm1121_vm3, %v1141_v29, %v1143_v45 }
  0xe5   : > { %5150 = vmatpush3.bf16.msra.mxu1 %v5901_v0  ;;  %v2842_v0 = vor.u32 %v2841_v1, %v2840_v7  ;;  %v6762_v1 = vsel %vm1121_vm3, %v1143_v45, %v1145_v55  ;;  %v5902_v45 = vld [vmem:[%s7307_s1 + $0x208] sm:$0xff]  }
  0xe6   : > { %5151 = vmatprep.subr.bf16.mxu1 %v5903_v11 }
  0xe7   : > { %5112 = vmatmul.mubr.bf16.gmra.mrb[12].mxu1 %v6697_v59  ;;  %3798 = vperm.xlu0 %5837, %v3717_v41   ;;  %v2843_v39 = vsel %vm2836_vm4, %v2839_v27, %v2842_v0  ;;  %v2852_v41 = vrot.slane %v6127_v10, 2  ;;  %v2853_v27 = vrot.slane %v6124_v9, 3  ;;  %v1149_v10 = vrot.slane %v6305_v4, 1  ;;  %v3722_v9 = vld [vmem:[%s7310_s4 + $0x78] sm:$0xff] }
  0xe8   : > { %5356 = vmatmul.mubr.bf16.gmra.mrb[32].mxu0 %v6534_v34  ;;  %5115 = vmatprep.mubr.bf16.mxu1 %v6703_v63  ;;  %v3716_v34 = vld [vmem:[%s7310_s4 + $0x48] sm:$0xff] }
  0xe9   : > { %5359 = vmatprep.mubr.bf16.mxu0 %v2537_v8  ;;  %5152 = vmatpush3.bf16.msra.mxu1 %v5903_v11  ;;  %v2844_v11 = vrot.slane %v6102_v60, 2  ;;  %v2848_v8 = vrot.slane %v6119_v6, 2  ;;  %v3718_v60 = vld [vmem:[%s7310_s4 + $0x58] sm:$0xff] }
  0xea   : > { %5153 = vmatprep.subr.bf16.mxu1 %v5905_v52  ;;  %3793 = vperm.xlu1 %5838, %v3716_v34  }
  0xeb   : > { %3808 = vperm.xlu0 %5837, %v3719_v3   ;;  %v2846_v6 = vor.u32 %v2845_v50, %v2844_v11  ;;  %v2850_v7 = vor.u32 %v2849_v31, %v2848_v8  ;;  %v2856_v3 = vrot.slane %v6158_v38, 2  ;;  %v2857_v11 = vrot.slane %v6155_v37, 3  ;;  %v3724_v8 = vld [vmem:[%s7310_s4 + $0x88] sm:$0xff] }
  0xec   : > { %v2854_v37 = vor.u32 %v2853_v27, %v2852_v41  ;;  %v1151_v38 = vrot.slane %v6312_v12, 1  ;;  %v6797_v31 = vsel %vm1121_vm3, %v1147_v42, %v1149_v10  ;;  %v2864_v42 = vrot.slane %v6204_v14, 2  ;;  %v5907_v27 = vld [vmem:[%s7307_s1 + $0x220] sm:$0xff]  }
  0xed   : > { %5154 = vmatpush3.bf16.msra.mxu1 %v5905_v52  ;;  %v3723_v52 = vld [vmem:[%s7310_s4 + $0x80] sm:$0xff]  ;;  %v2847_v29 = vsel %vm2836_vm4, %v2842_v0, %v2846_v6  ;;  %v2851_v34 = vsel %vm2836_vm4, %v2846_v6, %v2850_v7  ;;  %v3725_v0 = vld [vmem:[%s7310_s4 + $0x90] sm:$0xff]  ;;  %v2858_v50 = vor.u32 %v2857_v11, %v2856_v3  ;;  %v2861_v6 = vrot.slane %v6168_v47, 3 }
  0xee   : > { %5475 = vmatprep.subr.bf16.mxu1 %v6745_v17  ;;  %3803 = vperm.xlu1 %5838, %v3718_v60   ;;  %v2855_v55 = vsel %vm2836_vm4, %v2850_v7, %v2854_v37  ;;  %v6804_v60 = vsel %vm1121_vm3, %v1149_v10, %v1151_v38  ;;  %v1153_v47 = vrot.slane %v6316_v18, 1  ;;  %v1155_v7 = vrot.slane %v6347_v35, 1  ;;  %v3731_v3 = vld [vmem:[%s7310_s4 + $0xc0] sm:$0xff] }
  0xef   : > { %5116 = vmatmul.mubr.bf16.gmra.mrb[16].mxu1 %v6729_v51  ;;  %3818 = vperm.xlu0 %5837, %v3721_v5   ;;  %v2860_v5 = vrot.slane %v6171_v48, 2  ;;  %v3726_v48 = vld [vmem:[%s7310_s4 + $0x98] sm:$0xff] }
  0xf0   : > { %5360 = vmatmul.mubr.bf16.gmra.mrb[36].mxu0 %v2536_v15  ;;  %5119 = vmatprep.mubr.bf16.mxu1 %v6735_v43  ;;  %v3720_v15 = vld [vmem:[%s7310_s4 + $0x68] sm:$0xff]  ;;  %v6838_v10 = vsel %vm1121_vm3, %v1153_v47, %v1155_v7 }
  0xf1   : > { %5379 = vmatprep.mubr.bf16.mxu0 %v2843_v39  ;;  %v5904_v39 = vld [vmem:[%s7307_s1 + $0x210] sm:$0xff]   ;;  %v2862_v14 = vor.u32 %v2861_v6, %v2860_v5  ;;  %v6858_v6 = vrot.slane %v6384_v54, 1  ;;  %v1858_v54 = vshll.u32 %v6513_v44, 16 }
  0xf2   : > { %3813 = vperm.xlu1 %5838, %v3720_v15   ;;  %v2859_v15 = vsel %vm2836_vm4, %v2854_v37, %v2858_v50 }
  0xf3   : > { %3828 = vperm.xlu0 %5837, %v3723_v52   ;;  %v2865_v52 = vrot.slane %v6201_v13, 3  ;;  %v3729_v13 = vld [vmem:[%s7310_s4 + $0xb0] sm:$0xff]  ;;  %v2863_v11 = vsel %vm2836_vm4, %v2858_v50, %v2862_v14 }
  0xf4   : > { %v3733_v50 = vld [vmem:[%s7310_s4 + $0xd0] sm:$0xff] }
  0xf5   : > { %v2866_v41 = vor.u32 %v2865_v52, %v2864_v42  ;;  %v5909_v42 = vld [vmem:[%s7307_s1 + $0x230] sm:$0xff]   ;;  %v3732_v52 = vld [vmem:[%s7310_s4 + $0xc8] sm:$0xff] }
  0xf6   : > { %3823 = vperm.xlu1 %5838, %v3722_v9   ;;  %v2868_v9 = vrot.slane %v6212_v23, 2  ;;  %v3730_v23 = vld [vmem:[%s7310_s4 + $0xb8] sm:$0xff] }
  0xf7   : > { %5120 = vmatmul.mubr.bf16.gmra.mrb[20].mxu1 %v6762_v1  ;;  %3838 = vperm.xlu0 %5837, %v3725_v0   ;;  %v2869_v0 = vrot.slane %v6209_v22, 3  ;;  %v2867_v37 = vsel %vm2836_vm4, %v2862_v14, %v2866_v41  ;;  %v1157_v22 = vrot.slane %v6375_v57, 1  ;;  %v7372_v14 = vld [vmem:[#allocation7_spill] sm:$0xff] }
  0xf8   : > { %5380 = vmatmul.mubr.bf16.vlgmr.msra.gmra.mrb[0].mxu0 %v2847_v29  ;;  %5123 = vmatprep.mubr.bf16.mxu1 %v6769_v28  ;;  %v5906_v29 = vld [vmem:[%s7307_s1 + $0x218] sm:$0xff]  }
  0xf9   : > { %5420 = vmatpush3.bf16.msra.mxu0 %v6593_v25  ;;  %5383 = vmatprep.mubr.bf16.mxu0 %v2851_v34  ;;  %v3727_v25 = vld [vmem:[%s7310_s4 + $0xa0] sm:$0xff]  ;;  %v3728_v34 = vld [vmem:[%s7310_s4 + $0xa8] sm:$0xff]  ;;  %v2870_v5 = vor.u32 %v2869_v0, %v2868_v9  ;;  %v7374_v9 = vld [vmem:[#allocation9_spill] sm:$0xff] }
  0xfa   : > { %5421 = vmatprep.subr.bf16.mxu0 %v5902_v45  ;;  %3833 = vperm.xlu1 %5838, %v3724_v8   ;;  %v7375_v0 = vld [vmem:[#allocation6_spill] sm:$0xff] }
  0xfb   : > { %3848 = vperm.xlu0 %5837, %v3727_v25  }
  0xfd   : > { %5422 = vmatpush3.bf16.msra.mxu0 %v5902_v45  ;;  %v6831_v45 = vsel %vm1121_vm3, %v1151_v38, %v1153_v47  ;;  %v7371_v38 = vld [vmem:[#allocation2_spill] sm:$0xff] }
  0xfe   : > { %5423 = vmatprep.subr.bf16.mxu0 %v5904_v39  ;;  %3843 = vperm.xlu1 %5838, %v3726_v48   ;;  %v2873_v25 = vrot.slane %v7371_v38, 3  ;;  %v3735_v47 = vld [vmem:[%s7310_s4 + $0xe0] sm:$0xff]  ;;  %v2871_v48 = vsel %vm2836_vm4, %v2866_v41, %v2870_v5  ;;  %v5910_v41 = vld [vmem:[%s7307_s1 + $0x238] sm:$0xff]  }
  0xff   : > { %5124 = vmatmul.mubr.bf16.gmra.mrb[24].mxu1 %v6797_v31  ;;  %3858 = vperm.xlu0 %5837, %v3729_v13   ;;  %v6875_v13 = vsel %vm1121_vm3, %v1157_v22, %v6858_v6 }
 0x100   : > { %5384 = vmatmul.mubr.bf16.gmra.mrb[4].mxu0 %v2855_v55  ;;  %5127 = vmatprep.mubr.bf16.mxu1 %v6804_v60  ;;  %v5908_v55 = vld [vmem:[%s7307_s1 + $0x228] sm:$0xff]  }
 0x101   : > { %5387 = vmatprep.mubr.bf16.mxu0 %v2859_v15  ;;  %5424 = vmatpush3.bf16.msra.mxu0 %v5904_v39  ;;  %v7370_v39 = vld [vmem:[#allocation3_spill] sm:$0xff] }
 0x102   : > { %5425 = vmatprep.subr.bf16.mxu0 %v5906_v29  ;;  %v2872_v8 = vrot.slane %v7370_v39, 2  ;;  %3853 = vperm.xlu1 %5838, %v3728_v34   ;;  %v7373_v34 = vld [vmem:[#allocation5_spill] sm:$0xff] }
 0x103   : > { %3868 = vperm.xlu0 %5837, %v3731_v3   ;;  %v2877_v3 = vrot.slane %v7373_v34, 3  ;;  %v3734_v39 = vld [vmem:[%s7310_s4 + $0xd8] sm:$0xff] }
 0x104   : > { %v2874_v15 = vor.u32 %v2873_v25, %v2872_v8  ;;  %v3737_v8 = vld [vmem:[%s7310_s4 + $0xf0] sm:$0xff] }
 0x105   : > { %5426 = vmatpush3.bf16.msra.mxu0 %v5906_v29  ;;  %v6867_v29 = vsel %vm1121_vm3, %v1155_v7, %v1157_v22  ;;  %v2880_v7 = vrot.slane %v7374_v9, 2  ;;  %v3739_v22 = vld [vmem:[%s7310_s4 + $0x100] sm:$0xff] }
 0x106   : > { %5427 = vmatprep.subr.bf16.mxu0 %v5907_v27  ;;  %3863 = vperm.xlu1 %5838, %v3730_v23  }
 0x107   : > { %5128 = vmatmul.mubr.bf16.gmra.mrb[28].mxu1 %v6831_v45  ;;  %3878 = vperm.xlu0 %5837, %v3733_v50   ;;  %v7376_v50 = vld [vmem:[#allocation11_spill] sm:$0xff] }
 0x108   : > { %5388 = vmatmul.mubr.bf16.gmra.mrb[8].mxu0 %v2863_v11  ;;  %5131 = vmatprep.mubr.bf16.mxu1 %v6838_v10  ;;  %v2875_v11 = vsel %vm2836_vm4, %v2870_v5, %v2874_v15  ;;  %v2884_v5 = vrot.slane %v7376_v50, 2 }
 0x109   : > { %5391 = vmatprep.mubr.bf16.mxu0 %v2867_v37  ;;  %5428 = vmatpush3.bf16.msra.mxu0 %v5907_v27  ;;  %v2876_v27 = vrot.slane %v7372_v14, 2  ;;  %v2881_v37 = vrot.slane %v7375_v0, 3 }
 0x10a   : > { %5429 = vmatprep.subr.bf16.mxu0 %v5908_v55  ;;  %3873 = vperm.xlu1 %5838, %v3732_v52   ;;  %v7377_v52 = vld [vmem:[#allocation8_spill] sm:$0xff] }
 0x10b   : > { %3888 = vperm.xlu0 %5837, %v3735_v47   ;;  %v2878_v38 = vor.u32 %v2877_v3, %v2876_v27  ;;  %v2882_v25 = vor.u32 %v2881_v37, %v2880_v7  ;;  %v2885_v47 = vrot.slane %v7377_v52, 3  ;;  %v7379_v3 = vld [vmem:[#allocation10_spill] sm:$0xff]  ;;  %v3738_v7 = vld [vmem:[%s7310_s4 + $0xf8] sm:$0xff] }
 0x10d   : > { %5430 = vmatpush3.bf16.msra.mxu0 %v5908_v55  ;;  %v3736_v55 = vld [vmem:[%s7310_s4 + $0xe8] sm:$0xff]  ;;  %v2879_v23 = vsel %vm2836_vm4, %v2874_v15, %v2878_v38  ;;  %v3741_v15 = vld [vmem:[%s7310_s4 + $0x110] sm:$0xff]  ;;  %v2886_v37 = vor.u32 %v2885_v47, %v2884_v5  ;;  %v7382_v5 = vld [vmem:[#allocation18_spill] sm:$0xff] }
 0x10e   : > { %5431 = vmatprep.subr.bf16.mxu0 %v5909_v42  ;;  %3883 = vperm.xlu1 %5838, %v3734_v39   ;;  %v3740_v39 = vld [vmem:[%s7310_s4 + $0x108] sm:$0xff]  ;;  %v2896_v47 = vrot.slane %v7382_v5, 2 }
 0x10f   : > { %5132 = vmatmul.mubr.bf16.gmra.mrb[32].mxu1 %v6867_v29  ;;  %3898 = vperm.xlu0 %5837, %v3737_v8   ;;  %v3743_v8 = vld [vmem:[%s7310_s4 + $0x120] sm:$0xff] }
 0x110   : > { %5392 = vmatmul.mubr.bf16.gmra.mrb[12].mxu0 %v2871_v48  ;;  %5135 = vmatprep.mubr.bf16.mxu1 %v6875_v13  ;;  %v7378_v48 = vld [vmem:[#allocation13_spill] sm:$0xff] }
 0x111   : > { %5395 = vmatprep.mubr.bf16.mxu0 %v2875_v11  ;;  %5432 = vmatpush3.bf16.msra.mxu0 %v5909_v42  ;;  %v2883_v42 = vsel %vm2836_vm4, %v2878_v38, %v2882_v25  ;;  %v2888_v27 = vrot.slane %v7378_v48, 2  ;;  %v2889_v11 = vrot.slane %v7379_v3, 3  ;;  %v2887_v38 = vsel %vm2836_vm4, %v2882_v25, %v2886_v37  ;;  %v3745_v25 = vld [vmem:[%s7310_s4 + $0x130] sm:$0xff] }
 0x112   : > { %5433 = vmatprep.subr.bf16.mxu0 %v5910_v41  ;;  %3893 = vperm.xlu1 %5838, %v3736_v55  }
 0x113   : > { %3908 = vperm.xlu0 %5837, %v3739_v22   ;;  %v7381_v22 = vld [vmem:[#allocation12_spill] sm:$0xff] }
 0x115   : > { %5434 = vmatpush3.bf16.msra.mxu0 %v5910_v41  ;;  %v2890_v41 = vor.u32 %v2889_v11, %v2888_v27  ;;  %v7383_v27 = vld [vmem:[#allocation15_spill] sm:$0xff] }
 0x116   : > { %3903 = vperm.xlu1 %5838, %v3738_v7   ;;  %v2897_v11 = vrot.slane %v7383_v27, 3  ;;  %v3742_v7 = vld [vmem:[%s7310_s4 + $0x118] sm:$0xff] }
 0x117   : > { %5136 = vmatmul.mubr.bf16.gmra.mrb[36].mxu1 %v6858_v6  ;;  %3918 = vperm.xlu0 %5837, %v3741_v15  }
 0x118   : > { %5396 = vmatmul.mubr.bf16.gmra.mrb[16].mxu0 %v2879_v23  ;;  %5155 = vmatprep.mubr.bf16.mxu1 %v6603_v30  ;;  %v7380_v30 = vld [vmem:[#allocation14_spill] sm:$0xff]  ;;  %v2893_v23 = vrot.slane %v7381_v22, 3 }
 0x119   : > { %5399 = vmatprep.mubr.bf16.mxu0 %v2883_v42  ;;  %v2892_v55 = vrot.slane %v7380_v30, 2  ;;  %v2891_v42 = vsel %vm2836_vm4, %v2886_v37, %v2890_v41  ;;  %v2898_v37 = vor.u32 %v2897_v11, %v2896_v47  ;;  %v7386_v47 = vld [vmem:[#allocation22_spill] sm:$0xff] }
 0x11a   : > { %3913 = vperm.xlu1 %5838, %v3740_v39   ;;  %v2904_v11 = vrot.slane %v7386_v47, 2 }
 0x11b   : > { %3928 = vperm.xlu0 %5837, %v3743_v8   ;;  %v2894_v15 = vor.u32 %v2893_v23, %v2892_v55  ;;  %v7384_v8 = vld [vmem:[#allocation20_spill] sm:$0xff] }
 0x11c   : > { %v5913_v55 = vld [vmem:[%s7307_s1 + $0x110] sm:$0xff]  }
 0x11d   : > { %v2895_v39 = vsel %vm2836_vm4, %v2890_v41, %v2894_v15  ;;  %v2899_v23 = vsel %vm2836_vm4, %v2894_v15, %v2898_v37  ;;  %v5914_v15 = vld [vmem:[%s7307_s1 + $0x118] sm:$0xff]  }
 0x11e   : > { %3923 = vperm.xlu1 %5838, %v3742_v7   ;;  %v7387_v7 = vld [vmem:[#allocation21_spill] sm:$0xff] }
 0x11f   : > { %5156 = vmatmul.mubr.bf16.vlgmr.msra.gmra.mrb[0].mxu1 %v6606_v56  ;;  %v5912_v56 = vld [vmem:[%s7307_s1 + $0x108] sm:$0xff]   ;;  %3938 = vperm.xlu0 %5837, %v3745_v25   ;;  %v2905_v25 = vrot.slane %v7387_v7, 3 }
 0x120   : > { %5400 = vmatmul.mubr.bf16.gmra.mrb[20].mxu0 %v2887_v38  ;;  %5483 = vmatpush3.bf16.msra.mxu1 %v6745_v17  ;;  %v3744_v17 = vld [vmem:[%s7310_s4 + $0x128] sm:$0xff]  ;;  %v2900_v38 = vrot.slane %v7384_v8, 2 }
 0x121   : > { %5159 = vmatprep.mubr.bf16.mxu1 %v6638_v49  ;;  %5403 = vmatprep.mubr.bf16.mxu0 %v2891_v42  ;;  %v7385_v49 = vld [vmem:[#allocation19_spill] sm:$0xff]  ;;  %v2906_v57 = vor.u32 %v2905_v25, %v2904_v11  ;;  %v5915_v11 = vld [vmem:[%s7307_s1 + $0x120] sm:$0xff]  }
 0x122   : > { %5476 = vmatprep.subr.bf16.mxu1 %v5912_v56  ;;  %v2901_v42 = vrot.slane %v7385_v49, 3  ;;  %3933 = vperm.xlu1 %5838, %v3744_v17   ;;  %v2913_v17 = vshrl.u32 %v6672_v20, 16 }
 0x124   : > { %5484 = vmatpush3.bf16.msra.mxu1 %v5912_v56  ;;  %v2902_v41 = vor.u32 %v2901_v42, %v2900_v38  ;;  %v1855_v56 = vshrl.u32 %v6513_v44, 16  ;;  %v2909_v38 = vrot.slane %v1858_v54, 3 }
 0x125   : > { %5477 = vmatprep.subr.bf16.mxu1 %v5913_v55 }
 0x126   : > { %v2907_v42 = vsel %vm2836_vm4, %v2902_v41, %v2906_v57 }
 0x127   : > { %5160 = vmatmul.mubr.bf16.gmra.mrb[4].mxu1 %v6641_v36  ;;  %v2916_v36 = vshll.u32 %v6672_v20, 16 }
 0x128   : > { %5404 = vmatmul.mubr.bf16.gmra.mrb[24].mxu0 %v2895_v39  ;;  %5163 = vmatprep.mubr.bf16.mxu1 %v6667_v53  ;;  %v2903_v39 = vsel %vm2836_vm4, %v2898_v37, %v2902_v41  ;;  %v2908_v53 = vrot.slane %v1855_v56, 2  ;;  %v5916_v41 = vld [vmem:[%s7307_s1 + $0x128] sm:$0xff]  }
 0x129   : > { %5407 = vmatprep.mubr.bf16.mxu0 %v2899_v23  ;;  %5485 = vmatpush3.bf16.msra.mxu1 %v5913_v55  ;;  %v2915_v55 = vrot.slane %v2913_v17, 2  ;;  %v2918_v23 = vrot.slane %v2916_v36, 3  ;;  %v3239_v36 = vrot.slane %v6066_v32, 3 }
 0x12a   : > { %5478 = vmatprep.subr.bf16.mxu1 %v5914_v15  ;;  %v2910_v37 = vor.u32 %v2909_v38, %v2908_v53  ;;  %v3247_v53 = vrot.slane %v6137_v19, 3  ;;  %v3253_v19 = vrot.slane %v6189_v2, 3  ;;  %v1822_v38 = vrot.slane %v7372_v14, 1 }
 0x12b   : > { %v2919_v25 = vor.u32 %v2918_v23, %v2915_v55  ;;  %v3257_v2 = vrot.slane %v6263_v24, 3  ;;  %v1826_v55 = vrot.slane %v7374_v9, 1  ;;  %v7388_v23 = vld [vmem:[#allocation4_spill] sm:$0xff] }
 0x12d   : > { %5486 = vmatpush3.bf16.msra.mxu1 %v5914_v15  ;;  %v2911_v15 = vsel %vm2836_vm4, %v2906_v57, %v2910_v37  ;;  %v2920_v17 = vsel %vm2836_vm4, %v2910_v37, %v2919_v25  ;;  %v5918_v57 = vld [vmem:[%s7307_s1 + $0x138] sm:$0xff]  }
 0x12e   : > { %5479 = vmatprep.subr.bf16.mxu1 %v5915_v11 }
 0x12f   : > { %5164 = vmatmul.mubr.bf16.gmra.mrb[8].mxu1 %v6670_v16  ;;  %v5917_v16 = vld [vmem:[%s7307_s1 + $0x130] sm:$0xff]  }
 0x130   : > { %5408 = vmatmul.mubr.bf16.gmra.mrb[28].mxu0 %v2903_v39  ;;  %5167 = vmatprep.mubr.bf16.mxu1 %v6697_v59  ;;  %v3238_v59 = vrot.slane %v6049_v21, 3  ;;  %v3243_v21 = vrot.slane %v6104_v61, 3  ;;  %v3249_v61 = vrot.slane %v6163_v40, 3 }
 0x131   : > { %5411 = vmatprep.mubr.bf16.mxu0 %v2907_v42  ;;  %5487 = vmatpush3.bf16.msra.mxu1 %v5915_v11  ;;  %v1823_v42 = vrot.slane %v7373_v34, 2  ;;  %v1830_v11 = vrot.slane %v7376_v50, 1  ;;  %v1835_v50 = vrot.slane %v7379_v3, 2  ;;  %v3267_v3 = vrot.slane %v6347_v35, 3  ;;  %v7389_v35 = vld [vmem:[#allocation16_spill] sm:$0xff] }
 0x132   : > { %5480 = vmatprep.subr.bf16.mxu1 %v5916_v41  ;;  %v3240_v39 = vsel %vm3237_vm5, %v3238_v59, %v3239_v36 }
 0x135   : > { %5488 = vmatpush3.bf16.msra.mxu1 %v5916_v41  ;;  %v1834_v41 = vrot.slane %v7378_v48, 1 }
 0x136   : > { %5481 = vmatprep.subr.bf16.mxu1 %v5917_v16 }
 0x137   : > { %5168 = vmatmul.mubr.bf16.gmra.mrb[12].mxu1 %v6703_v63  ;;  %v3241_v63 = vrot.slane %v6082_v46, 3 }
 0x138   : > { %5412 = vmatmul.mubr.bf16.gmra.mrb[32].mxu0 %v2911_v15  ;;  %5171 = vmatprep.mubr.bf16.mxu1 %v6729_v51 }
 0x139   : > { %5415 = vmatprep.mubr.bf16.mxu0 %v2920_v17  ;;  %5489 = vmatpush3.bf16.msra.mxu1 %v5917_v16  ;;  %v3242_v32 = vsel %vm3237_vm5, %v3239_v36, %v3241_v63  ;;  %v3244_v51 = vsel %vm3237_vm5, %v3241_v63, %v3243_v21  ;;  %v1838_v17 = vrot.slane %v7380_v30, 1  ;;  %v1839_v16 = vrot.slane %v7381_v22, 2 }
 0x13a   : > { %5482 = vmatprep.subr.bf16.mxu1 %v5918_v57  ;;  %v1843_v30 = vrot.slane %v7383_v27, 2  ;;  %v1846_v63 = vrot.slane %v7384_v8, 1  ;;  %v1851_v8 = vrot.slane %v7387_v7, 2 }
 0x13b   : > { %v1840_v48 = vor.u32 %v1839_v16, %v1838_v17 }
 0x13d   : > { %5490 = vmatpush3.bf16.msra.mxu1 %v5918_v57  ;;  %v1842_v57 = vrot.slane %v7382_v5, 1 }
 0x13f   : > { %5172 = vmatmul.mubr.bf16.gmra.mrb[16].mxu1 %v6735_v43  ;;  %v3245_v43 = vrot.slane %v6106_v62, 3 }
 0x140   : > { %5416 = vmatmul.mubr.bf16.gmra.mrb[36].mxu0 %v2919_v25  ;;  %5175 = vmatprep.mubr.bf16.mxu1 %v6762_v1 }
 0x141   : > { %5435 = vmatprep.mubr.bf16.mxu0 %v3240_v39  ;;  %v3246_v1 = vsel %vm3237_vm5, %v3243_v21, %v3245_v43  ;;  %v3248_v46 = vsel %vm3237_vm5, %v3245_v43, %v3247_v53  ;;  %v1847_v21 = vrot.slane %v7385_v49, 2  ;;  %v7390_v43 = vld [vmem:[#allocation17_spill] sm:$0xff] }
 0x142   : > { %v3271_v27 = vrot.slane %v7390_v43, 3 }
 0x143   : > { %v1848_v5 = vor.u32 %v1847_v21, %v1846_v63  ;;  %v7123_v21 = vld [vmem:[%s7309_s3] ss:$0 sm:$0xff] }
 0x147   : > { %5176 = vmatmul.mubr.bf16.gmra.mrb[20].mxu1 %v6769_v28  ;;  %v3251_v28 = vrot.slane %v6181_v58, 3 }
 0x148   : > { %5436 = vmatmul.mubr.bf16.vlgmr.msra.gmra.mrb[0].mxu0 %v3242_v32  ;;  %5179 = vmatprep.mubr.bf16.mxu1 %v6797_v31  ;;  %v3250_v31 = vsel %vm3237_vm5, %v3247_v53, %v3249_v61 }
 0x149   : > { %5439 = vmatprep.mubr.bf16.mxu0 %v3244_v51  ;;  %v3252_v62 = vsel %vm3237_vm5, %v3249_v61, %v3251_v28  ;;  %v3254_v40 = vsel %vm3237_vm5, %v3251_v28, %v3253_v19  ;;  %v3269_v51 = vrot.slane %v7389_v35, 3  ;;  %v1857_v61 = vrot.slane %v1855_v56, 1 }
 0x14a   : > { %v1860_v28 = vrot.slane %v1858_v54, 2 }
 0x14b   : > { %v3270_v49 = vsel %vm3237_vm5, %v3267_v3, %v3269_v51 }
 0x14c   : > { %v1861_v7 = vor.u32 %v1860_v28, %v1857_v61 }
 0x14f   : > { %5180 = vmatmul.mubr.bf16.gmra.mrb[24].mxu1 %v6804_v60  ;;  %v1478_v60 = vrot.slane %v6513_v44, 1 }
 0x150   : > { %5440 = vmatmul.mubr.bf16.gmra.mrb[4].mxu0 %v3246_v1  ;;  %5183 = vmatprep.mubr.bf16.mxu1 %v6831_v45  ;;  %v3255_v45 = vrot.slane %v6222_v33, 3  ;;  %v3259_v33 = vrot.slane %v6269_v26, 3  ;;  %v3261_v26 = vrot.slane %v6305_v4, 3  ;;  %v1836_v4 = vor.u32 %v1835_v50, %v1834_v41 }
 0x151   : > { %5443 = vmatprep.mubr.bf16.mxu0 %v3248_v46  ;;  %v1479_v58 = vsel %vm1121_vm3, %v6858_v6, %v1478_v60  ;;  %v1827_v6 = vrot.slane %v7375_v0, 2  ;;  %v3263_v0 = vrot.slane %v6312_v12, 3  ;;  %v3265_v12 = vrot.slane %v6316_v18, 3 }
 0x152   : > { %v3258_v14 = vsel %vm3237_vm5, %v3255_v45, %v3257_v2  ;;  %v3260_v37 = vsel %vm3237_vm5, %v3257_v2, %v3259_v33  ;;  %v1841_v39 = vsel %vm1778_vm1, %v1836_v4, %v1840_v48  ;;  %v1844_v18 = vor.u32 %v1843_v30, %v1842_v57  ;;  %v7116_v30 = vld [vmem:[%s7308_s2] ss:$0 sm:$0xff] }
 0x153   : > { %v1828_v24 = vor.u32 %v1827_v6, %v1826_v55  ;;  %v3264_v59 = vsel %vm3237_vm5, %v3261_v26, %v3263_v0  ;;  %v3266_v22 = vsel %vm3237_vm5, %v3263_v0, %v3265_v12  ;;  %v3268_v32 = vsel %vm3237_vm5, %v3265_v12, %v3267_v3 }
 0x154   : > { %v1845_v53 = vsel %vm1778_vm1, %v1840_v48, %v1844_v18  ;;  %v1850_v1 = vrot.slane %v7386_v47, 1  ;;  %v1849_v46 = vsel %vm1778_vm1, %v1844_v18, %v1848_v5  ;;  %v3273_v47 = vrot.slane %v6513_v44, 3 }
 0x157   : > { %5184 = vmatmul.mubr.bf16.gmra.mrb[28].mxu1 %v6838_v10  ;;  %v3256_v10 = vsel %vm3237_vm5, %v3253_v19, %v3255_v45  ;;  %v3275_v19 = vrot.slane %v6672_v20, 3  ;;  %v3274_v45 = vsel %vm3237_vm5, %v3271_v27, %v3273_v47 }
 0x158   : > { %5444 = vmatmul.mubr.bf16.gmra.mrb[8].mxu0 %v3250_v31  ;;  %5187 = vmatprep.mubr.bf16.mxu1 %v6867_v29  ;;  %v1824_v29 = vor.u32 %v1823_v42, %v1822_v38  ;;  %v3272_v31 = vsel %vm3237_vm5, %v3269_v51, %v3271_v27  ;;  %v3759_v38 = vpop.permute.xlu1 %3758 }
 0x159   : > { %5447 = vmatprep.mubr.bf16.mxu0 %v3252_v62  ;;  %v1852_v62 = vor.u32 %v1851_v8, %v1850_v1  ;;  %v3276_v54 = vsel %vm3237_vm5, %v3273_v47, %v3275_v19 }
 0x15a   : > { %v1825_v34 = vsel %vm1778_vm1, %v7388_v23, %v1824_v29  ;;  %v1829_v25 = vsel %vm1778_vm1, %v1824_v29, %v1828_v24 }
 0x15b   : > { %v1862_v56 = vsel %vm1778_vm1, %v1852_v62, %v1861_v7 }
 0x15c   : > { %v3764_v29 = vpop.permute.xlu1 %3763 }
 0x15f   : > { %5188 = vmatmul.mubr.bf16.gmra.mrb[32].mxu1 %v6875_v13  ;;  %v1831_v13 = vrot.slane %v7377_v52, 2  ;;  %v3262_v52 = vsel %vm3237_vm5, %v3259_v33, %v3261_v26 }
 0x160   : > { %5448 = vmatmul.mubr.bf16.gmra.mrb[12].mxu0 %v3254_v40  ;;  %5191 = vmatprep.mubr.bf16.mxu1 %v1479_v58  ;;  %v7063_v40 = vpop.permute.xlu0 %3748 }
 0x161   : > { %5451 = vmatprep.mubr.bf16.mxu0 %v3256_v10  ;;  %v1832_v9 = vor.u32 %v1831_v13, %v1830_v11 }
 0x163   : > { %v1833_v15 = vsel %vm1778_vm1, %v1828_v24, %v1832_v9  ;;  %v1837_v36 = vsel %vm1778_vm1, %v1832_v9, %v1836_v4 }
 0x164   : > { %v7065_v58 = vpop.permute.xlu0 %3753 }
 0x167   : > { %5192 = vmatmul.mubr.bf16.gmra.mrb[36].mxu1 %v1478_v60  ;;  %v1853_v60 = vsel %vm1778_vm1, %v1848_v5, %v1852_v62 }
 0x168   : > { %5452 = vmatmul.mubr.bf16.gmra.mrb[16].mxu0 %v3258_v14  ;;  %5231 = vmatprep.mubr.bf16.mxu1 %v1825_v34  ;;  %v7067_v2 = vpop.permute.xlu0 %3768  ;;  %v7071_v34 = vpop.permute.xlu1 %3773 }
 0x169   : > { %5455 = vmatprep.mubr.bf16.mxu0 %v3260_v37 }
 0x16c   : > { %v7069_v23 = vpop.permute.xlu0 %3778  ;;  %v7083_v9 = vpop.permute.xlu1 %3783 }
 0x16f   : > { %5232 = vmatmul.mubr.bf16.vlgmr.msra.gmra.mrb[20].mxu1 %v1829_v25 }
 0x170   : > { %5456 = vmatmul.mubr.bf16.gmra.mrb[20].mxu0 %v3262_v52  ;;  %5235 = vmatprep.mubr.bf16.mxu1 %v1833_v15  ;;  %v7079_v24 = vpop.permute.xlu0 %3788  ;;  %v7091_v50 = vpop.permute.xlu1 %3793 }
 0x171   : > { %5459 = vmatprep.mubr.bf16.mxu0 %v3264_v59 }
 0x174   : > { %v7087_v25 = vpop.permute.xlu0 %3798  ;;  %v7099_v16 = vpop.permute.xlu1 %3803 }
 0x177   : > { %5236 = vmatmul.mubr.bf16.gmra.mrb[24].mxu1 %v1837_v36 }
 0x178   : > { %5460 = vmatmul.mubr.bf16.gmra.mrb[24].mxu0 %v3266_v22  ;;  %5239 = vmatprep.mubr.bf16.mxu1 %v1841_v39  ;;  %v7097_v17 = vpop.permute.xlu0 %3808  ;;  %v7111_v36 = vpop.permute.xlu1 %3813 }
 0x179   : > { %5463 = vmatprep.mubr.bf16.mxu0 %v3268_v32 }
 0x17c   : > { %v7109_v3 = vpop.permute.xlu0 %3818  ;;  %v7125_v35 = vpop.permute.xlu1 %3823 }
 0x17f   : > { %5240 = vmatmul.mubr.bf16.gmra.mrb[28].mxu1 %v1845_v53 }
 0x180   : > { %5464 = vmatmul.mubr.bf16.gmra.mrb[28].mxu0 %v3270_v49  ;;  %5243 = vmatprep.mubr.bf16.mxu1 %v1849_v46  ;;  %v7118_v63 = vpop.permute.xlu0 %3828 }
 0x181   : > { %5467 = vmatprep.mubr.bf16.mxu0 %v3272_v31 }
 0x184   : > { %v7134_v31 = vpop.permute.xlu0 %3838 }
 0x187   : > { %5244 = vmatmul.mubr.bf16.gmra.mrb[32].mxu1 %v1853_v60 }
 0x188   : > { %5468 = vmatmul.mubr.bf16.gmra.mrb[32].mxu0 %v3274_v45  ;;  %5247 = vmatprep.mubr.bf16.mxu1 %v1862_v56 }
 0x189   : > { %5471 = vmatprep.mubr.bf16.mxu0 %v3276_v54 }
 0x18f   : > { %5248 = vmatmul.mubr.bf16.gmra.mrb[36].mxu1 %v1861_v7 }
 0x190   : > { %5472 = vmatmul.mubr.bf16.gmra.mrb[36].mxu0 %v3275_v19  ;;  %v7137_v19 = vpop.permute.xlu1 %3833 }
 0x1f2   : > { %v5157_v44 = vpop.f32.mrb[0].mxu1 }
 0x1f3   : > { %v1564_v20 = vpop.f32.mrb[1].mxu1 }
 0x1f4   : > { %v5158_v42 = vpop.f32.mrb[2].mxu1 }
 0x1f5   : > { %v1567_v10 = vpop.f32.mrb[3].mxu1 }
 0x1fa   : > { %v5161_v33 = vpop.f32.mrb[4].mxu1 }
 0x1fb   : > { %v1580_v55 = vpop.f32.mrb[5].mxu1 }
 0x1fc   : > { %v5162_v6 = vpop.f32.mrb[6].mxu1 }
 0x1fd   : > { %v1583_v14 = vpop.f32.mrb[7].mxu1 }
 0x202   : > { %v7073_v11 = vpop.f32.mrb[8].mxu1 }
 0x203   : > { %v7075_v13 = vpop.f32.mrb[9].mxu1 }
 0x204   : > { %v7077_v37 = vpop.f32.mrb[10].mxu1 }
 0x205   : > { %v7081_v26 = vpop.f32.mrb[11].mxu1 }
 0x20a   : > { %v7085_v0 = vpop.f32.mrb[12].mxu1 }
 0x20b   : > { %v7089_v41 = vpop.f32.mrb[13].mxu1 }
 0x20c   : > { %v7093_v52 = vpop.f32.mrb[14].mxu1 }
 0x20d   : > { %v7095_v15 = vpop.f32.mrb[15].mxu1 }
 0x212   : > { %v7101_v59 = vpop.f32.mrb[16].mxu1 }
 0x213   : > { %v7103_v4 = vpop.f32.mrb[17].mxu1 }
 0x214   : > { %v7105_v12 = vpop.f32.mrb[18].mxu1 }
 0x215   : > { %v7107_v48 = vpop.f32.mrb[19].mxu1 }
 0x21b   : > { %v5437_v57 = vpop.f32.mrb[0].mxu0 }
 0x21c   : > { %v5491_v22 = vadd.f32 %v5437_v57, %v5157_v44  ;;  %v3379_v39 = vpop.f32.mrb[1].mxu0 }
 0x21d   : > { %v5492_v32 = vadd.f32 %v3379_v39, %v1564_v20  ;;  %v5438_v18 = vpop.f32.mrb[2].mxu0 }
 0x21e   : > { %v3585_v51 = vmul.f32 %v5491_v22, %v7116_v30  ;;  %v5493_v5 = vadd.f32 %v5438_v18, %v5158_v42  ;;  %v3382_v43 = vpop.f32.mrb[3].mxu0 }
 0x21f   : > { %v3583_v27 = vmul.f32 %v5492_v32, %v7116_v30  ;;  %v5494_v53 = vadd.f32 %v3382_v43, %v1567_v10 }
 0x220   : > { %v3631_v1 = vadd.f32 %v7123_v21, %v3585_v51  ;;  %v3586_v8 = vmul.f32 %v5493_v5, %v7116_v30 }
 0x221   : > { %v3629_v49 = vadd.f32 %v7123_v21, %v3583_v27  ;;  %v3584_v46 = vmul.f32 %v5494_v53, %v7116_v30  ;;  %v7149_v53 = vpop.permute.xlu1 %3843 }
 0x222   : > { %v3670_v61 = vmax.f32 %v3631_v1, 0.0  ;;  %v3632_v28 = vadd.f32 %v7123_v21, %v3586_v8 }
 0x223   : > { %v3668_v62 = vmax.f32 %v3629_v49, 0.0  ;;  %v3630_v47 = vadd.f32 %v7123_v21, %v3584_v46  ;;  %v5441_v7 = vpop.f32.mrb[4].mxu0 }
 0x224   : > { %v3671_v60 = vmax.f32 %v3632_v28, 0.0  ;;  %v5495_v45 = vadd.f32 %v5441_v7, %v5161_v33  ;;  %v3395_v56 = vpop.f32.mrb[5].mxu0  ;;  %v3943_v42 = vmul.f32 %v3759_v38, %v3670_v61  ;;  %v7145_v38 = vpop.permute.xlu0 %3848 }
 0x225   : > { %v3669_v54 = vmax.f32 %v3630_v47, 0.0  ;;  %v5496_v44 = vadd.f32 %v3395_v56, %v1580_v55  ;;  %v5442_v20 = vpop.f32.mrb[6].mxu0  ;;  %v3941_v32 = vmul.f32 %v7063_v40, %v3668_v62 }
 0x226   : > { %v3944_v10 = vmul.f32 %v3764_v29, %v3671_v60  ;;  %v3589_v57 = vmul.f32 %v5495_v45, %v7116_v30  ;;  %v5497_v22 = vadd.f32 %v5442_v20, %v5162_v6  ;;  %v3398_v39 = vpop.f32.mrb[7].mxu0 }
 0x227   : > { %v3942_v18 = vmul.f32 %v7065_v58, %v3669_v54  ;;  %v3587_v51 = vmul.f32 %v5496_v44, %v7116_v30  ;;  %v5498_v5 = vadd.f32 %v3398_v39, %v1583_v14 }
 0x228   : > { %v4613_v33 = vpack.c.bf16 %v3944_v10, %v3943_v42  ;;  %v3635_v43 = vadd.f32 %v7123_v21, %v3589_v57  ;;  %v3590_v55 = vmul.f32 %v5497_v22, %v7116_v30  ;;  %v7161_v44 = vpop.permute.xlu0 %3858 }
 0x229   : > { %v4608_v29 = vpack.c.bf16 %v3942_v18, %v3941_v32  ;;  %v3633_v27 = vadd.f32 %v7123_v21, %v3587_v51  ;;  %v3588_v6 = vmul.f32 %v5498_v5, %v7116_v30 }
 0x22a   : > { %4701 = vst [vmem:[%s6627_s18 + $0x18] sm:$0xff] %v4613_v33   ;;  %v3674_v40 = vmax.f32 %v3635_v43, 0.0  ;;  %v3636_v58 = vadd.f32 %v7123_v21, %v3590_v55 }
 0x22b   : > { %4700 = vst [vmem:[%s6627_s18 + $0x10] sm:$0xff] %v4608_v29   ;;  %v3672_v14 = vmax.f32 %v3633_v27, 0.0  ;;  %v3634_v1 = vadd.f32 %v7123_v21, %v3588_v6  ;;  %v5445_v8 = vpop.f32.mrb[8].mxu0 }
 0x22c   : > { %v3675_v49 = vmax.f32 %v3636_v58, 0.0  ;;  %v5499_v46 = vadd.f32 %v5445_v8, %v7073_v11  ;;  %v3411_v61 = vpop.f32.mrb[9].mxu0  ;;  %v3947_v7 = vmul.f32 %v7069_v23, %v3674_v40  ;;  %v7167_v23 = vpop.permute.xlu1 %3853 }
 0x22d   : > { %v3673_v28 = vmax.f32 %v3634_v1, 0.0  ;;  %v5500_v62 = vadd.f32 %v3411_v61, %v7075_v13  ;;  %v5446_v47 = vpop.f32.mrb[10].mxu0  ;;  %v3945_v11 = vmul.f32 %v7067_v2, %v3672_v14  ;;  %v7178_v43 = vpop.permute.xlu0 %3868 }
 0x22e   : > { %v3948_v60 = vmul.f32 %v7083_v9, %v3675_v49  ;;  %v3593_v45 = vmul.f32 %v5499_v46, %v7116_v30  ;;  %v5501_v56 = vadd.f32 %v5446_v47, %v7077_v37  ;;  %v3414_v54 = vpop.f32.mrb[11].mxu0 }
 0x22f   : > { %v3946_v20 = vmul.f32 %v7071_v34, %v3673_v28  ;;  %v3591_v13 = vmul.f32 %v5500_v62, %v7116_v30  ;;  %v5502_v42 = vadd.f32 %v3414_v54, %v7081_v26 }
 0x230   : > { %v4623_v9 = vpack.c.bf16 %v3948_v60, %v3947_v7  ;;  %v3639_v10 = vadd.f32 %v7123_v21, %v3593_v45  ;;  %v3594_v57 = vmul.f32 %v5501_v56, %v7116_v30  ;;  %v7181_v6 = vpop.permute.xlu1 %3863 }
 0x231   : > { %v4618_v37 = vpack.c.bf16 %v3946_v20, %v3945_v11  ;;  %v3637_v22 = vadd.f32 %v7123_v21, %v3591_v13  ;;  %v3592_v39 = vmul.f32 %v5502_v42, %v7116_v30  ;;  %v7197_v7 = vpop.permute.xlu0 %3878 }
 0x232   : > { %4703 = vst [vmem:[%s6627_s18 + $0x28] sm:$0xff] %v4623_v9   ;;  %v3678_v2 = vmax.f32 %v3639_v10, 0.0  ;;  %v3640_v34 = vadd.f32 %v7123_v21, %v3594_v57 }
 0x233   : > { %4702 = vst [vmem:[%s6627_s18 + $0x20] sm:$0xff] %v4618_v37   ;;  %v3676_v32 = vmax.f32 %v3637_v22, 0.0  ;;  %v3638_v26 = vadd.f32 %v7123_v21, %v3592_v39  ;;  %v5449_v18 = vpop.f32.mrb[12].mxu0 }
 0x234   : > { %v3679_v51 = vmax.f32 %v3640_v34, 0.0  ;;  %v5503_v5 = vadd.f32 %v5449_v18, %v7085_v0  ;;  %v3427_v33 = vpop.f32.mrb[13].mxu0  ;;  %v3951_v40 = vmul.f32 %v7087_v25, %v3678_v2  ;;  %v7201_v45 = vpop.permute.xlu1 %3873 }
 0x235   : > { %v3677_v55 = vmax.f32 %v3638_v26, 0.0  ;;  %v5504_v29 = vadd.f32 %v3427_v33, %v7089_v41  ;;  %v5450_v27 = vpop.f32.mrb[14].mxu0  ;;  %v3949_v8 = vmul.f32 %v7079_v24, %v3676_v32  ;;  %v7215_v32 = vpop.permute.xlu0 %3888 }
 0x236   : > { %v3952_v58 = vmul.f32 %v7099_v16, %v3679_v51  ;;  %v3597_v14 = vmul.f32 %v5503_v5, %v7116_v30  ;;  %v5505_v1 = vadd.f32 %v5450_v27, %v7093_v52  ;;  %v3430_v0 = vpop.f32.mrb[15].mxu0 }
 0x237   : > { %v3950_v49 = vmul.f32 %v7091_v50, %v3677_v55  ;;  %v3595_v41 = vmul.f32 %v5504_v29, %v7116_v30  ;;  %v5506_v46 = vadd.f32 %v3430_v0, %v7095_v15 }
 0x238   : > { %v4633_v61 = vpack.c.bf16 %v3952_v58, %v3951_v40  ;;  %v3643_v28 = vadd.f32 %v7123_v21, %v3597_v14  ;;  %v3598_v25 = vmul.f32 %v5505_v1, %v7116_v30 }
 0x239   : > { %v4628_v16 = vpack.c.bf16 %v3950_v49, %v3949_v8  ;;  %v3641_v62 = vadd.f32 %v7123_v21, %v3595_v41  ;;  %v3596_v52 = vmul.f32 %v5506_v46, %v7116_v30 }
 0x23a   : > { %4705 = vst [vmem:[%s6627_s18 + $0x38] sm:$0xff] %v4633_v61   ;;  %v3682_v47 = vmax.f32 %v3643_v28, 0.0  ;;  %v3644_v24 = vadd.f32 %v7123_v21, %v3598_v25 }
 0x23b   : > { %4704 = vst [vmem:[%s6627_s18 + $0x30] sm:$0xff] %v4628_v16   ;;  %v3680_v50 = vmax.f32 %v3641_v62, 0.0  ;;  %v3642_v15 = vadd.f32 %v7123_v21, %v3596_v52  ;;  %v5453_v60 = vpop.f32.mrb[16].mxu0 }
 0x23c   : > { %v3683_v56 = vmax.f32 %v3644_v24, 0.0  ;;  %v5507_v54 = vadd.f32 %v5453_v60, %v7101_v59  ;;  %v3443_v11 = vpop.f32.mrb[17].mxu0  ;;  %v3955_v9 = vmul.f32 %v7109_v3, %v3682_v47 }
 0x23d   : > { %v3681_v20 = vmax.f32 %v3642_v15, 0.0  ;;  %v5508_v13 = vadd.f32 %v3443_v11, %v7103_v4  ;;  %v5454_v42 = vpop.f32.mrb[18].mxu0  ;;  %v3953_v39 = vmul.f32 %v7097_v17, %v3680_v50  ;;  %v7219_v17 = vpop.permute.xlu1 %3883 }
 0x23e   : > { %v3956_v10 = vmul.f32 %v7125_v35, %v3683_v56  ;;  %v3601_v57 = vmul.f32 %v5507_v54, %v7116_v30  ;;  %v5509_v37 = vadd.f32 %v5454_v42, %v7105_v12  ;;  %v3446_v22 = vpop.f32.mrb[19].mxu0  ;;  %v7233_v15 = vpop.permute.xlu0 %3898 }
 0x23f   : > { %v3954_v59 = vmul.f32 %v7111_v36, %v3681_v20  ;;  %v3599_v2 = vmul.f32 %v5508_v13, %v7116_v30  ;;  %v5510_v4 = vadd.f32 %v3446_v22, %v7107_v48 }
 0x240   : > { %v4643_v34 = vpack.c.bf16 %v3956_v10, %v3955_v9  ;;  %v3647_v3 = vadd.f32 %v7123_v21, %v3601_v57  ;;  %v3602_v35 = vmul.f32 %v5509_v37, %v7116_v30 }
 0x241   : > { %v4638_v26 = vpack.c.bf16 %v3954_v59, %v3953_v39  ;;  %v3645_v12 = vadd.f32 %v7123_v21, %v3599_v2  ;;  %v3600_v18 = vmul.f32 %v5510_v4, %v7116_v30  ;;  %v7237_v54 = vpop.permute.xlu1 %3893 }
 0x242   : > { %4707 = vst [vmem:[%s6627_s18 + $0x48] sm:$0xff] %v4643_v34   ;;  %v3686_v36 = vmax.f32 %v3647_v3, 0.0  ;;  %v3648_v51 = vadd.f32 %v7123_v21, %v3602_v35  ;;  %v5233_v5 = vpop.f32.mrb[20].mxu1 }
 0x243   : > { %4706 = vst [vmem:[%s6627_s18 + $0x40] sm:$0xff] %v4638_v26   ;;  %v3684_v48 = vmax.f32 %v3645_v12, 0.0  ;;  %v3646_v33 = vadd.f32 %v7123_v21, %v3600_v18  ;;  %v5457_v55 = vpop.f32.mrb[20].mxu0  ;;  %v2045_v29 = vpop.f32.mrb[21].mxu1 }
 0x244   : > { %v3687_v27 = vmax.f32 %v3648_v51, 0.0  ;;  %v5511_v40 = vadd.f32 %v5457_v55, %v5233_v5  ;;  %v3459_v58 = vpop.f32.mrb[21].mxu0  ;;  %v5234_v14 = vpop.f32.mrb[22].mxu1  ;;  %v3959_v41 = vmul.f32 %v7134_v31, %v3686_v36 }
 0x245   : > { %v3685_v1 = vmax.f32 %v3646_v33, 0.0  ;;  %v5512_v0 = vadd.f32 %v3459_v58, %v2045_v29  ;;  %v5458_v8 = vpop.f32.mrb[22].mxu0  ;;  %v2048_v49 = vpop.f32.mrb[23].mxu1  ;;  %v3957_v16 = vmul.f32 %v7118_v63, %v3684_v48 }
 0x246   : > { %v3960_v46 = vmul.f32 %v7149_v53, %v3687_v27  ;;  %v3605_v61 = vmul.f32 %v5511_v40, %v7116_v30  ;;  %v5513_v28 = vadd.f32 %v5458_v8, %v5234_v14  ;;  %v3462_v25 = vpop.f32.mrb[23].mxu0  ;;  %v7251_v55 = vpop.permute.xlu0 %3908 }
 0x247   : > { %v3958_v62 = vmul.f32 %v7137_v19, %v3685_v1  ;;  %v3603_v52 = vmul.f32 %v5512_v0, %v7116_v30  ;;  %v5514_v47 = vadd.f32 %v3462_v25, %v2048_v49  ;;  %v3904_v40 = vpop.permute.xlu1 %3903 }
 0x248   : > { %v4653_v24 = vpack.c.bf16 %v3960_v46, %v3959_v41  ;;  %v3651_v50 = vadd.f32 %v7123_v21, %v3605_v61  ;;  %v3606_v31 = vmul.f32 %v5513_v28, %v7116_v30 }
 0x249   : > { %v4648_v53 = vpack.c.bf16 %v3958_v62, %v3957_v16  ;;  %v3649_v60 = vadd.f32 %v7123_v21, %v3603_v52  ;;  %v3604_v56 = vmul.f32 %v5514_v47, %v7116_v30 }
 0x24a   : > { %4709 = vst [vmem:[%s6627_s18 + $0x58] sm:$0xff] %v4653_v24   ;;  %v3690_v63 = vmax.f32 %v3651_v50, 0.0  ;;  %v3652_v19 = vadd.f32 %v7123_v21, %v3606_v31  ;;  %v5237_v11 = vpop.f32.mrb[24].mxu1 }
 0x24b   : > { %4708 = vst [vmem:[%s6627_s18 + $0x50] sm:$0xff] %v4648_v53   ;;  %v3688_v20 = vmax.f32 %v3649_v60, 0.0  ;;  %v3650_v13 = vadd.f32 %v7123_v21, %v3604_v56  ;;  %v5461_v42 = vpop.f32.mrb[24].mxu0  ;;  %v2061_v9 = vpop.f32.mrb[25].mxu1 }
 0x24c   : > { %v3691_v10 = vmax.f32 %v3652_v19, 0.0  ;;  %v5515_v57 = vadd.f32 %v5461_v42, %v5237_v11  ;;  %v3475_v37 = vpop.f32.mrb[25].mxu0  ;;  %v5238_v22 = vpop.f32.mrb[26].mxu1  ;;  %v3963_v34 = vmul.f32 %v7161_v44, %v3690_v63 }
 0x24d   : > { %v3689_v39 = vmax.f32 %v3650_v13, 0.0  ;;  %v5516_v59 = vadd.f32 %v3475_v37, %v2061_v9  ;;  %v5462_v2 = vpop.f32.mrb[26].mxu0  ;;  %v2064_v4 = vpop.f32.mrb[27].mxu1  ;;  %v3961_v18 = vmul.f32 %v7145_v38, %v3688_v20 }
 0x24e   : > { %v3964_v3 = vmul.f32 %v7181_v6, %v3691_v10  ;;  %v3609_v35 = vmul.f32 %v5515_v57, %v7116_v30  ;;  %v5517_v26 = vadd.f32 %v5462_v2, %v5238_v22  ;;  %v3478_v12 = vpop.f32.mrb[27].mxu0  ;;  %v3919_v20 = vpop.permute.xlu0 %3918 }
 0x24f   : > { %v3962_v36 = vmul.f32 %v7167_v23, %v3689_v39  ;;  %v3607_v51 = vmul.f32 %v5516_v59, %v7116_v30  ;;  %v5518_v5 = vadd.f32 %v3478_v12, %v2064_v4  ;;  %v3914_v9 = vpop.permute.xlu1 %3913 }
 0x250   : > { %v4663_v48 = vpack.c.bf16 %v3964_v3, %v3963_v34  ;;  %v3655_v33 = vadd.f32 %v7123_v21, %v3609_v35  ;;  %v3610_v44 = vmul.f32 %v5517_v26, %v7116_v30 }
 0x251   : > { %v4658_v6 = vpack.c.bf16 %v3962_v36, %v3961_v18  ;;  %v3653_v29 = vadd.f32 %v7123_v21, %v3607_v51  ;;  %v3608_v27 = vmul.f32 %v5518_v5, %v7116_v30 }
 0x252   : > { %4711 = vst [vmem:[%s6627_s18 + $0x68] sm:$0xff] %v4663_v48   ;;  %v3694_v38 = vmax.f32 %v3655_v33, 0.0  ;;  %v3656_v23 = vadd.f32 %v7123_v21, %v3610_v44  ;;  %v5241_v58 = vpop.f32.mrb[28].mxu1 }
 0x253   : > { %4710 = vst [vmem:[%s6627_s18 + $0x60] sm:$0xff] %v4658_v6   ;;  %v3692_v14 = vmax.f32 %v3653_v29, 0.0  ;;  %v3654_v1 = vadd.f32 %v7123_v21, %v3608_v27  ;;  %v5465_v0 = vpop.f32.mrb[28].mxu0  ;;  %v2077_v8 = vpop.f32.mrb[29].mxu1 }
 0x254   : > { %v3695_v49 = vmax.f32 %v3656_v23, 0.0  ;;  %v5519_v41 = vadd.f32 %v5465_v0, %v5241_v58  ;;  %v3491_v46 = vpop.f32.mrb[29].mxu0  ;;  %v5242_v61 = vpop.f32.mrb[30].mxu1  ;;  %v3967_v52 = vmul.f32 %v7197_v7, %v3694_v38 }
 0x255   : > { %v3693_v28 = vmax.f32 %v3654_v1, 0.0  ;;  %v5520_v25 = vadd.f32 %v3491_v46, %v2077_v8  ;;  %v5466_v16 = vpop.f32.mrb[30].mxu0  ;;  %v2080_v62 = vpop.f32.mrb[31].mxu1  ;;  %v3965_v53 = vmul.f32 %v7178_v43, %v3692_v14 }
 0x256   : > { %v3968_v47 = vmul.f32 %v7219_v17, %v3695_v49  ;;  %v3613_v24 = vmul.f32 %v5519_v41, %v7116_v30  ;;  %v5521_v50 = vadd.f32 %v5466_v16, %v5242_v61  ;;  %v3494_v31 = vpop.f32.mrb[31].mxu0  ;;  %v3924_v1 = vpop.permute.xlu1 %3923 }
 0x257   : > { %v3966_v60 = vmul.f32 %v7201_v45, %v3693_v28  ;;  %v3611_v56 = vmul.f32 %v5520_v25, %v7116_v30  ;;  %v5522_v63 = vadd.f32 %v3494_v31, %v2080_v62 }
 0x258   : > { %v4673_v19 = vpack.c.bf16 %v3968_v47, %v3967_v52  ;;  %v3659_v11 = vadd.f32 %v7123_v21, %v3613_v24  ;;  %v3614_v7 = vmul.f32 %v5521_v50, %v7116_v30 }
 0x259   : > { %v4668_v17 = vpack.c.bf16 %v3966_v60, %v3965_v53  ;;  %v3657_v13 = vadd.f32 %v7123_v21, %v3611_v56  ;;  %v3612_v42 = vmul.f32 %v5522_v63, %v7116_v30 }
 0x25a   : > { %4713 = vst [vmem:[%s6627_s18 + $0x78] sm:$0xff] %v4673_v19   ;;  %v3698_v43 = vmax.f32 %v3659_v11, 0.0  ;;  %v3660_v10 = vadd.f32 %v7123_v21, %v3614_v7  ;;  %v5245_v45 = vpop.f32.mrb[32].mxu1 }
 0x25b   : > { %4712 = vst [vmem:[%s6627_s18 + $0x70] sm:$0xff] %v4668_v17   ;;  %v3696_v57 = vmax.f32 %v3657_v13, 0.0  ;;  %v3658_v37 = vadd.f32 %v7123_v21, %v3612_v42  ;;  %v5469_v22 = vpop.f32.mrb[32].mxu0  ;;  %v2093_v39 = vpop.f32.mrb[33].mxu1 }
 0x25c   : > { %v3699_v59 = vmax.f32 %v3660_v10, 0.0  ;;  %v5523_v2 = vadd.f32 %v5469_v22, %v5245_v45  ;;  %v3507_v4 = vpop.f32.mrb[33].mxu0  ;;  %v5246_v34 = vpop.f32.mrb[34].mxu1  ;;  %v3971_v18 = vmul.f32 %v7233_v15, %v3698_v43 }
 0x25d   : > { %v3697_v3 = vmax.f32 %v3658_v37, 0.0  ;;  %v5524_v35 = vadd.f32 %v3507_v4, %v2093_v39  ;;  %v5470_v26 = vpop.f32.mrb[34].mxu0  ;;  %v2096_v12 = vpop.f32.mrb[35].mxu1  ;;  %v3969_v33 = vmul.f32 %v7215_v32, %v3696_v57 }
 0x25e   : > { %v3972_v36 = vmul.f32 %v3904_v40, %v3699_v59  ;;  %v3617_v51 = vmul.f32 %v5523_v2, %v7116_v30  ;;  %v5525_v5 = vadd.f32 %v5470_v26, %v5246_v34  ;;  %v3510_v48 = vpop.f32.mrb[35].mxu0  ;;  %v3929_v15 = vpop.permute.xlu0 %3928 }
 0x25f   : > { %v3970_v44 = vmul.f32 %v7237_v54, %v3697_v3  ;;  %v3615_v6 = vmul.f32 %v5524_v35, %v7116_v30  ;;  %v5526_v29 = vadd.f32 %v3510_v48, %v2096_v12  ;;  %v3934_v37 = vpop.permute.xlu1 %3933 }
 0x260   : > { %v4683_v27 = vpack.c.bf16 %v3972_v36, %v3971_v18  ;;  %v3663_v38 = vadd.f32 %v7123_v21, %v3617_v51  ;;  %v3618_v23 = vmul.f32 %v5525_v5, %v7116_v30 }
 0x261   : > { %v4678_v40 = vpack.c.bf16 %v3970_v44, %v3969_v33  ;;  %v3661_v58 = vadd.f32 %v7123_v21, %v3615_v6  ;;  %v3616_v14 = vmul.f32 %v5526_v29, %v7116_v30 }
 0x262   : > { %4715 = vst [vmem:[%s6627_s18 + $0x88] sm:$0xff] %v4683_v27   ;;  %v3702_v32 = vmax.f32 %v3663_v38, 0.0  ;;  %v3664_v0 = vadd.f32 %v7123_v21, %v3618_v23  ;;  %v5249_v54 = vpop.f32.mrb[36].mxu1  ;;  %v3939_v10 = vpop.permute.xlu0 %3938 }
 0x263   : > { %4714 = vst [vmem:[%s6627_s18 + $0x80] sm:$0xff] %v4678_v40   ;;  %v3700_v8 = vmax.f32 %v3661_v58, 0.0  ;;  %v3662_v49 = vadd.f32 %v7123_v21, %v3616_v14  ;;  %v5473_v41 = vpop.f32.mrb[36].mxu0  ;;  %v2109_v46 = vpop.f32.mrb[37].mxu1 }
 0x264   : > { %v3703_v61 = vmax.f32 %v3664_v0, 0.0  ;;  %v5527_v28 = vadd.f32 %v5473_v41, %v5249_v54  ;;  %v3523_v25 = vpop.f32.mrb[37].mxu0  ;;  %v5250_v16 = vpop.f32.mrb[38].mxu1  ;;  %v3975_v50 = vmul.f32 %v3919_v20, %v3702_v32 }
 0x265   : > { %v3701_v62 = vmax.f32 %v3662_v49, 0.0  ;;  %v5528_v52 = vadd.f32 %v3523_v25, %v2109_v46  ;;  %v5474_v47 = vpop.f32.mrb[38].mxu0  ;;  %v2112_v24 = vpop.f32.mrb[39].mxu1  ;;  %v3973_v56 = vmul.f32 %v7251_v55, %v3700_v8 }
 0x266   : > { %v3976_v31 = vmul.f32 %v3924_v1, %v3703_v61  ;;  %v3621_v53 = vmul.f32 %v5527_v28, %v7116_v30  ;;  %v3526_v60 = vpop.f32.mrb[39].mxu0 }
 0x267   : > { %v3974_v63 = vmul.f32 %v3914_v9, %v3701_v62  ;;  %v3619_v19 = vmul.f32 %v5528_v52, %v7116_v30  ;;  %v5529_v11 = vadd.f32 %v3526_v60, %v2112_v24 }
 0x268   : > { %v4693_v7 = vpack.c.bf16 %v3976_v31, %v3975_v50  ;;  %v3667_v17 = vadd.f32 %v7123_v21, %v3621_v53 }
 0x269   : > { %v4688_v13 = vpack.c.bf16 %v3974_v63, %v3973_v56  ;;  %v3665_v42 = vadd.f32 %v7123_v21, %v3619_v19  ;;  %v3620_v20 = vmul.f32 %v5529_v11, %v7116_v30 }
 0x26a   : > { %4717 = vst [vmem:[%s6627_s18 + $0x98] sm:$0xff] %v4693_v7   ;;  %v3706_v43 = vmax.f32 %v3667_v17, 0.0 }
 0x26b   : > { %4716 = vst [vmem:[%s6627_s18 + $0x90] sm:$0xff] %v4688_v13   ;;  %v3704_v45 = vmax.f32 %v3665_v42, 0.0  ;;  %v3666_v55 = vadd.f32 %v7123_v21, %v3620_v20 }
 0x26c   : > { %v3979_v9 = vmul.f32 %v3939_v10, %v3706_v43 }
 0x26d   : > { %v3705_v57 = vmax.f32 %v3666_v55, 0.0  ;;  %v3977_v39 = vmul.f32 %v3929_v15, %v3704_v45 }
 0x26e   : > { %v4604_v22 = vpack.c.bf16 %v3979_v9, %v3979_v9 }
 0x26f   : > { %v3978_v59 = vmul.f32 %v3934_v37, %v3705_v57 }
 0x270   : > { %4183 = vst [vmem:[%s6627_s18 + $0xa8] sm:$0xf] %v4604_v22 }
 0x271   : > { %v4698_v2 = vpack.c.bf16 %v3978_v59, %v3977_v39 }
 0x273   : > { %4718 = vst [vmem:[%s6627_s18 + $0xa0] sm:$0xff] %v4698_v2  }
 0x274 PF: > { %s15_s20 = sadd.s32 1, %s5941_s20   ;;  %s7391_s18 = smov %s5937_s19 }
 0x275   : > { %p12_p5 = scmp.ge.s32.totalorder %s15_s20, 4   ;;  %s7392_s19 = smov %s7394_s21 }
 0x277   :  { %14 = sbr.rel (!%p12_p5) target bundleno = 2 (0x2), region = 87 }

// kernel: decoder_no_upsample_forward.3
= control target key start
LH: loop header
LB: loop body
LE: loop exit
PB: predicated region body
PF: predicated region fallthrough
CT: control target
= control target key end

     0   :  { %s5851_s18 = smov 0   ;;  %s5853_s19 = smov 0   ;;  %s7260_s0 = inlined_call_operand.vmem [shape: bf16[2,376,128], index: 0, kind: input, shape index: {}]   ;;  %s7261_s1 = inlined_call_operand.vmem [shape: bf16[9,128,128], index: 1, kind: input, shape index: {}]   ;;  %s7262_s2 = inlined_call_operand.vmem [shape: f32[1,128], index: 2, kind: input, shape index: {}]   ;;  %s7263_s3 = inlined_call_operand.vmem [shape: f32[1,128], index: 3, kind: input, shape index: {}]   ;;  %s7264_s4 = inlined_call_operand.vmem [shape: f32[320,1], index: 4, kind: input, shape index: {}]   ;;  %s7265_s5 = inlined_call_operand.vmem [shape: f32[2,392,128], index: 5, kind: output, shape index: {}]  }
   0x1   :  { %s5855_s20 = smov 0  }
   0x2 LB: > { %s34_s21 = sadd.s32 1, %s5813_s19  ;;  %p4316_p0 = scmp.ge.s32.totalorder %s5817_s20, 1  ;;  %s5817_s20 = sphi %s5855_s20, %s15_s20   ;;  %s5813_s19 = sphi %s5853_s19, %s7349_s19   ;;  %s5809_s18 = sphi %s5851_s18, %s7348_s18  }
   0x3   : > { %p36_p1 = scmp.ge.s32.totalorder %s34_s21, 2  ;;  %p245_p2 = scmp.lt.s32.totalorder %s5817_s20, 3 }
   0x5   : > { %s7351_s21 = smov (%p36_p1, %s34_s21), 0  ;;  %p246_p3 = pnand %p4316_p0, %p245_p2 }
   0x7   : > { %249 = sbr.rel (%p246_p3) target bundleno = 626 (0x272), region = 40 }
   0xe   : > { %v5670_v0 = vld [vmem:[%s7261_s1 + $0x40] sm:$0xff]   ;;  %v5672_v2 = vld [vmem:[%s7261_s1 + $0x48] sm:$0xff]   ;;  %p293_p4 = scmp.lt.s32.totalorder %s5809_s18, 1  ;;  %v5674_v4 = vld [vmem:[%s7261_s1 + $0x50] sm:$0xff]   ;;  %vm506_vm0 = vsmask.f32 7424 }
   0xf   : > { %v5671_v1 = vld [vmem:[%s7261_s1 + $0x100] sm:$0xff]   ;;  %4800 = vmatprep.subr.bf16.mxu1 %v5670_v0  ;;  %v5673_v3 = vld [vmem:[%s7261_s1 + $0x108] sm:$0xff]   ;;  %v5675_v5 = vld [vmem:[%s7261_s1 + $0x110] sm:$0xff]   ;;  %vm1880_vm1 = vsmask.f32 6400  ;;  %vm2292_vm2 = vcmask 1045504  }
  0x10   : > { %5024 = vmatprep.subr.bf16.mxu0 %v5671_v1  ;;  %4801 = vmatpush3.bf16.msra.mxu1 %v5670_v0  ;;  %s7353_s18 = smov (!%p293_p4, %s5809_s18), 1  ;;  %v5676_v6 = vld [vmem:[%s7261_s1 + $0x58] sm:$0xff]   ;;  %v5678_v8 = vld [vmem:[%s7261_s1 + $0x60] sm:$0xff]   ;;  %v5680_v10 = vld [vmem:[%s7261_s1 + $0x68] sm:$0xff]   ;;  %vm1210_vm3 = vcmask 1046528   ;;  %vm3374_vm5 = vcmask 1044480  }
  0x11   : > { %5025 = vmatpush3.bf16.msra.mxu0 %v5671_v1  ;;  %4802 = vmatprep.subr.bf16.mxu1 %v5672_v2  ;;  %v5677_v7 = vld [vmem:[%s7261_s1 + $0x118] sm:$0xff]   ;;  %s5640_s13 = smul.u32 188, %s7353_s18  ;;  %v5679_v9 = vld [vmem:[%s7261_s1 + $0x120] sm:$0xff]   ;;  %v5681_v11 = vld [vmem:[%s7261_s1 + $0x128] sm:$0xff]   ;;  %vm2962_vm4 = vsmask.f32 5376 }
  0x12   : > { %5026 = vmatprep.subr.bf16.mxu0 %v5673_v3  ;;  %v5682_v14 = vld [vmem:[%s7261_s1 + $0x70] sm:$0xff]   ;;  %v5684_v28 = vld [vmem:[%s7261_s1 + $0x78] sm:$0xff]   ;;  %v5689_v42 = vld [vmem:[%s7261_s1] sm:$0xff]  }
  0x13   : > { %s5908_s26 = scalar_lea.vmem %s7260_s0, %s5640_s13  ;;  %v5683_v22 = vld [vmem:[%s7261_s1 + $0x130] sm:$0xff]   ;;  %v5685_v31 = vld [vmem:[%s7261_s1 + $0x138] sm:$0xff]   ;;  %v5691_v49 = vld [vmem:[%s7261_s1 + $0x140] sm:$0xff]  }
  0x14   : > { %4803 = vmatpush3.bf16.msra.mxu1 %v5672_v2  ;;  %v5914_v12 = vld [vmem:[%s5908_s26] sm:$0xff]   ;;  %v5917_v13 = vld [vmem:[%s5908_s26 + $0x8] sm:$0xff]   ;;  %v5923_v15 = vld [vmem:[%s5908_s26 + $0x10] sm:$0xff]  }
  0x15   : > { %5027 = vmatpush3.bf16.msra.mxu0 %v5673_v3  ;;  %4804 = vmatprep.subr.bf16.mxu1 %v5674_v4  ;;  %v508_v16 = vshrl.u32 %v5914_v12, 16  ;;  %v510_v17 = vshll.u32 %v5914_v12, 16  ;;  %v515_v18 = vshll.u32 %v5917_v13, 16  ;;  %v519_v19 = vshrl.u32 %v5917_v13, 16  ;;  %v5939_v27 = vld [vmem:[%s5908_s26 + $0x18] sm:$0xff]   ;;  %v5956_v37 = vld [vmem:[%s5908_s26 + $0x20] sm:$0xff]  }
  0x16   : > { %5028 = vmatprep.subr.bf16.mxu0 %v5675_v5  ;;  %v5930_v20 = vshll.u32 %v5923_v15, 16  ;;  %v5933_v21 = vshrl.u32 %v5923_v15, 16  ;;  %v5950_v34 = vshll.u32 %v5939_v27, 16  ;;  %v5953_v36 = vshrl.u32 %v5939_v27, 16  ;;  %v5973_v46 = vld [vmem:[%s5908_s26 + $0x28] sm:$0xff]   ;;  %v5994_v60 = vld [vmem:[%s5908_s26 + $0x30] sm:$0xff]  }
  0x17   : > { %v512_v23 = vrot.slane %v510_v17, 1  ;;  %v517_v24 = vrot.slane %v515_v18, 1  ;;  %v1881_v25 = vrot.slane %v519_v19, 1  ;;  %v1882_v26 = vrot.slane %v515_v18, 2  ;;  %v5692_v58 = vld [vmem:[%s7261_s1 + $0x148] sm:$0xff]  }
  0x18   : > { %4805 = vmatpush3.bf16.msra.mxu1 %v5674_v4  ;;  %v1884_v29 = vrot.slane %v5933_v21, 1  ;;  %v1885_v30 = vrot.slane %v5930_v20, 2  ;;  %v525_v39 = vrot.slane %v5930_v20, 1  ;;  %v1889_v40 = vrot.slane %v5950_v34, 2  ;;  %v5695_v1 = vld [vmem:[%s7261_s1 + $0x8] sm:$0xff]   ;;  %v6010_v4 = vld [vmem:[%s5908_s26 + $0x38] sm:$0xff]  }
  0x19   : > { %5029 = vmatpush3.bf16.msra.mxu0 %v5675_v5  ;;  %4806 = vmatprep.subr.bf16.mxu1 %v5676_v6  ;;  %v513_v32 = vor.u32 %v512_v23, %v508_v16  ;;  %v1883_v33 = vor.u32 %v1882_v26, %v1881_v25  ;;  %v1888_v43 = vrot.slane %v5953_v36, 1  ;;  %v5967_v44 = vshll.u32 %v5956_v37, 16 }
  0x1a   : > { %5030 = vmatprep.subr.bf16.mxu0 %v5677_v7  ;;  %v1886_v35 = vor.u32 %v1885_v30, %v1884_v29  ;;  %v5970_v45 = vshrl.u32 %v5956_v37, 16  ;;  %v521_v47 = vor.u32 %v519_v19, %v517_v24  ;;  %v533_v50 = vrot.slane %v5950_v34, 1 }
  0x1b   : > { %v518_v38 = vsel %vm506_vm0, %v513_v32, %v517_v24  ;;  %v1890_v48 = vor.u32 %v1889_v40, %v1888_v43  ;;  %v1893_v52 = vrot.slane %v5967_v44, 2  ;;  %v529_v53 = vor.u32 %v5933_v21, %v525_v39  ;;  %v5705_v40 = vld [vmem:[%s7261_s1 + $0x18] sm:$0xff]   ;;  %v6060_v43 = vld [vmem:[%s5908_s26 + $0x50] sm:$0xff]  }
  0x1c   : > { %4807 = vmatpush3.bf16.msra.mxu1 %v5676_v6  ;;  %4816 = vmatprep.mubr.bf16.mxu1 %v518_v38  ;;  %v1887_v41 = vsel %vm1880_vm1, %v1883_v33, %v1886_v35  ;;  %v1892_v51 = vrot.slane %v5970_v45, 1  ;;  %v5983_v54 = vshll.u32 %v5973_v46, 16  ;;  %v5986_v55 = vshrl.u32 %v5973_v46, 16  ;;  %v5698_v33 = vld [vmem:[%s7261_s1 + $0x158] sm:$0xff]  }
  0x1d   : > { %5031 = vmatpush3.bf16.msra.mxu0 %v5677_v7  ;;  %4808 = vmatprep.subr.bf16.mxu1 %v5678_v8  ;;  %v526_v57 = vsel %vm506_vm0, %v521_v47, %v525_v39  ;;  %v541_v59 = vrot.slane %v5967_v44, 1  ;;  %v1891_v61 = vsel %vm1880_vm1, %v1886_v35, %v1890_v48  ;;  %v534_v0 = vsel %vm506_vm0, %v529_v53, %v533_v50  ;;  %v5696_v7 = vld [vmem:[%s7261_s1 + $0x150] sm:$0xff]  }
  0x1e   : > { %5032 = vmatprep.subr.bf16.mxu0 %v5679_v9  ;;  %5040 = vmatprep.mubr.bf16.mxu0 %v1887_v41  ;;  %v1894_v56 = vor.u32 %v1893_v52, %v1892_v51  ;;  %v1896_v62 = vrot.slane %v5986_v55, 1  ;;  %v1897_v63 = vrot.slane %v5983_v54, 2  ;;  %v6004_v2 = vshll.u32 %v5994_v60, 16  ;;  %v5701_v51 = vld [vmem:[%s7261_s1 + $0x160] sm:$0xff]  }
  0x1f   : > { %v6007_v3 = vshrl.u32 %v5994_v60, 16  ;;  %v537_v6 = vor.u32 %v5953_v36, %v533_v50  ;;  %v545_v16 = vor.u32 %v5970_v45, %v541_v59  ;;  %v6025_v17 = vshll.u32 %v6010_v4, 16 }
  0x20   : > { %4809 = vmatpush3.bf16.msra.mxu1 %v5678_v8  ;;  %v1895_v5 = vsel %vm1880_vm1, %v1890_v48, %v1894_v56  ;;  %v549_v8 = vrot.slane %v5983_v54, 1  ;;  %v6028_v18 = vshrl.u32 %v6010_v4, 16  ;;  %v557_v39 = vrot.slane %v6004_v2, 1 }
  0x21   : > { %5033 = vmatpush3.bf16.msra.mxu0 %v5679_v9  ;;  %4810 = vmatprep.subr.bf16.mxu1 %v5680_v10  ;;  %v1900_v9 = vrot.slane %v6007_v3, 1  ;;  %v542_v23 = vsel %vm506_vm0, %v537_v6, %v541_v59  ;;  %v1905_v30 = vrot.slane %v6025_v17, 2  ;;  %v6073_v53 = vshll.u32 %v6060_v43, 16 }
  0x22   : > { %5034 = vmatprep.subr.bf16.mxu0 %v5681_v11  ;;  %v1904_v24 = vrot.slane %v6028_v18, 1  ;;  %v550_v29 = vsel %vm506_vm0, %v545_v16, %v549_v8  ;;  %v553_v41 = vor.u32 %v5986_v55, %v549_v8  ;;  %v561_v48 = vor.u32 %v6007_v3, %v557_v39 }
  0x23   : > { %7304 = vst [vmem:[#allocation2_spill] sm:$0xff] %v6073_v53 }
  0x24   : > { %4811 = vmatpush3.bf16.msra.mxu1 %v5680_v10  ;;  %v1901_v10 = vrot.slane %v6004_v2, 2  ;;  %v1906_v47 = vor.u32 %v1905_v30, %v1904_v24  ;;  %v5706_v24 = vld [vmem:[%s7261_s1 + $0x170] sm:$0xff]  }
  0x25   : > { %5035 = vmatpush3.bf16.msra.mxu0 %v5681_v11  ;;  %4812 = vmatprep.subr.bf16.mxu1 %v5682_v14  ;;  %v5700_v11 = vld [vmem:[%s7261_s1 + $0x10] sm:$0xff]  }
  0x26   : > { %5036 = vmatprep.subr.bf16.mxu0 %v5683_v22  ;;  %v1902_v19 = vor.u32 %v1901_v10, %v1900_v9 }
  0x28   : > { %4813 = vmatpush3.bf16.msra.mxu1 %v5682_v14  ;;  %v1898_v14 = vor.u32 %v1897_v63, %v1896_v62  ;;  %v1907_v59 = vsel %vm1880_vm1, %v1902_v19, %v1906_v47 }
  0x29   : > { %5037 = vmatpush3.bf16.msra.mxu0 %v5683_v22  ;;  %4814 = vmatprep.subr.bf16.mxu1 %v5684_v28  ;;  %v6031_v22 = vld [vmem:[%s5908_s26 + $0x40] sm:$0xff]  }
  0x2a   : > { %5038 = vmatprep.subr.bf16.mxu0 %v5685_v31  ;;  %v6036_v25 = vshll.u32 %v6031_v22, 16  ;;  %v6039_v26 = vshrl.u32 %v6031_v22, 16  ;;  %v1903_v32 = vsel %vm1880_vm1, %v1898_v14, %v1902_v19 }
  0x2c   : > { %4815 = vmatpush3.bf16.msra.mxu1 %v5684_v28  ;;  %v1899_v28 = vsel %vm1880_vm1, %v1894_v56, %v1898_v14  ;;  %v1908_v35 = vrot.slane %v6039_v26, 1  ;;  %v1909_v38 = vrot.slane %v6036_v25, 2  ;;  %v6076_v56 = vshrl.u32 %v6060_v43, 16 }
  0x2d   : > { %5039 = vmatpush3.bf16.msra.mxu0 %v5685_v31  ;;  %4856 = vmatprep.subr.bf16.mxu1 %v5689_v42  ;;  %v6045_v31 = vld [vmem:[%s5908_s26 + $0x48] sm:$0xff]   ;;  %v573_v8 = vrot.slane %v6036_v25, 1 }
  0x2e   : > { %5080 = vmatprep.subr.bf16.mxu0 %v5691_v49  ;;  %v6067_v50 = vshrl.u32 %v6045_v31, 16  ;;  %v1910_v52 = vor.u32 %v1909_v38, %v1908_v35  ;;  %7305 = vst [vmem:[#allocation3_spill] sm:$0xff] %v6076_v56  ;;  %v1916_v6 = vrot.slane %v6076_v56, 1  ;;  %v5719_v38 = vld [vmem:[%s7261_s1 + $0x30] sm:$0xff]  }
  0x2f   : > { %4817 = vmatmul.mubr.bf16.vlgmr.msra.gmra.mrb[0].mxu1 %v526_v57  ;;  %v558_v57 = vsel %vm506_vm0, %v553_v41, %v557_v39  ;;  %v577_v16 = vor.u32 %v6039_v26, %v573_v8  ;;  %v589_v41 = vrot.slane %v6073_v53, 1 }
  0x30   : > { %5041 = vmatmul.mubr.bf16.vlgmr.msra.gmra.mrb[0].mxu0 %v1891_v61  ;;  %4857 = vmatpush3.bf16.msra.mxu1 %v5689_v42  ;;  %v565_v42 = vrot.slane %v6025_v17, 1  ;;  %v1912_v62 = vrot.slane %v6067_v50, 1 }
  0x31   : > { %5081 = vmatpush3.bf16.msra.mxu0 %v5691_v49  ;;  %4820 = vmatprep.mubr.bf16.mxu1 %v534_v0  ;;  %v6064_v49 = vshll.u32 %v6045_v31, 16  ;;  %v5704_v0 = vld [vmem:[%s7261_s1 + $0x168] sm:$0xff]  }
  0x32   : > { %5082 = vmatprep.subr.bf16.mxu0 %v5692_v58  ;;  %5044 = vmatprep.mubr.bf16.mxu0 %v1895_v5  ;;  %v566_v61 = vsel %vm506_vm0, %v561_v48, %v565_v42  ;;  %v1911_v5 = vsel %vm1880_vm1, %v1906_v47, %v1910_v52  ;;  %v569_v9 = vor.u32 %v6028_v18, %v565_v42  ;;  %v6125_v42 = vld [vmem:[%s5908_s26 + $0x60] sm:$0xff]  }
  0x33   : > { %4858 = vmatprep.subr.bf16.mxu1 %v5695_v1  ;;  %v1913_v63 = vrot.slane %v6064_v49, 2  ;;  %v581_v19 = vrot.slane %v6064_v49, 1 }
  0x34   : > { %4859 = vmatpush3.bf16.msra.mxu1 %v5695_v1  ;;  %v5711_v1 = vld [vmem:[%s7261_s1 + $0x20] sm:$0xff]  }
  0x35   : > { %5083 = vmatpush3.bf16.msra.mxu0 %v5692_v58  ;;  %4860 = vmatprep.subr.bf16.mxu1 %v5700_v11  ;;  %v6080_v58 = vld [vmem:[%s5908_s26 + $0x58] sm:$0xff]   ;;  %v1914_v14 = vor.u32 %v1913_v63, %v1912_v62  ;;  %v585_v47 = vor.u32 %v6067_v50, %v581_v19  ;;  %v5712_v62 = vld [vmem:[%s7261_s1 + $0x180] sm:$0xff]   ;;  %v6141_v63 = vshll.u32 %v6125_v42, 16 }
  0x36   : > { %5084 = vmatprep.subr.bf16.mxu0 %v5696_v7  ;;  %v6098_v10 = vshrl.u32 %v6080_v58, 16 }
  0x37   : > { %4821 = vmatmul.mubr.bf16.gmra.mrb[4].mxu1 %v542_v23  ;;  %v6106_v23 = vshll.u32 %v6080_v58, 16  ;;  %7309 = vst [vmem:[#allocation7_spill] sm:$0xff] %v6141_v63 }
  0x38   : > { %5045 = vmatmul.mubr.bf16.gmra.mrb[4].mxu0 %v1899_v28  ;;  %4824 = vmatprep.mubr.bf16.mxu1 %v550_v29  ;;  %7306 = vst [vmem:[#allocation4_spill] sm:$0xff] %v6098_v10  ;;  %v574_v29 = vsel %vm506_vm0, %v569_v9, %v573_v8  ;;  %v1920_v30 = vrot.slane %v6098_v10, 1 }
  0x39   : > { %5085 = vmatpush3.bf16.msra.mxu0 %v5696_v7  ;;  %5048 = vmatprep.mubr.bf16.mxu0 %v1903_v32  ;;  %v1917_v7 = vrot.slane %v6073_v53, 2  ;;  %7307 = vst [vmem:[#allocation5_spill] sm:$0xff] %v6106_v23  ;;  %v1915_v32 = vsel %vm1880_vm1, %v1910_v52, %v1914_v14  ;;  %v1921_v35 = vrot.slane %v6106_v23, 2  ;;  %v597_v52 = vrot.slane %v6106_v23, 1 }
  0x3a   : > { %5086 = vmatprep.subr.bf16.mxu0 %v5698_v33  ;;  %4861 = vmatpush3.bf16.msra.mxu1 %v5700_v11  ;;  %v5715_v11 = vld [vmem:[%s7261_s1 + $0x28] sm:$0xff]   ;;  %v2310_v23 = vrot.slane %v6060_v43, 2 }
  0x3b   : > { %4862 = vmatprep.subr.bf16.mxu1 %v5705_v40  ;;  %v1918_v28 = vor.u32 %v1917_v7, %v1916_v6  ;;  %v6128_v48 = vor.u32 %v1921_v35, %v1920_v30  ;;  %v6151_v7 = vshrl.u32 %v6125_v42, 16  ;;  %v6171_v30 = vld [vmem:[%s5908_s26 + $0x78] sm:$0xff]  }
  0x3d   : > { %5087 = vmatpush3.bf16.msra.mxu0 %v5698_v33  ;;  %v582_v33 = vsel %vm506_vm0, %v577_v16, %v581_v19  ;;  %v1919_v39 = vsel %vm1880_vm1, %v1914_v14, %v1918_v28  ;;  %7308 = vst [vmem:[#allocation6_spill] sm:$0xff] %v6128_v48  ;;  %7310 = vst [vmem:[#allocation8_spill] sm:$0xff] %v6151_v7  ;;  %v605_v14 = vrot.slane %v6141_v63, 1  ;;  %v6164_v16 = vld [vmem:[%s7261_s1 + $0x80] sm:$0xff]  }
  0x3e   : > { %5088 = vmatprep.subr.bf16.mxu0 %v5701_v51  ;;  %4863 = vmatpush3.bf16.msra.mxu1 %v5705_v40  ;;  %v5709_v40 = vld [vmem:[%s7261_s1 + $0x178] sm:$0xff]   ;;  %v601_v19 = vor.u32 %v6098_v10, %v597_v52  ;;  %v368_v10 = vld [vmem:[%s5908_s26 + $0xac] sm:$0xf] }
  0x3f   : > { %4825 = vmatmul.mubr.bf16.gmra.mrb[8].mxu1 %v558_v57  ;;  %4864 = vmatprep.subr.bf16.mxu1 %v5711_v1  ;;  %v2293_v57 = vrot.slane %v5917_v13, 2 }
  0x40   : > { %5049 = vmatmul.mubr.bf16.gmra.mrb[8].mxu0 %v1907_v59  ;;  %4828 = vmatprep.mubr.bf16.mxu1 %v566_v61  ;;  %v6134_v59 = vld [vmem:[%s5908_s26 + $0x68] sm:$0xff]   ;;  %v2294_v61 = vrot.slane %v5923_v15, 2  ;;  %v606_v35 = vsel %vm506_vm0, %v601_v19, %v605_v14  ;;  %v5720_v19 = vld [vmem:[%s7261_s1 + $0x190] sm:$0xff]  }
  0x41   : > { %5089 = vmatpush3.bf16.msra.mxu0 %v5701_v51  ;;  %5052 = vmatprep.mubr.bf16.mxu0 %v1911_v5  ;;  %v593_v51 = vor.u32 %v6076_v56, %v589_v41  ;;  %v1923_v5 = vsel %vm1880_vm1, %v1918_v28, %v6128_v48  ;;  %v6154_v8 = vshll.u32 %v6134_v59, 16  ;;  %v609_v28 = vor.u32 %v6151_v7, %v605_v14 }
  0x42   : > { %5090 = vmatprep.subr.bf16.mxu0 %v5704_v0  ;;  %4865 = vmatpush3.bf16.msra.mxu1 %v5711_v1  ;;  %v590_v1 = vsel %vm506_vm0, %v585_v47, %v589_v41  ;;  %v2295_v9 = vsel %vm2292_vm2, %v2293_v57, %v2294_v61  ;;  %v6190_v47 = vshll.u32 %v6171_v30, 16  ;;  %v2302_v14 = vrot.slane %v5994_v60, 2 }
  0x43   : > { %4866 = vmatprep.subr.bf16.mxu1 %v5715_v11  ;;  %v598_v6 = vsel %vm506_vm0, %v593_v51, %v597_v52  ;;  %7311 = vst [vmem:[#allocation9_spill] sm:$0xff] %v6154_v8  ;;  %v5716_v52 = vld [vmem:[%s7261_s1 + $0x188] sm:$0xff]  }
  0x44   : > { %7315 = vst [vmem:[#allocation13_spill] sm:$0xff] %v6190_v47 }
  0x45   : > { %5091 = vmatpush3.bf16.msra.mxu0 %v5704_v0  ;;  %v5723_v0 = vld [vmem:[%s7261_s1 + $0x38] sm:$0xff]  }
  0x46   : > { %5092 = vmatprep.subr.bf16.mxu0 %v5706_v24  ;;  %4867 = vmatpush3.bf16.msra.mxu1 %v5715_v11  ;;  %v6158_v11 = vld [vmem:[%s5908_s26 + $0x70] sm:$0xff]  }
  0x47   : > { %4829 = vmatmul.mubr.bf16.gmra.mrb[12].mxu1 %v574_v29  ;;  %4868 = vmatprep.subr.bf16.mxu1 %v5719_v38  ;;  %v613_v29 = vrot.slane %v6154_v8, 1  ;;  %v6187_v41 = vshrl.u32 %v6158_v11, 16 }
  0x48   : > { %5053 = vmatmul.mubr.bf16.gmra.mrb[12].mxu0 %v1915_v32  ;;  %4832 = vmatprep.mubr.bf16.mxu1 %v582_v33  ;;  %v2298_v32 = vrot.slane %v5956_v37, 2  ;;  %v6176_v33 = vshll.u32 %v6158_v11, 16 }
  0x49   : > { %5056 = vmatprep.mubr.bf16.mxu0 %v1919_v39  ;;  %5093 = vmatpush3.bf16.msra.mxu0 %v5706_v24  ;;  %v2296_v24 = vrot.slane %v5939_v27, 2  ;;  %7314 = vst [vmem:[#allocation12_spill] sm:$0xff] %v6187_v41 }
  0x4a   : > { %5094 = vmatprep.subr.bf16.mxu0 %v5709_v40  ;;  %4869 = vmatpush3.bf16.msra.mxu1 %v5719_v38  ;;  %7312 = vst [vmem:[#allocation10_spill] sm:$0xff] %v6176_v33  ;;  %v6180_v38 = vshrl.u32 %v6134_v59, 16  ;;  %v621_v57 = vrot.slane %v6176_v33, 1 }
  0x4b   : > { %4870 = vmatprep.subr.bf16.mxu1 %v5723_v0  ;;  %v6183_v39 = vsel %vm2292_vm2, %v2294_v61, %v2296_v24  ;;  %v6193_v51 = vsel %vm2292_vm2, %v2296_v24, %v2298_v32  ;;  %v6200_v61 = vld [vmem:[%s5908_s26 + $0x80] sm:$0xff]  }
  0x4c   : > { %7313 = vst [vmem:[#allocation11_spill] sm:$0xff] %v6180_v38  ;;  %v6216_v24 = vshll.u32 %v6200_v61, 16 }
  0x4d   : > { %5095 = vmatpush3.bf16.msra.mxu0 %v5709_v40  ;;  %v614_v40 = vsel %vm506_vm0, %v609_v28, %v613_v29  ;;  %v6220_v28 = vshrl.u32 %v6171_v30, 16 }
  0x4e   : > { %5136 = vmatprep.subr.bf16.mxu0 %v5712_v62  ;;  %4871 = vmatpush3.bf16.msra.mxu1 %v5723_v0  ;;  %v617_v0 = vor.u32 %v6180_v38, %v613_v29  ;;  %7316 = vst [vmem:[#allocation14_spill] sm:$0xff] %v6216_v24  ;;  %v6223_v29 = vshrl.u32 %v6200_v61, 16  ;;  %v366_v38 = vld [vmem:[%s5908_s26 + $0xa4] sm:$0xf] }
  0x4f   : > { %4833 = vmatmul.mubr.bf16.gmra.mrb[16].mxu1 %v590_v1  ;;  %4912 = vmatprep.subr.bf16.mxu1 %v6164_v16  ;;  %v2300_v1 = vrot.slane %v5973_v46, 2  ;;  %7317 = vst [vmem:[#allocation15_spill] sm:$0xff] %v6220_v28 }
  0x50   : > { %5057 = vmatmul.mubr.bf16.gmra.mrb[16].mxu0 %v1923_v5  ;;  %4836 = vmatprep.mubr.bf16.mxu1 %v598_v6  ;;  %v625_v5 = vor.u32 %v6187_v41, %v621_v57  ;;  %v629_v6 = vrot.slane %v6190_v47, 1  ;;  %7318 = vst [vmem:[#allocation16_spill] sm:$0xff] %v6223_v29  ;;  %v6233_v47 = vld [vmem:[%s5908_s26 + $0x90] sm:$0xff]   ;;  %v6253_v41 = vld [vmem:[%s5908_s26 + $0x98] sm:$0xff]  }
  0x51   : > { %5096 = vmatprep.mubr.bf16.mxu0 %v2295_v9  ;;  %v6209_v9 = vld [vmem:[%s5908_s26 + $0x88] sm:$0xff]   ;;  %v6256_v8 = vshll.u32 %v6233_v47, 16  ;;  %v6272_v63 = vshll.u32 %v6253_v41, 16 }
  0x52   : > { %v6230_v48 = vshll.u32 %v6209_v9, 16  ;;  %v6247_v33 = vshrl.u32 %v6209_v9, 16 }
  0x53   : > { %7321 = vst [vmem:[#allocation19_spill] sm:$0xff] %v6256_v8  ;;  %7323 = vst [vmem:[#allocation21_spill] sm:$0xff] %v6272_v63  ;;  %v661_v53 = vrot.slane %v6272_v63, 1 }
  0x54   : > { %7319 = vst [vmem:[#allocation17_spill] sm:$0xff] %v6230_v48  ;;  %7320 = vst [vmem:[#allocation18_spill] sm:$0xff] %v6247_v33 }
  0x57   : > { %4837 = vmatmul.mubr.bf16.gmra.mrb[20].mxu1 %v606_v35  ;;  %v6226_v35 = vsel %vm2292_vm2, %v2298_v32, %v2300_v1  ;;  %v637_v32 = vrot.slane %v6216_v24, 1  ;;  %v645_v24 = vrot.slane %v6230_v48, 1  ;;  %v6269_v48 = vshrl.u32 %v6233_v47, 16 }
  0x58   : > { %5097 = vmatmul.mubr.bf16.vlgmr.msra.gmra.mrb[0].mxu0 %v6183_v39  ;;  %4840 = vmatprep.mubr.bf16.mxu1 %v614_v40  ;;  %v630_v40 = vsel %vm506_vm0, %v625_v5, %v629_v6  ;;  %v633_v5 = vor.u32 %v6220_v28, %v629_v6  ;;  %v5729_v6 = vld [vmem:[%s7261_s1 + $0x1a0] sm:$0xff]  }
  0x59   : > { %5137 = vmatpush3.bf16.msra.mxu0 %v5712_v62  ;;  %5100 = vmatprep.mubr.bf16.mxu0 %v6193_v51  ;;  %v622_v62 = vsel %vm506_vm0, %v617_v0, %v621_v57  ;;  %v6236_v57 = vsel %vm2292_vm2, %v2300_v1, %v2302_v14  ;;  %v5724_v0 = vld [vmem:[%s7261_s1 + $0x198] sm:$0xff]   ;;  %v2306_v1 = vrot.slane %v6031_v22, 2  ;;  %7322 = vst [vmem:[#allocation20_spill] sm:$0xff] %v6269_v48 }
  0x5a   : > { %5138 = vmatprep.subr.bf16.mxu0 %v5716_v52  ;;  %v638_v28 = vsel %vm506_vm0, %v633_v5, %v637_v32 }
  0x5d   : > { %5139 = vmatpush3.bf16.msra.mxu0 %v5716_v52  ;;  %v2304_v52 = vrot.slane %v6010_v4, 2 }
  0x5e   : > { %5140 = vmatprep.subr.bf16.mxu0 %v5720_v19 }
  0x5f   : > { %4841 = vmatmul.mubr.bf16.gmra.mrb[24].mxu1 %v622_v62  ;;  %v641_v62 = vor.u32 %v6223_v29, %v637_v32  ;;  %v6275_v7 = vsel %vm2292_vm2, %v2304_v52, %v2306_v1  ;;  %v653_v32 = vrot.slane %v6256_v8, 1  ;;  %v6290_v8 = vld [vmem:[%s5908_s26 + $0xa8] sm:$0xf] }
  0x60   : > { %5101 = vmatmul.mubr.bf16.gmra.mrb[4].mxu0 %v6226_v35  ;;  %4844 = vmatprep.mubr.bf16.mxu1 %v630_v40  ;;  %v365_v40 = vld [vmem:[%s5908_s26 + $0xa0] sm:$0xf] }
  0x61   : > { %5104 = vmatprep.mubr.bf16.mxu0 %v6236_v57  ;;  %5141 = vmatpush3.bf16.msra.mxu0 %v5720_v19  ;;  %v6265_v19 = vsel %vm2292_vm2, %v2302_v14, %v2304_v52  ;;  %v646_v29 = vsel %vm506_vm0, %v641_v62, %v645_v24  ;;  %v5731_v14 = vld [vmem:[%s7261_s1 + $0x1a8] sm:$0xff]   ;;  %v6281_v5 = vcombine.low %v365_v40, %v365_v40  ;;  %v2308_v52 = vrot.slane %v6045_v31, 2 }
  0x62   : > { %5142 = vmatprep.subr.bf16.mxu0 %v5724_v0  ;;  %v6283_v62 = vcombine.low %v365_v40, %v366_v38  ;;  %v5733_v38 = vld [vmem:[%s7261_s1 + $0x1b0] sm:$0xff]  }
  0x63   : > { %7324 = vst [vmem:[#allocation22_spill] sm:$0xff] %v6281_v5  ;;  %v667_v40 = vshll.u32 %v6281_v5, 16  ;;  %v6312_v63 = vsel %vm2292_vm2, %v2306_v1, %v2308_v52  ;;  %v6325_v5 = vsel %vm2292_vm2, %v2308_v52, %v2310_v23  ;;  %v6335_v52 = vld [vmem:[%s7261_s1 + $0x1c0] sm:$0xff]  }
  0x64   : > { %7325 = vst [vmem:[#allocation23_spill] sm:$0xff] %v6283_v62 }
  0x65   : > { %5143 = vmatpush3.bf16.msra.mxu0 %v5724_v0  ;;  %v649_v0 = vor.u32 %v6247_v33, %v645_v24  ;;  %v6300_v24 = vcombine.low %v6290_v8, %v368_v10  ;;  %v6307_v33 = vrot.slane %v6283_v62, 2  ;;  %v5735_v10 = vld [vmem:[%s7261_s1 + $0x1b8] sm:$0xff]  }
  0x66   : > { %5144 = vmatprep.subr.bf16.mxu0 %v5729_v6 }
  0x67   : > { %4845 = vmatmul.mubr.bf16.gmra.mrb[28].mxu1 %v638_v28  ;;  %v657_v28 = vor.u32 %v6269_v48, %v653_v32  ;;  %v2658_v48 = vrot.slane %v6300_v24, 2 }
  0x68   : > { %5105 = vmatmul.mubr.bf16.gmra.mrb[8].mxu0 %v6265_v19  ;;  %4848 = vmatprep.mubr.bf16.mxu1 %v646_v29  ;;  %v6303_v29 = vshrl.u32 %v6253_v41, 16 }
  0x69   : > { %5108 = vmatprep.mubr.bf16.mxu0 %v6275_v7  ;;  %5145 = vmatpush3.bf16.msra.mxu0 %v5729_v6  ;;  %v654_v6 = vsel %vm506_vm0, %v649_v0, %v653_v32  ;;  %v662_v56 = vsel %vm506_vm0, %v657_v28, %v661_v53  ;;  %v6322_v62 = vsel %vm2292_vm2, %v6307_v33, %v2658_v48  ;;  %v669_v32 = vrot.slane %v667_v40, 1 }
  0x6a   : > { %5146 = vmatprep.subr.bf16.mxu0 %v5731_v14  ;;  %v665_v1 = vor.u32 %v6303_v29, %v661_v53  ;;  %v2314_v0 = vrot.slane %v6125_v42, 2  ;;  %v2318_v40 = vrot.slane %v6158_v11, 2 }
  0x6c   : > { %v670_v28 = vsel %vm506_vm0, %v665_v1, %v669_v32  ;;  %v5732_v1 = vld [vmem:[%s7261_s1 + $0x90] sm:$0xff]   ;;  %v2322_v32 = vrot.slane %v6200_v61, 2 }
  0x6d   : > { %5147 = vmatpush3.bf16.msra.mxu0 %v5731_v14  ;;  %v2312_v14 = vrot.slane %v6080_v58, 2 }
  0x6e   : > { %5148 = vmatprep.subr.bf16.mxu0 %v5733_v38 }
  0x6f   : > { %4849 = vmatmul.mubr.bf16.gmra.mrb[32].mxu1 %v654_v6  ;;  %v6342_v53 = vsel %vm2292_vm2, %v2312_v14, %v2314_v0 }
  0x70   : > { %5109 = vmatmul.mubr.bf16.gmra.mrb[12].mxu0 %v6312_v63  ;;  %4852 = vmatprep.mubr.bf16.mxu1 %v662_v56  ;;  %v6339_v56 = vsel %vm2292_vm2, %v2310_v23, %v2312_v14  ;;  %v2324_v14 = vrot.slane %v6209_v9, 2 }
  0x71   : > { %5112 = vmatprep.mubr.bf16.mxu0 %v6325_v5  ;;  %5149 = vmatpush3.bf16.msra.mxu0 %v5733_v38  ;;  %v2316_v38 = vrot.slane %v6134_v59, 2 }
  0x72   : > { %5150 = vmatprep.subr.bf16.mxu0 %v5735_v10 }
  0x73   : > { %v6351_v23 = vsel %vm2292_vm2, %v2314_v0, %v2316_v38  ;;  %v6354_v6 = vsel %vm2292_vm2, %v2316_v38, %v2318_v40  ;;  %v2326_v0 = vrot.slane %v6233_v47, 2  ;;  %v6388_v38 = vsel %vm2292_vm2, %v2322_v32, %v2324_v14 }
  0x75   : > { %5151 = vmatpush3.bf16.msra.mxu0 %v5735_v10  ;;  %v5730_v10 = vld [vmem:[%s7261_s1 + $0x88] sm:$0xff]  }
  0x76   : > { %5192 = vmatprep.subr.bf16.mxu0 %v6335_v52 }
  0x77   : > { %4853 = vmatmul.mubr.bf16.gmra.mrb[36].mxu1 %v670_v28  ;;  %v5737_v28 = vld [vmem:[%s7261_s1 + $0xa0] sm:$0xff]  }
  0x78   : > { %5113 = vmatmul.mubr.bf16.gmra.mrb[16].mxu0 %v6339_v56  ;;  %4872 = vmatprep.mubr.bf16.mxu1 %v5914_v12  ;;  %v2320_v12 = vrot.slane %v6171_v30, 2 }
  0x79   : > { %5116 = vmatprep.mubr.bf16.mxu0 %v6342_v53 }
  0x7f   : > { %4873 = vmatmul.mubr.bf16.vlgmr.msra.gmra.mrb[0].mxu1 %v5917_v13  ;;  %v6370_v13 = vsel %vm2292_vm2, %v2318_v40, %v2320_v12  ;;  %v2328_v40 = vrot.slane %v6253_v41, 2 }
  0x80   : > { %5117 = vmatmul.mubr.bf16.gmra.mrb[20].mxu0 %v6351_v23  ;;  %4913 = vmatpush3.bf16.msra.mxu1 %v6164_v16  ;;  %v6373_v16 = vsel %vm2292_vm2, %v2320_v12, %v2322_v32  ;;  %v6426_v32 = vld [vmem:[%s7261_s1 + $0xc0] sm:$0xff]  }
  0x81   : > { %4876 = vmatprep.mubr.bf16.mxu1 %v5923_v15  ;;  %5120 = vmatprep.mubr.bf16.mxu0 %v6354_v6  ;;  %v5734_v15 = vld [vmem:[%s7261_s1 + $0x98] sm:$0xff]   ;;  %v6405_v12 = vsel %vm2292_vm2, %v2326_v0, %v2328_v40 }
  0x82   : > { %4914 = vmatprep.subr.bf16.mxu1 %v5730_v10 }
  0x84   : > { %4915 = vmatpush3.bf16.msra.mxu1 %v5730_v10  ;;  %v5741_v10 = vld [vmem:[%s7261_s1 + $0xb0] sm:$0xff]  }
  0x85   : > { %4916 = vmatprep.subr.bf16.mxu1 %v5732_v1 }
  0x87   : > { %4877 = vmatmul.mubr.bf16.gmra.mrb[4].mxu1 %v5939_v27  ;;  %v6391_v27 = vsel %vm2292_vm2, %v2324_v14, %v2326_v0  ;;  %v6489_v0 = vld [vmem:[%s5908_s26 + $0x18] sm:$0xff]  }
  0x88   : > { %5121 = vmatmul.mubr.bf16.gmra.mrb[24].mxu0 %v6370_v13  ;;  %4880 = vmatprep.mubr.bf16.mxu1 %v5956_v37  ;;  %v5739_v37 = vld [vmem:[%s7261_s1 + $0xa8] sm:$0xff]  }
  0x89   : > { %5124 = vmatprep.mubr.bf16.mxu0 %v6373_v16  ;;  %4917 = vmatpush3.bf16.msra.mxu1 %v5732_v1  ;;  %v5743_v1 = vld [vmem:[%s7261_s1 + $0xb8] sm:$0xff]  }
  0x8a   : > { %4918 = vmatprep.subr.bf16.mxu1 %v5734_v15 }
  0x8d   : > { %4919 = vmatpush3.bf16.msra.mxu1 %v5734_v15 }
  0x8e   : > { %4920 = vmatprep.subr.bf16.mxu1 %v5737_v28 }
  0x8f   : > { %4881 = vmatmul.mubr.bf16.gmra.mrb[8].mxu1 %v5973_v46  ;;  %v6409_v46 = vcombine.low %v6290_v8, %v6290_v8 }
  0x90   : > { %5125 = vmatmul.mubr.bf16.gmra.mrb[28].mxu0 %v6388_v38  ;;  %4884 = vmatprep.mubr.bf16.mxu1 %v5994_v60  ;;  %v6413_v60 = vsel %vm2292_vm2, %v2328_v40, %v6307_v33 }
  0x91   : > { %5128 = vmatprep.mubr.bf16.mxu0 %v6391_v27  ;;  %4921 = vmatpush3.bf16.msra.mxu1 %v5737_v28  ;;  %v2332_v8 = vrot.slane %v6409_v46, 2  ;;  %v1216_v28 = vrot.slane %v6489_v0, 1 }
  0x92   : > { %4922 = vmatprep.subr.bf16.mxu1 %v5739_v37 }
  0x93   : > { %v2333_v15 = vsel %vm2292_vm2, %v6307_v33, %v2332_v8  ;;  %v5746_v33 = vld [vmem:[%s7261_s1 + $0x1e0] sm:$0xff]  }
  0x95   : > { %4923 = vmatpush3.bf16.msra.mxu1 %v5739_v37 }
  0x96   : > { %4924 = vmatprep.subr.bf16.mxu1 %v5741_v10 }
  0x97   : > { %4885 = vmatmul.mubr.bf16.gmra.mrb[12].mxu1 %v6010_v4  ;;  %v5740_v4 = vld [vmem:[%s7261_s1 + $0x1c8] sm:$0xff]  }
  0x98   : > { %5129 = vmatmul.mubr.bf16.gmra.mrb[32].mxu0 %v6405_v12  ;;  %4888 = vmatprep.mubr.bf16.mxu1 %v6031_v22  ;;  %v5742_v22 = vld [vmem:[%s7261_s1 + $0x1d0] sm:$0xff]  }
  0x99   : > { %5132 = vmatprep.mubr.bf16.mxu0 %v6413_v60  ;;  %4925 = vmatpush3.bf16.msra.mxu1 %v5741_v10 }
  0x9a   : > { %4926 = vmatprep.subr.bf16.mxu1 %v5743_v1 }
  0x9d   : > { %4927 = vmatpush3.bf16.msra.mxu1 %v5743_v1  ;;  %v6511_v1 = vld [vmem:[%s5908_s26 + $0x28] sm:$0xff]  }
  0x9e   : > { %4968 = vmatprep.subr.bf16.mxu1 %v6426_v32  ;;  %v1220_v8 = vrot.slane %v6511_v1, 1 }
  0x9f   : > { %4889 = vmatmul.mubr.bf16.gmra.mrb[16].mxu1 %v6045_v31 }
  0xa0   : > { %5133 = vmatmul.mubr.bf16.gmra.mrb[36].mxu0 %v2333_v15  ;;  %4892 = vmatprep.mubr.bf16.mxu1 %v6060_v43  ;;  %v5744_v43 = vld [vmem:[%s7261_s1 + $0x1d8] sm:$0xff]   ;;  %v5749_v15 = vld [vmem:[%s7261_s1 + $0xd0] sm:$0xff]  }
  0xa1   : > { %5152 = vmatprep.mubr.bf16.mxu0 %v6183_v39  ;;  %v5748_v39 = vld [vmem:[%s7261_s1 + $0x1e8] sm:$0xff]  }
  0xa7   : > { %4893 = vmatmul.mubr.bf16.gmra.mrb[20].mxu1 %v6080_v58 }
  0xa8   : > { %5153 = vmatmul.mubr.bf16.vlgmr.msra.gmra.mrb[0].mxu0 %v6193_v51  ;;  %4896 = vmatprep.mubr.bf16.mxu1 %v6125_v42  ;;  %v5750_v51 = vld [vmem:[%s7261_s1 + $0x1f0] sm:$0xff]  }
  0xa9   : > { %5193 = vmatpush3.bf16.msra.mxu0 %v6335_v52  ;;  %5156 = vmatprep.mubr.bf16.mxu0 %v6226_v35  ;;  %v5752_v35 = vld [vmem:[%s7261_s1 + $0x1f8] sm:$0xff]   ;;  %v6477_v52 = vld [vmem:[%s7261_s1 + $0x200] sm:$0xff]  }
  0xaa   : > { %5194 = vmatprep.subr.bf16.mxu0 %v5740_v4 }
  0xad   : > { %5195 = vmatpush3.bf16.msra.mxu0 %v5740_v4  ;;  %v5819_v4 = vmov 0  }
  0xae   : > { %5196 = vmatprep.subr.bf16.mxu0 %v5742_v22  ;;  %5669 = vset.pattern.permute.xlu1 %v5819_v4 }
  0xaf   : > { %4897 = vmatmul.mubr.bf16.gmra.mrb[24].mxu1 %v6134_v59  ;;  %5668 = vset.pattern.permute.xlu0 %v5819_v4  ;;  %v6599_v4 = vld [vmem:[%s5908_s26 + $0xb0] ss:$0 sps:$4 sm:$0xff]  }
  0xb0   : > { %5157 = vmatmul.mubr.bf16.gmra.mrb[4].mxu0 %v6236_v57  ;;  %4900 = vmatprep.mubr.bf16.mxu1 %v6158_v11  ;;  %v5768_v57 = vld [vmem:[%s5908_s26 + $0x8] sm:$0xff]  }
  0xb1   : > { %5160 = vmatprep.mubr.bf16.mxu0 %v6265_v19  ;;  %5197 = vmatpush3.bf16.msra.mxu0 %v5742_v22  ;;  %v1212_v19 = vrot.slane %v5768_v57, 1  ;;  %v3856_v57 = vld [vmem:[%s7264_s4 + $0x28] sm:$0xff] }
  0xb2   : > { %5198 = vmatprep.subr.bf16.mxu0 %v5744_v43 }
  0xb5   : > { %5199 = vmatpush3.bf16.msra.mxu0 %v5744_v43  ;;  %v5751_v43 = vld [vmem:[%s7261_s1 + $0xd8] sm:$0xff]  }
  0xb6   : > { %5200 = vmatprep.subr.bf16.mxu0 %v5746_v33 }
  0xb7   : > { %4901 = vmatmul.mubr.bf16.gmra.mrb[28].mxu1 %v6171_v30 }
  0xb8   : > { %5161 = vmatmul.mubr.bf16.gmra.mrb[8].mxu0 %v6275_v7  ;;  %4904 = vmatprep.mubr.bf16.mxu1 %v6200_v61 }
  0xb9   : > { %5164 = vmatprep.mubr.bf16.mxu0 %v6312_v63  ;;  %5201 = vmatpush3.bf16.msra.mxu0 %v5746_v33  ;;  %v5767_v63 = vld [vmem:[%s5908_s26] sm:$0xff]   ;;  %v6536_v33 = vld [vmem:[%s5908_s26 + $0x30] sm:$0xff]  }
  0xba   : > { %5202 = vmatprep.subr.bf16.mxu0 %v5748_v39  ;;  %v1211_v7 = vrot.slane %v5767_v63, 1  ;;  %v6547_v63 = vld [vmem:[%s5908_s26 + $0x38] sm:$0xff]  }
  0xbd   : > { %5203 = vmatpush3.bf16.msra.mxu0 %v5748_v39  ;;  %v1222_v39 = vrot.slane %v6536_v33, 1 }
  0xbe   : > { %5204 = vmatprep.subr.bf16.mxu0 %v5750_v51 }
  0xbf   : > { %4905 = vmatmul.mubr.bf16.gmra.mrb[32].mxu1 %v6209_v9 }
  0xc0   : > { %5165 = vmatmul.mubr.bf16.gmra.mrb[12].mxu0 %v6325_v5  ;;  %4908 = vmatprep.mubr.bf16.mxu1 %v6233_v47  ;;  %v1213_v5 = vsel %vm1210_vm3, %v1211_v7, %v1212_v19  ;;  %v5755_v7 = vld [vmem:[%s7261_s1 + $0xe0] sm:$0xff]  }
  0xc1   : > { %5168 = vmatprep.mubr.bf16.mxu0 %v6339_v56  ;;  %5205 = vmatpush3.bf16.msra.mxu0 %v5750_v51  ;;  %v6484_v56 = vld [vmem:[%s5908_s26 + $0x10] sm:$0xff]   ;;  %v3854_v51 = vld [vmem:[%s7264_s4 + $0x18] sm:$0xff] }
  0xc2   : > { %5206 = vmatprep.subr.bf16.mxu0 %v5752_v35  ;;  %v1214_v14 = vrot.slane %v6484_v56, 1 }
  0xc4   : > { %v6493_v37 = vsel %vm1210_vm3, %v1212_v19, %v1214_v14  ;;  %v6496_v40 = vsel %vm1210_vm3, %v1214_v14, %v1216_v28  ;;  %v6557_v19 = vsel %vm1210_vm3, %v1220_v8, %v1222_v39  ;;  %v5757_v14 = vld [vmem:[%s7261_s1 + $0xe8] sm:$0xff]  }
  0xc5   : > { %5207 = vmatpush3.bf16.msra.mxu0 %v5752_v35  ;;  %v3852_v35 = vld [vmem:[%s7264_s4 + $0x8] sm:$0xff] }
  0xc6   : > { %5248 = vmatprep.subr.bf16.mxu0 %v6477_v52 }
  0xc7   : > { %4909 = vmatmul.mubr.bf16.gmra.mrb[36].mxu1 %v6253_v41 }
  0xc8   : > { %5169 = vmatmul.mubr.bf16.gmra.mrb[16].mxu0 %v6342_v53  ;;  %4928 = vmatprep.mubr.bf16.mxu1 %v1213_v5  ;;  %v5747_v53 = vld [vmem:[%s7261_s1 + $0xc8] sm:$0xff]  }
  0xc9   : > { %5172 = vmatprep.mubr.bf16.mxu0 %v6351_v23  ;;  %v6505_v23 = vld [vmem:[%s5908_s26 + $0x20] sm:$0xff]  }
  0xca   : > { %v1218_v10 = vrot.slane %v6505_v23, 1 }
  0xcc   : > { %v6527_v22 = vsel %vm1210_vm3, %v1218_v10, %v1220_v8  ;;  %v3857_v8 = vld [vmem:[%s7264_s4 + $0x30] sm:$0xff] }
  0xcf   : > { %4929 = vmatmul.mubr.bf16.vlgmr.msra.gmra.mrb[0].mxu1 %v6493_v37 }
  0xd0   : > { %5173 = vmatmul.mubr.bf16.gmra.mrb[20].mxu0 %v6354_v6  ;;  %4969 = vmatpush3.bf16.msra.mxu1 %v6426_v32  ;;  %v3853_v6 = vld [vmem:[%s7264_s4 + $0x10] sm:$0xff]  ;;  %v3851_v32 = vld [vmem:[%s7264_s4] sm:$0xff] }
  0xd1   : > { %4932 = vmatprep.mubr.bf16.mxu1 %v6496_v40  ;;  %5176 = vmatprep.mubr.bf16.mxu0 %v6370_v13  ;;  %v6524_v13 = vsel %vm1210_vm3, %v1216_v28, %v1218_v10  ;;  %v6572_v28 = vld [vmem:[%s5908_s26 + $0x40] sm:$0xff]   ;;  %v3858_v10 = vld [vmem:[%s7264_s4 + $0x38] sm:$0xff] }
  0xd2   : > { %4970 = vmatprep.subr.bf16.mxu1 %v5747_v53  ;;  %3903 = vperm.xlu1 %5669, %v3853_v6   ;;  %v3860_v6 = vld [vmem:[%s7264_s4 + $0x48] sm:$0xff] }
  0xd3   : > { %3893 = vperm.xlu0 %5668, %v3851_v32  }
  0xd4   : > { %4971 = vmatpush3.bf16.msra.mxu1 %v5747_v53  ;;  %v1226_v53 = vrot.slane %v6572_v28, 1 }
  0xd5   : > { %4972 = vmatprep.subr.bf16.mxu1 %v5749_v15 }
  0xd6   : > { %3908 = vperm.xlu1 %5669, %v3854_v51   ;;  %v2966_v51 = vrot.slane %v5953_v36, 2  ;;  %v3861_v36 = vld [vmem:[%s7264_s4 + $0x50] sm:$0xff] }
  0xd7   : > { %4933 = vmatmul.mubr.bf16.gmra.mrb[4].mxu1 %v6524_v13  ;;  %3898 = vperm.xlu0 %5668, %v3852_v35   ;;  %v2967_v35 = vrot.slane %v5950_v34, 3  ;;  %v3862_v34 = vld [vmem:[%s7264_s4 + $0x58] sm:$0xff] }
  0xd8   : > { %5177 = vmatmul.mubr.bf16.gmra.mrb[24].mxu0 %v6373_v16  ;;  %4936 = vmatprep.mubr.bf16.mxu1 %v6527_v22  ;;  %v1224_v16 = vrot.slane %v6547_v63, 1 }
  0xd9   : > { %5180 = vmatprep.mubr.bf16.mxu0 %v6388_v38  ;;  %4973 = vmatpush3.bf16.msra.mxu1 %v5749_v15  ;;  %v3855_v38 = vld [vmem:[%s7264_s4 + $0x20] sm:$0xff]  ;;  %v1228_v15 = vrot.slane %v6045_v31, 1 }
  0xda   : > { %4974 = vmatprep.subr.bf16.mxu1 %v5751_v43  ;;  %v6563_v5 = vsel %vm1210_vm3, %v1222_v39, %v1224_v16  ;;  %3918 = vperm.xlu1 %5669, %v3856_v57   ;;  %v6590_v32 = vsel %vm1210_vm3, %v1224_v16, %v1226_v53  ;;  %v3859_v31 = vld [vmem:[%s7264_s4 + $0x40] sm:$0xff]  ;;  %v2964_v39 = vrot.slane %v5930_v20, 3  ;;  %v5761_v16 = vld [vmem:[%s7261_s1 + $0xf8] sm:$0xff]  }
  0xdb   : > { %3913 = vperm.xlu0 %5668, %v3855_v38   ;;  %v2968_v38 = vor.u32 %v2967_v35, %v2966_v51  ;;  %v3868_v51 = vld [vmem:[%s7264_s4 + $0x88] sm:$0xff]  ;;  %v3867_v35 = vld [vmem:[%s7264_s4 + $0x80] sm:$0xff] }
  0xdd   : > { %4975 = vmatpush3.bf16.msra.mxu1 %v5751_v43  ;;  %v2963_v43 = vrot.slane %v5933_v21, 2  ;;  %v6612_v21 = vld [vmem:[%s5908_s26 + $0x50] sm:$0xff]  }
  0xde   : > { %4976 = vmatprep.subr.bf16.mxu1 %v5755_v7  ;;  %3928 = vperm.xlu1 %5669, %v3858_v10   ;;  %v1230_v20 = vrot.slane %v6612_v21, 1 }
  0xdf   : > { %4937 = vmatmul.mubr.bf16.gmra.mrb[8].mxu1 %v6557_v19  ;;  %3923 = vperm.xlu0 %5668, %v3857_v8   ;;  %v2965_v57 = vor.u32 %v2964_v39, %v2963_v43  ;;  %v2970_v8 = vrot.slane %v5970_v45, 2  ;;  %v6647_v43 = vld [vmem:[%s7261_s1 + $0x100] sm:$0xff]   ;;  %v3866_v45 = vld [vmem:[%s7264_s4 + $0x78] sm:$0xff] }
  0xe0   : > { %5181 = vmatmul.mubr.bf16.gmra.mrb[28].mxu0 %v6391_v27  ;;  %4940 = vmatprep.mubr.bf16.mxu1 %v6563_v5  ;;  %v5759_v27 = vld [vmem:[%s7261_s1 + $0xf0] sm:$0xff]  }
  0xe1   : > { %5184 = vmatprep.mubr.bf16.mxu0 %v6405_v12  ;;  %4977 = vmatpush3.bf16.msra.mxu1 %v5755_v7  ;;  %v6596_v12 = vsel %vm1210_vm3, %v1226_v53, %v1228_v15  ;;  %v2660_v7 = vrot.slane %v6599_v4, 2  ;;  %v6628_v53 = vsel %vm1210_vm3, %v1228_v15, %v1230_v20  ;;  %v2974_v15 = vrot.slane %v5986_v55, 2 }
  0xe2   : > { %4978 = vmatprep.subr.bf16.mxu1 %v5757_v14  ;;  %3938 = vperm.xlu1 %5669, %v3860_v6   ;;  %v2969_v6 = vsel %vm2962_vm4, %v2965_v57, %v2968_v38  ;;  %v2983_v57 = vrot.slane %v6025_v17, 3 }
  0xe3   : > { %3933 = vperm.xlu0 %5668, %v3859_v31   ;;  %v2975_v31 = vrot.slane %v5983_v54, 3  ;;  %v3865_v54 = vld [vmem:[%s7264_s4 + $0x70] sm:$0xff] }
  0xe5   : > { %4979 = vmatpush3.bf16.msra.mxu1 %v5757_v14  ;;  %v3864_v14 = vld [vmem:[%s7264_s4 + $0x68] sm:$0xff]  ;;  %v2976_v39 = vor.u32 %v2975_v31, %v2974_v15  ;;  %v2990_v31 = vrot.slane %v6067_v50, 2 }
  0xe6   : > { %4980 = vmatprep.subr.bf16.mxu1 %v5759_v27  ;;  %3948 = vperm.xlu1 %5669, %v3862_v34   ;;  %v2979_v34 = vrot.slane %v6004_v2, 3  ;;  %v3870_v2 = vld [vmem:[%s7264_s4 + $0x98] sm:$0xff] }
  0xe7   : > { %4941 = vmatmul.mubr.bf16.gmra.mrb[12].mxu1 %v6590_v32  ;;  %3943 = vperm.xlu0 %5668, %v3861_v36  }
  0xe8   : > { %5185 = vmatmul.mubr.bf16.gmra.mrb[32].mxu0 %v6413_v60  ;;  %4944 = vmatprep.mubr.bf16.mxu1 %v6596_v12  ;;  %v1232_v60 = vrot.slane %v6080_v58, 1  ;;  %v2661_v58 = vsel %vm2292_vm2, %v2658_v48, %v2660_v7  ;;  %v1236_v48 = vrot.slane %v6134_v59, 1  ;;  %v2978_v59 = vrot.slane %v6007_v3, 2  ;;  %v5758_v7 = vld [vmem:[%s7261_s1 + $0x208] sm:$0xff]  }
  0xe9   : > { %5188 = vmatprep.mubr.bf16.mxu0 %v6322_v62  ;;  %4981 = vmatpush3.bf16.msra.mxu1 %v5759_v27  ;;  %v3863_v62 = vld [vmem:[%s7264_s4 + $0x60] sm:$0xff]  ;;  %v2971_v27 = vrot.slane %v5967_v44, 3  ;;  %v1234_v44 = vrot.slane %v6125_v42, 1  ;;  %v1238_v3 = vrot.slane %v6158_v11, 1  ;;  %v5760_v11 = vld [vmem:[%s7261_s1 + $0x210] sm:$0xff]  }
  0xea   : > { %4982 = vmatprep.subr.bf16.mxu1 %v5761_v16  ;;  %v6637_v10 = vsel %vm1210_vm3, %v1230_v20, %v1232_v60  ;;  %3958 = vperm.xlu1 %5669, %v3864_v14   ;;  %v2980_v17 = vor.u32 %v2979_v34, %v2978_v59  ;;  %v7327_v34 = vld [vmem:[#allocation2_spill] sm:$0xff] }
  0xeb   : > { %3953 = vperm.xlu0 %5668, %v3863_v62   ;;  %v2972_v55 = vor.u32 %v2971_v27, %v2970_v8  ;;  %v6664_v42 = vsel %vm1210_vm3, %v1232_v60, %v1234_v44  ;;  %v6671_v20 = vsel %vm1210_vm3, %v1234_v44, %v1236_v48  ;;  %v2982_v60 = vrot.slane %v6028_v18, 2  ;;  %v3872_v62 = vld [vmem:[%s7264_s4 + $0xa8] sm:$0xff] }
  0xec   : > { %v1240_v18 = vrot.slane %v6171_v30, 1  ;;  %v2981_v30 = vsel %vm2962_vm4, %v2976_v39, %v2980_v17  ;;  %v2986_v27 = vrot.slane %v6039_v26, 2  ;;  %v2991_v44 = vrot.slane %v6064_v49, 3  ;;  %v3874_v26 = vld [vmem:[%s7264_s4 + $0xb8] sm:$0xff]  ;;  %v3873_v49 = vld [vmem:[%s7264_s4 + $0xb0] sm:$0xff] }
  0xed   : > { %4983 = vmatpush3.bf16.msra.mxu1 %v5761_v16  ;;  %v2973_v16 = vsel %vm2962_vm4, %v2968_v38, %v2972_v55  ;;  %v2977_v36 = vsel %vm2962_vm4, %v2972_v55, %v2976_v39  ;;  %v3869_v38 = vld [vmem:[%s7264_s4 + $0x90] sm:$0xff]  ;;  %v2984_v14 = vor.u32 %v2983_v57, %v2982_v60 }
  0xee   : > { %5304 = vmatprep.subr.bf16.mxu1 %v6647_v43  ;;  %3968 = vperm.xlu1 %5669, %v3866_v45   ;;  %v6706_v8 = vsel %vm1210_vm3, %v1238_v3, %v1240_v18  ;;  %v5762_v45 = vld [vmem:[%s7261_s1 + $0x218] sm:$0xff]   ;;  %v2992_v55 = vor.u32 %v2991_v44, %v2990_v31  ;;  %v7328_v60 = vld [vmem:[#allocation4_spill] sm:$0xff] }
  0xef   : > { %4945 = vmatmul.mubr.bf16.gmra.mrb[16].mxu1 %v6628_v53  ;;  %3963 = vperm.xlu0 %5668, %v3865_v54   ;;  %v2985_v15 = vsel %vm2962_vm4, %v2980_v17, %v2984_v14  ;;  %v1244_v54 = vrot.slane %v6209_v9, 1  ;;  %v2998_v57 = vrot.slane %v7328_v60, 2  ;;  %v1246_v17 = vrot.slane %v6233_v47, 1  ;;  %v5765_v47 = vld [vmem:[%s7261_s1 + $0x230] sm:$0xff]   ;;  %v3883_v60 = vld [vmem:[%s7264_s4 + $0x100] sm:$0xff] }
  0xf0   : > { %5189 = vmatmul.mubr.bf16.gmra.mrb[36].mxu0 %v2661_v58  ;;  %4948 = vmatprep.mubr.bf16.mxu1 %v6637_v10  ;;  %v6699_v58 = vsel %vm1210_vm3, %v1236_v48, %v1238_v3  ;;  %v5763_v48 = vld [vmem:[%s7261_s1 + $0x220] sm:$0xff]   ;;  %v7329_v3 = vld [vmem:[#allocation5_spill] sm:$0xff]  ;;  %v7330_v31 = vld [vmem:[#allocation8_spill] sm:$0xff] }
  0xf1   : > { %5208 = vmatprep.mubr.bf16.mxu0 %v2969_v6  ;;  %v2987_v6 = vrot.slane %v6036_v25, 3  ;;  %v1242_v25 = vrot.slane %v6200_v61, 1  ;;  %v3876_v61 = vld [vmem:[%s7264_s4 + $0xc8] sm:$0xff]  ;;  %v3002_v44 = vrot.slane %v7330_v31, 2 }
  0xf2   : > { %3978 = vperm.xlu1 %5669, %v3868_v51   ;;  %v3875_v51 = vld [vmem:[%s7264_s4 + $0xc0] sm:$0xff] }
  0xf3   : > { %3973 = vperm.xlu0 %5668, %v3867_v35   ;;  %v2988_v50 = vor.u32 %v2987_v6, %v2986_v27  ;;  %v6733_v39 = vsel %vm1210_vm3, %v1240_v18, %v1242_v25  ;;  %v6740_v35 = vsel %vm1210_vm3, %v1242_v25, %v1244_v54  ;;  %v3878_v18 = vld [vmem:[%s7264_s4 + $0xd8] sm:$0xff]  ;;  %v6769_v27 = vsel %vm1210_vm3, %v1244_v54, %v1246_v17 }
  0xf4   : > { %v7333_v54 = vld [vmem:[#allocation9_spill] sm:$0xff] }
  0xf5   : > { %v2989_v9 = vsel %vm2962_vm4, %v2984_v14, %v2988_v50  ;;  %v3877_v14 = vld [vmem:[%s7264_s4 + $0xd0] sm:$0xff] }
  0xf6   : > { %3988 = vperm.xlu1 %5669, %v3870_v2   ;;  %v2999_v2 = vrot.slane %v7329_v3, 3  ;;  %v7335_v3 = vld [vmem:[#allocation12_spill] sm:$0xff] }
  0xf7   : > { %4949 = vmatmul.mubr.bf16.gmra.mrb[20].mxu1 %v6664_v42  ;;  %3983 = vperm.xlu0 %5668, %v3869_v38   ;;  %v5764_v38 = vld [vmem:[%s7261_s1 + $0x228] sm:$0xff]  }
  0xf8   : > { %5209 = vmatmul.mubr.bf16.vlgmr.msra.gmra.mrb[0].mxu0 %v2973_v16  ;;  %4952 = vmatprep.mubr.bf16.mxu1 %v6671_v20  ;;  %v7326_v16 = vld [vmem:[#allocation3_spill] sm:$0xff] }
  0xf9   : > { %5249 = vmatpush3.bf16.msra.mxu0 %v6477_v52  ;;  %5212 = vmatprep.mubr.bf16.mxu0 %v2977_v36  ;;  %v3871_v52 = vld [vmem:[%s7264_s4 + $0xa0] sm:$0xff]  ;;  %v2994_v59 = vrot.slane %v7326_v16, 2  ;;  %v2995_v36 = vrot.slane %v7327_v34, 3  ;;  %v3881_v16 = vld [vmem:[%s7264_s4 + $0xf0] sm:$0xff] }
  0xfa   : > { %5250 = vmatprep.subr.bf16.mxu0 %v5758_v7  ;;  %3998 = vperm.xlu1 %5669, %v3872_v62   ;;  %v6760_v62 = vrot.slane %v6253_v41, 1  ;;  %v3879_v41 = vld [vmem:[%s7264_s4 + $0xe0] sm:$0xff] }
  0xfb   : > { %3993 = vperm.xlu0 %5668, %v3871_v52   ;;  %v3000_v52 = vor.u32 %v2999_v2, %v2998_v57  ;;  %v3010_v2 = vrot.slane %v7335_v3, 2 }
  0xfd   : > { %5251 = vmatpush3.bf16.msra.mxu0 %v5758_v7  ;;  %v2993_v7 = vsel %vm2962_vm4, %v2988_v50, %v2992_v55 }
  0xfe   : > { %5252 = vmatprep.subr.bf16.mxu0 %v5760_v11  ;;  %4008 = vperm.xlu1 %5669, %v3874_v26  }
  0xff   : > { %4953 = vmatmul.mubr.bf16.gmra.mrb[24].mxu1 %v6699_v58  ;;  %4003 = vperm.xlu0 %5668, %v3873_v49   ;;  %v7332_v49 = vld [vmem:[#allocation11_spill] sm:$0xff] }
 0x100   : > { %5213 = vmatmul.mubr.bf16.gmra.mrb[4].mxu0 %v2981_v30  ;;  %4956 = vmatprep.mubr.bf16.mxu1 %v6706_v8  ;;  %v3880_v30 = vld [vmem:[%s7264_s4 + $0xe8] sm:$0xff]  ;;  %v3006_v50 = vrot.slane %v7332_v49, 2 }
 0x101   : > { %5216 = vmatprep.mubr.bf16.mxu0 %v2985_v15  ;;  %5253 = vmatpush3.bf16.msra.mxu0 %v5760_v11  ;;  %v2996_v11 = vor.u32 %v2995_v36, %v2994_v59  ;;  %v6777_v15 = vsel %vm1210_vm3, %v1246_v17, %v6760_v62  ;;  %v3884_v36 = vld [vmem:[%s7264_s4 + $0x108] sm:$0xff] }
 0x102   : > { %5254 = vmatprep.subr.bf16.mxu0 %v5762_v45  ;;  %4018 = vperm.xlu1 %5669, %v3876_v61   ;;  %v7334_v61 = vld [vmem:[#allocation22_spill] sm:$0xff] }
 0x103   : > { %4013 = vperm.xlu0 %5668, %v3875_v51   ;;  %v2997_v6 = vsel %vm2962_vm4, %v2992_v55, %v2996_v11  ;;  %v3001_v26 = vsel %vm2962_vm4, %v2996_v11, %v3000_v52  ;;  %v5766_v55 = vld [vmem:[%s7261_s1 + $0x238] sm:$0xff]   ;;  %v1250_v51 = vrot.slane %v7334_v61, 1 }
 0x105   : > { %5255 = vmatpush3.bf16.msra.mxu0 %v5762_v45  ;;  %v7331_v45 = vld [vmem:[#allocation7_spill] sm:$0xff] }
 0x106   : > { %5256 = vmatprep.subr.bf16.mxu0 %v5763_v48  ;;  %4028 = vperm.xlu1 %5669, %v3878_v18   ;;  %v3003_v25 = vrot.slane %v7331_v45, 3 }
 0x107   : > { %4957 = vmatmul.mubr.bf16.gmra.mrb[28].mxu1 %v6733_v39  ;;  %4023 = vperm.xlu0 %5668, %v3877_v14   ;;  %v7337_v14 = vld [vmem:[#allocation15_spill] sm:$0xff] }
 0x108   : > { %5217 = vmatmul.mubr.bf16.gmra.mrb[8].mxu0 %v2989_v9  ;;  %4960 = vmatprep.mubr.bf16.mxu1 %v6740_v35  ;;  %v3882_v9 = vld [vmem:[%s7264_s4 + $0xf8] sm:$0xff]  ;;  %v3004_v59 = vor.u32 %v3003_v25, %v3002_v44  ;;  %v3014_v11 = vrot.slane %v7337_v14, 2  ;;  %v3888_v25 = vld [vmem:[%s7264_s4 + $0x128] sm:$0xff] }
 0x109   : > { %5220 = vmatprep.mubr.bf16.mxu0 %v2993_v7  ;;  %5257 = vmatpush3.bf16.msra.mxu0 %v5763_v48  ;;  %v3007_v48 = vrot.slane %v7333_v54, 3  ;;  %v1251_v7 = vsel %vm1210_vm3, %v6760_v62, %v1250_v51 }
 0x10a   : > { %5258 = vmatprep.subr.bf16.mxu0 %v5764_v38  ;;  %4038 = vperm.xlu1 %5669, %v3880_v30   ;;  %v3005_v57 = vsel %vm2962_vm4, %v3000_v52, %v3004_v59  ;;  %v3885_v52 = vld [vmem:[%s7264_s4 + $0x110] sm:$0xff] }
 0x10b   : > { %4033 = vperm.xlu0 %5668, %v3879_v41   ;;  %v3008_v34 = vor.u32 %v3007_v48, %v3006_v50  ;;  %v3886_v41 = vld [vmem:[%s7264_s4 + $0x118] sm:$0xff] }
 0x10d   : > { %5259 = vmatpush3.bf16.msra.mxu0 %v5764_v38  ;;  %v7336_v38 = vld [vmem:[#allocation10_spill] sm:$0xff]  ;;  %v3009_v18 = vsel %vm2962_vm4, %v3004_v59, %v3008_v34  ;;  %v7342_v59 = vld [vmem:[#allocation17_spill] sm:$0xff] }
 0x10e   : > { %5260 = vmatprep.subr.bf16.mxu0 %v5765_v47  ;;  %4048 = vperm.xlu1 %5669, %v3882_v9   ;;  %v3011_v17 = vrot.slane %v7336_v38, 3  ;;  %v7341_v9 = vld [vmem:[#allocation18_spill] sm:$0xff] }
 0x10f   : > { %4961 = vmatmul.mubr.bf16.gmra.mrb[32].mxu1 %v6769_v27  ;;  %4043 = vperm.xlu0 %5668, %v3881_v16   ;;  %v3022_v16 = vrot.slane %v7341_v9, 2 }
 0x110   : > { %5221 = vmatmul.mubr.bf16.gmra.mrb[12].mxu0 %v2997_v6  ;;  %4964 = vmatprep.mubr.bf16.mxu1 %v6777_v15  ;;  %v3012_v6 = vor.u32 %v3011_v17, %v3010_v2 }
 0x111   : > { %5224 = vmatprep.mubr.bf16.mxu0 %v3001_v26  ;;  %5261 = vmatpush3.bf16.msra.mxu0 %v5765_v47  ;;  %v7338_v47 = vld [vmem:[#allocation13_spill] sm:$0xff]  ;;  %v3887_v26 = vld [vmem:[%s7264_s4 + $0x120] sm:$0xff] }
 0x112   : > { %5262 = vmatprep.subr.bf16.mxu0 %v5766_v55  ;;  %v3015_v30 = vrot.slane %v7338_v47, 3  ;;  %4058 = vperm.xlu1 %5669, %v3884_v36   ;;  %v3013_v50 = vsel %vm2962_vm4, %v3008_v34, %v3012_v6  ;;  %v3023_v36 = vrot.slane %v7342_v59, 3  ;;  %v3889_v34 = vld [vmem:[%s7264_s4 + $0x130] sm:$0xff] }
 0x113   : > { %4053 = vperm.xlu0 %5668, %v3883_v60  }
 0x114   : > { %v3016_v44 = vor.u32 %v3015_v30, %v3014_v11 }
 0x115   : > { %5263 = vmatpush3.bf16.msra.mxu0 %v5766_v55  ;;  %v7340_v55 = vld [vmem:[#allocation14_spill] sm:$0xff] }
 0x116   : > { %4068 = vperm.xlu1 %5669, %v3886_v41   ;;  %v3019_v61 = vrot.slane %v7340_v55, 3  ;;  %v3017_v51 = vsel %vm2962_vm4, %v3012_v6, %v3016_v44  ;;  %v3030_v41 = vrot.slane %v6303_v29, 2 }
 0x117   : > { %4965 = vmatmul.mubr.bf16.gmra.mrb[36].mxu1 %v1251_v7  ;;  %4063 = vperm.xlu0 %5668, %v3885_v52   ;;  %v3890_v7 = vld [vmem:[%s7264_s4 + $0x138] sm:$0xff] }
 0x118   : > { %5225 = vmatmul.mubr.bf16.gmra.mrb[16].mxu0 %v3005_v57  ;;  %4984 = vmatprep.mubr.bf16.mxu1 %v6493_v37  ;;  %v7339_v37 = vld [vmem:[#allocation16_spill] sm:$0xff]  ;;  %v3024_v57 = vor.u32 %v3023_v36, %v3022_v16  ;;  %v7345_v52 = vld [vmem:[#allocation21_spill] sm:$0xff] }
 0x119   : > { %5228 = vmatprep.mubr.bf16.mxu0 %v3009_v18  ;;  %v3018_v48 = vrot.slane %v7339_v37, 2  ;;  %v7344_v18 = vld [vmem:[#allocation19_spill] sm:$0xff]  ;;  %v3031_v6 = vrot.slane %v7345_v52, 3 }
 0x11a   : > { %4078 = vperm.xlu1 %5669, %v3888_v25   ;;  %v3027_v11 = vrot.slane %v7344_v18, 3  ;;  %v7346_v25 = vld [vmem:[#allocation23_spill] sm:$0xff] }
 0x11b   : > { %4073 = vperm.xlu0 %5668, %v3887_v26   ;;  %v3020_v60 = vor.u32 %v3019_v61, %v3018_v48  ;;  %v1957_v26 = vshrl.u32 %v7346_v25, 16  ;;  %v3032_v48 = vor.u32 %v3031_v6, %v3030_v41  ;;  %v5780_v61 = vld [vmem:[%s7261_s1 + $0x118] sm:$0xff]   ;;  %v5783_v6 = vld [vmem:[%s7261_s1 + $0x130] sm:$0xff]  }
 0x11d   : > { %v3021_v2 = vsel %vm2962_vm4, %v3016_v44, %v3020_v60  ;;  %v3025_v30 = vsel %vm2962_vm4, %v3020_v60, %v3024_v57 }
 0x11e   : > { %4088 = vperm.xlu1 %5669, %v3890_v7  }
 0x11f   : > { %4985 = vmatmul.mubr.bf16.vlgmr.msra.gmra.mrb[0].mxu1 %v6496_v40  ;;  %v5778_v40 = vld [vmem:[%s7261_s1 + $0x108] sm:$0xff]   ;;  %4083 = vperm.xlu0 %5668, %v3889_v34  }
 0x120   : > { %5229 = vmatmul.mubr.bf16.gmra.mrb[20].mxu0 %v3013_v50  ;;  %5312 = vmatpush3.bf16.msra.mxu1 %v6647_v43  ;;  %v7343_v43 = vld [vmem:[#allocation20_spill] sm:$0xff]  ;;  %v1960_v50 = vshll.u32 %v7346_v25, 16 }
 0x121   : > { %4988 = vmatprep.mubr.bf16.mxu1 %v6524_v13  ;;  %5232 = vmatprep.mubr.bf16.mxu0 %v3017_v51  ;;  %v3026_v17 = vrot.slane %v7343_v43, 2  ;;  %v5779_v13 = vld [vmem:[%s7261_s1 + $0x110] sm:$0xff]   ;;  %v3039_v51 = vshrl.u32 %v6300_v24, 16 }
 0x122   : > { %5305 = vmatprep.subr.bf16.mxu1 %v5778_v40  ;;  %v3035_v36 = vrot.slane %v1960_v50, 3 }
 0x123   : > { %v3028_v44 = vor.u32 %v3027_v11, %v3026_v17  ;;  %v3041_v34 = vrot.slane %v3039_v51, 2  ;;  %v3051_v17 = vshll.u32 %v6599_v4, 16  ;;  %v5784_v51 = vld [vmem:[%s7261_s1 + $0x138] sm:$0xff]  }
 0x124   : > { %5313 = vmatpush3.bf16.msra.mxu1 %v5778_v40  ;;  %v5781_v40 = vld [vmem:[%s7261_s1 + $0x120] sm:$0xff]  }
 0x125   : > { %5306 = vmatprep.subr.bf16.mxu1 %v5779_v13  ;;  %v3029_v16 = vsel %vm2962_vm4, %v3024_v57, %v3028_v44  ;;  %v3033_v7 = vsel %vm2962_vm4, %v3028_v44, %v3032_v48 }
 0x127   : > { %4989 = vmatmul.mubr.bf16.gmra.mrb[4].mxu1 %v6527_v22  ;;  %v3042_v22 = vshll.u32 %v6300_v24, 16 }
 0x128   : > { %5233 = vmatmul.mubr.bf16.gmra.mrb[24].mxu0 %v3021_v2  ;;  %4992 = vmatprep.mubr.bf16.mxu1 %v6557_v19  ;;  %v3034_v19 = vrot.slane %v1957_v26, 2  ;;  %v3048_v2 = vshrl.u32 %v6599_v4, 16 }
 0x129   : > { %5236 = vmatprep.mubr.bf16.mxu0 %v3025_v30  ;;  %5314 = vmatpush3.bf16.msra.mxu1 %v5779_v13  ;;  %v3044_v60 = vrot.slane %v3042_v22, 3  ;;  %v5782_v13 = vld [vmem:[%s7261_s1 + $0x128] sm:$0xff]  }
 0x12a   : > { %5307 = vmatprep.subr.bf16.mxu1 %v5780_v61  ;;  %v3036_v57 = vor.u32 %v3035_v36, %v3034_v19  ;;  %v3050_v41 = vrot.slane %v3048_v2, 2 }
 0x12b   : > { %v3045_v11 = vor.u32 %v3044_v60, %v3041_v34  ;;  %v1924_v60 = vrot.slane %v7330_v31, 1  ;;  %v1928_v31 = vrot.slane %v7332_v49, 1 }
 0x12c   : > { %v3037_v30 = vsel %vm2962_vm4, %v3032_v48, %v3036_v57  ;;  %v3375_v48 = vrot.slane %v6484_v56, 3  ;;  %v3378_v56 = vrot.slane %v6505_v23, 3 }
 0x12d   : > { %5315 = vmatpush3.bf16.msra.mxu1 %v5780_v61  ;;  %v3376_v61 = vrot.slane %v6489_v0, 3  ;;  %v3380_v0 = vrot.slane %v6511_v1, 3  ;;  %v3386_v1 = vrot.slane %v6572_v28, 3 }
 0x12e   : > { %5308 = vmatprep.subr.bf16.mxu1 %v5781_v40 }
 0x12f   : > { %4993 = vmatmul.mubr.bf16.gmra.mrb[8].mxu1 %v6563_v5  ;;  %v3053_v5 = vrot.slane %v3051_v17, 3  ;;  %v5788_v17 = vld [vmem:[%s5908_s26 + $0x68] sm:$0xff]  }
 0x130   : > { %5237 = vmatmul.mubr.bf16.gmra.mrb[28].mxu0 %v3029_v16  ;;  %4996 = vmatprep.mubr.bf16.mxu1 %v6590_v32  ;;  %v3046_v32 = vsel %vm2962_vm4, %v3036_v57, %v3045_v11  ;;  %v3381_v16 = vsel %vm3374_vm5, %v3378_v56, %v3380_v0 }
 0x131   : > { %5240 = vmatprep.mubr.bf16.mxu0 %v3033_v7  ;;  %5316 = vmatpush3.bf16.msra.mxu1 %v5781_v40  ;;  %v3054_v44 = vor.u32 %v3053_v5, %v3050_v41  ;;  %v5787_v40 = vld [vmem:[%s5908_s26 + $0x60] sm:$0xff]   ;;  %v1932_v41 = vrot.slane %v7335_v3, 1  ;;  %v1933_v5 = vrot.slane %v7336_v38, 2  ;;  %v1936_v3 = vrot.slane %v7337_v14, 1 }
 0x132   : > { %5309 = vmatprep.subr.bf16.mxu1 %v5782_v13  ;;  %v3394_v57 = vrot.slane %v5787_v40, 3  ;;  %v1937_v38 = vrot.slane %v7338_v47, 2  ;;  %v5792_v47 = vld [vmem:[%s5908_s26 + $0x88] sm:$0xff]  }
 0x133   : > { %v3055_v22 = vsel %vm2962_vm4, %v3045_v11, %v3054_v44  ;;  %v3396_v11 = vrot.slane %v5788_v17, 3  ;;  %v5789_v44 = vld [vmem:[%s5908_s26 + $0x70] sm:$0xff]   ;;  %v3412_v17 = vrot.slane %v6300_v24, 3 }
 0x134   : > { %v3398_v49 = vrot.slane %v5789_v44, 3 }
 0x135   : > { %5317 = vmatpush3.bf16.msra.mxu1 %v5782_v13  ;;  %v7347_v13 = vld [vmem:[#allocation6_spill] sm:$0xff] }
 0x136   : > { %5310 = vmatprep.subr.bf16.mxu1 %v5783_v6 }
 0x137   : > { %4997 = vmatmul.mubr.bf16.gmra.mrb[12].mxu1 %v6596_v12  ;;  %v3377_v12 = vsel %vm3374_vm5, %v3375_v48, %v3376_v61  ;;  %v1934_v48 = vor.u32 %v1933_v5, %v1932_v41 }
 0x138   : > { %5241 = vmatmul.mubr.bf16.gmra.mrb[32].mxu0 %v3037_v30  ;;  %5000 = vmatprep.mubr.bf16.mxu1 %v6628_v53  ;;  %v3379_v53 = vsel %vm3374_vm5, %v3376_v61, %v3378_v56  ;;  %v1940_v56 = vrot.slane %v7339_v37, 1  ;;  %v1944_v37 = vrot.slane %v7341_v9, 1 }
 0x139   : > { %5244 = vmatprep.mubr.bf16.mxu0 %v3046_v32  ;;  %5318 = vmatpush3.bf16.msra.mxu1 %v5783_v6  ;;  %v3397_v32 = vsel %vm3374_vm5, %v3394_v57, %v3396_v11 }
 0x13a   : > { %5311 = vmatprep.subr.bf16.mxu1 %v5784_v51 }
 0x13d   : > { %5319 = vmatpush3.bf16.msra.mxu1 %v5784_v51 }
 0x13f   : > { %5001 = vmatmul.mubr.bf16.gmra.mrb[16].mxu1 %v6637_v10  ;;  %v3382_v10 = vrot.slane %v6536_v33, 3 }
 0x140   : > { %5245 = vmatmul.mubr.bf16.gmra.mrb[36].mxu0 %v3055_v22  ;;  %5004 = vmatprep.mubr.bf16.mxu1 %v6664_v42  ;;  %v3384_v42 = vrot.slane %v6547_v63, 3  ;;  %v3390_v63 = vrot.slane %v6612_v21, 3  ;;  %v1578_v21 = vrot.slane %v6409_v46, 1  ;;  %v3399_v22 = vsel %vm3374_vm5, %v3396_v11, %v3398_v49 }
 0x141   : > { %5264 = vmatprep.mubr.bf16.mxu0 %v3377_v12  ;;  %v3383_v19 = vsel %vm3374_vm5, %v3380_v0, %v3382_v10  ;;  %v1941_v0 = vrot.slane %v7340_v55, 2  ;;  %v1945_v55 = vrot.slane %v7342_v59, 2 }
 0x142   : > { %v3385_v23 = vsel %vm3374_vm5, %v3382_v10, %v3384_v42  ;;  %v3387_v36 = vsel %vm3374_vm5, %v3384_v42, %v3386_v1  ;;  %v5791_v10 = vld [vmem:[%s5908_s26 + $0x80] sm:$0xff]  }
 0x143   : > { %v3402_v42 = vrot.slane %v5791_v10, 3  ;;  %v1942_v14 = vor.u32 %v1941_v0, %v1940_v56 }
 0x147   : > { %5005 = vmatmul.mubr.bf16.gmra.mrb[20].mxu1 %v6671_v20  ;;  %v5785_v20 = vld [vmem:[%s5908_s26 + $0x48] sm:$0xff]  }
 0x148   : > { %5265 = vmatmul.mubr.bf16.vlgmr.msra.gmra.mrb[0].mxu0 %v3379_v53  ;;  %5008 = vmatprep.mubr.bf16.mxu1 %v6699_v58  ;;  %v3388_v58 = vrot.slane %v5785_v20, 3 }
 0x149   : > { %5268 = vmatprep.mubr.bf16.mxu0 %v3381_v16  ;;  %v1938_v16 = vor.u32 %v1937_v38, %v1936_v3 }
 0x14a   : > { %v3389_v33 = vsel %vm3374_vm5, %v3386_v1, %v3388_v58  ;;  %v3391_v7 = vsel %vm3374_vm5, %v3388_v58, %v3390_v63  ;;  %v1948_v58 = vrot.slane %v7343_v43, 1  ;;  %v1953_v43 = vrot.slane %v7345_v52, 2 }
 0x14b   : > { %v1943_v20 = vsel %vm1880_vm1, %v1938_v16, %v1942_v14  ;;  %v1969_v52 = vshll.u32 %v6409_v46, 16 }
 0x14d   : > { %v1971_v11 = vrot.slane %v1969_v52, 2 }
 0x14f   : > { %5009 = vmatmul.mubr.bf16.gmra.mrb[24].mxu1 %v6706_v8  ;;  %v1576_v8 = vrot.slane %v7346_v25, 1 }
 0x150   : > { %5269 = vmatmul.mubr.bf16.gmra.mrb[4].mxu0 %v3383_v19  ;;  %5012 = vmatprep.mubr.bf16.mxu1 %v6733_v39  ;;  %v5786_v39 = vld [vmem:[%s5908_s26 + $0x58] sm:$0xff]   ;;  %v3404_v19 = vrot.slane %v5792_v47, 3 }
 0x151   : > { %5272 = vmatprep.mubr.bf16.mxu0 %v3385_v23  ;;  %v3392_v28 = vrot.slane %v5786_v39, 3  ;;  %v1577_v34 = vsel %vm1210_vm3, %v6760_v62, %v1576_v8  ;;  %v1579_v62 = vsel %vm1210_vm3, %v1576_v8, %v1578_v21  ;;  %v1939_v23 = vsel %vm1880_vm1, %v1934_v48, %v1938_v16  ;;  %v5793_v8 = vld [vmem:[%s5908_s26 + $0x90] sm:$0xff]   ;;  %v3904_v41 = vpop.permute.xlu1 %3903 }
 0x152   : > { %v3406_v39 = vrot.slane %v5793_v8, 3 }
 0x157   : > { %5013 = vmatmul.mubr.bf16.gmra.mrb[28].mxu1 %v6740_v35  ;;  %v1925_v35 = vrot.slane %v7331_v45, 2  ;;  %v1929_v45 = vrot.slane %v7333_v54, 2  ;;  %v5790_v54 = vld [vmem:[%s5908_s26 + $0x78] sm:$0xff]  }
 0x158   : > { %5273 = vmatmul.mubr.bf16.gmra.mrb[8].mxu0 %v3387_v36  ;;  %5016 = vmatprep.mubr.bf16.mxu1 %v6769_v27  ;;  %v3393_v27 = vsel %vm3374_vm5, %v3390_v63, %v3392_v28  ;;  %v3400_v61 = vrot.slane %v5790_v54, 3  ;;  %v1949_v36 = vrot.slane %v7344_v18, 2  ;;  %v1946_v63 = vor.u32 %v1945_v55, %v1944_v37 }
 0x159   : > { %5276 = vmatprep.mubr.bf16.mxu0 %v3389_v33  ;;  %v1926_v2 = vor.u32 %v1925_v35, %v1924_v60  ;;  %v1930_v6 = vor.u32 %v1929_v45, %v1928_v31  ;;  %v3405_v33 = vsel %vm3374_vm5, %v3402_v42, %v3404_v19  ;;  %v3407_v18 = vsel %vm3374_vm5, %v3404_v19, %v3406_v39 }
 0x15a   : > { %v3401_v53 = vsel %vm3374_vm5, %v3398_v49, %v3400_v61  ;;  %v3403_v1 = vsel %vm3374_vm5, %v3400_v61, %v3402_v42  ;;  %v1950_v9 = vor.u32 %v1949_v36, %v1948_v58  ;;  %v1959_v35 = vrot.slane %v1957_v26, 1  ;;  %v3909_v49 = vpop.permute.xlu1 %3908 }
 0x15b   : > { %v1927_v30 = vsel %vm1880_vm1, %v7347_v13, %v1926_v2  ;;  %v1931_v51 = vsel %vm1880_vm1, %v1926_v2, %v1930_v6  ;;  %v1935_v12 = vsel %vm1880_vm1, %v1930_v6, %v1934_v48  ;;  %v6975_v13 = vpop.permute.xlu0 %3893 }
 0x15c   : > { %v1951_v60 = vsel %vm1880_vm1, %v1946_v63, %v1950_v9 }
 0x15e   : > { %v6997_v38 = vpop.permute.xlu1 %3918 }
 0x15f   : > { %5017 = vmatmul.mubr.bf16.gmra.mrb[32].mxu1 %v6777_v15  ;;  %v3395_v15 = vsel %vm3374_vm5, %v3392_v28, %v3394_v57  ;;  %v5794_v28 = vld [vmem:[%s5908_s26 + $0x98] sm:$0xff]   ;;  %v3410_v57 = vrot.slane %v7346_v25, 3  ;;  %v3414_v25 = vrot.slane %v6599_v4, 3  ;;  %s5641_s26 = smul.u32 392, %s7353_s18  ;;  %v5820_v4 = vmov 0.0  }
 0x160   : > { %5277 = vmatmul.mubr.bf16.gmra.mrb[12].mxu0 %v3391_v7  ;;  %5020 = vmatprep.mubr.bf16.mxu1 %v1577_v34  ;;  %v3408_v59 = vrot.slane %v5794_v28, 3  ;;  %v1947_v7 = vsel %vm1880_vm1, %v1942_v14, %v1946_v63  ;;  %v1952_v34 = vrot.slane %v6303_v29, 1  ;;  %v1966_v29 = vshrl.u32 %v6409_v46, 16 }
 0x161   : > { %5280 = vmatprep.mubr.bf16.mxu0 %v3393_v27  ;;  %v1962_v27 = vrot.slane %v1960_v50, 2  ;;  %v3413_v45 = vsel %vm3374_vm5, %v3410_v57, %v3412_v17  ;;  %s6980_s27 = scalar_lea.vmem %s7265_s5, %s5641_s26 }
 0x162   : > { %v3409_v21 = vsel %vm3374_vm5, %v3406_v39, %v3408_v59  ;;  %v1954_v40 = vor.u32 %v1953_v43, %v1952_v34  ;;  %v1968_v50 = vrot.slane %v1966_v29, 1  ;;  %4131 = vst [vmem:[%s6980_s27] sm:$0xff] %v5820_v4  ;;  %4132 = vst [vmem:[%s6980_s27 + $0x8] sm:$0xff] %v5820_v4  ;;  %v7051_v34 = vld [vmem:[%s7263_s3] ss:$0 sm:$0xff] }
 0x163   : > { %v1963_v2 = vor.u32 %v1962_v27, %v1959_v35  ;;  %4133 = vst [vmem:[%s6980_s27 + $0x10] sm:$0xff] %v5820_v4  ;;  %4134 = vst [vmem:[%s6980_s27 + $0x18] sm:$0xff] %v5820_v4 }
 0x164   : > { %v1955_v26 = vsel %vm1880_vm1, %v1950_v9, %v1954_v40  ;;  %v1972_v46 = vor.u32 %v1971_v11, %v1968_v50  ;;  %4135 = vst [vmem:[%s6980_s27 + $0x160] sm:$0xff] %v5820_v4  ;;  %4136 = vst [vmem:[%s6980_s27 + $0x168] sm:$0xff] %v5820_v4  ;;  %v7044_v9 = vld [vmem:[%s7262_s2] ss:$0 sm:$0xff] }
 0x165   : > { %v1964_v31 = vsel %vm1880_vm1, %v1954_v40, %v1963_v2  ;;  %4137 = vst [vmem:[%s6980_s27 + $0x170] sm:$0xff] %v5820_v4  ;;  %4138 = vst [vmem:[%s6980_s27 + $0x178] sm:$0xff] %v5820_v4 }
 0x166   : > { %v1973_v24 = vsel %vm1880_vm1, %v1963_v2, %v1972_v46  ;;  %4139 = vst [vmem:[%s6980_s27 + $0x180] sm:$0xff] %v5820_v4 }
 0x167   : > { %5021 = vmatmul.mubr.bf16.gmra.mrb[36].mxu1 %v1579_v62  ;;  %v3411_v62 = vsel %vm3374_vm5, %v3408_v59, %v3410_v57 }
 0x168   : > { %5281 = vmatmul.mubr.bf16.gmra.mrb[16].mxu0 %v3395_v15  ;;  %5060 = vmatprep.mubr.bf16.mxu1 %v1927_v30  ;;  %v3415_v15 = vsel %vm3374_vm5, %v3412_v17, %v3414_v25 }
 0x169   : > { %5284 = vmatprep.mubr.bf16.mxu0 %v3397_v32  ;;  %v6991_v32 = vpop.permute.xlu0 %3898 }
 0x16d   : > { %v6993_v48 = vpop.permute.xlu0 %3913 }
 0x16f   : > { %5061 = vmatmul.mubr.bf16.vlgmr.msra.gmra.mrb[20].mxu1 %v1931_v51 }
 0x170   : > { %5285 = vmatmul.mubr.bf16.gmra.mrb[20].mxu0 %v3399_v22  ;;  %5064 = vmatprep.mubr.bf16.mxu1 %v1935_v12 }
 0x171   : > { %5288 = vmatprep.mubr.bf16.mxu0 %v3401_v53  ;;  %v6999_v22 = vpop.permute.xlu0 %3923  ;;  %v7007_v53 = vpop.permute.xlu1 %3928 }
 0x175   : > { %v7011_v10 = vpop.permute.xlu0 %3933  ;;  %v7015_v14 = vpop.permute.xlu1 %3938 }
 0x177   : > { %5065 = vmatmul.mubr.bf16.gmra.mrb[24].mxu1 %v1939_v23 }
 0x178   : > { %5289 = vmatmul.mubr.bf16.gmra.mrb[24].mxu0 %v3403_v1  ;;  %5068 = vmatprep.mubr.bf16.mxu1 %v1943_v20 }
 0x179   : > { %5292 = vmatprep.mubr.bf16.mxu0 %v3405_v33  ;;  %v7019_v19 = vpop.permute.xlu0 %3943  ;;  %v7025_v55 = vpop.permute.xlu1 %3948 }
 0x17d   : > { %v7027_v1 = vpop.permute.xlu0 %3953  ;;  %v7037_v63 = vpop.permute.xlu1 %3958 }
 0x17f   : > { %5069 = vmatmul.mubr.bf16.gmra.mrb[28].mxu1 %v1947_v7 }
 0x180   : > { %5293 = vmatmul.mubr.bf16.gmra.mrb[28].mxu0 %v3407_v18  ;;  %5072 = vmatprep.mubr.bf16.mxu1 %v1951_v60 }
 0x181   : > { %5296 = vmatprep.mubr.bf16.mxu0 %v3409_v21  ;;  %v7039_v8 = vpop.permute.xlu0 %3963  ;;  %v7046_v7 = vpop.permute.xlu1 %3968 }
 0x185   : > { %v7053_v60 = vpop.permute.xlu0 %3973  ;;  %v7062_v11 = vpop.permute.xlu1 %3978 }
 0x187   : > { %5073 = vmatmul.mubr.bf16.gmra.mrb[32].mxu1 %v1955_v26 }
 0x188   : > { %5297 = vmatmul.mubr.bf16.gmra.mrb[32].mxu0 %v3411_v62  ;;  %5076 = vmatprep.mubr.bf16.mxu1 %v1964_v31 }
 0x189   : > { %5300 = vmatprep.mubr.bf16.mxu0 %v3413_v45  ;;  %v7065_v46 = vpop.permute.xlu0 %3983 }
 0x18f   : > { %5077 = vmatmul.mubr.bf16.gmra.mrb[36].mxu1 %v1973_v24 }
 0x190   : > { %5301 = vmatmul.mubr.bf16.gmra.mrb[36].mxu0 %v3415_v15 }
 0x1f2   : > { %v4986_v30 = vpop.f32.mrb[0].mxu1 }
 0x1f3   : > { %v1664_v5 = vpop.f32.mrb[1].mxu1 }
 0x1f4   : > { %v4987_v6 = vpop.f32.mrb[2].mxu1 }
 0x1f5   : > { %v1667_v44 = vpop.f32.mrb[3].mxu1 }
 0x1fa   : > { %v4990_v54 = vpop.f32.mrb[4].mxu1 }
 0x1fb   : > { %v1680_v61 = vpop.f32.mrb[5].mxu1 }
 0x1fc   : > { %v4991_v51 = vpop.f32.mrb[6].mxu1 }
 0x1fd   : > { %v6995_v3 = vpop.f32.mrb[7].mxu1 }
 0x202   : > { %v7001_v12 = vpop.f32.mrb[8].mxu1 }
 0x203   : > { %v7003_v56 = vpop.f32.mrb[9].mxu1 }
 0x204   : > { %v7005_v0 = vpop.f32.mrb[10].mxu1 }
 0x205   : > { %v7009_v16 = vpop.f32.mrb[11].mxu1 }
 0x20a   : > { %v7013_v42 = vpop.f32.mrb[12].mxu1 }
 0x20b   : > { %v7017_v47 = vpop.f32.mrb[13].mxu1 }
 0x20c   : > { %v7021_v23 = vpop.f32.mrb[14].mxu1 }
 0x20d   : > { %v7023_v37 = vpop.f32.mrb[15].mxu1 }
 0x212   : > { %v7029_v20 = vpop.f32.mrb[16].mxu1 }
 0x213   : > { %v7031_v58 = vpop.f32.mrb[17].mxu1 }
 0x214   : > { %v7033_v36 = vpop.f32.mrb[18].mxu1 }
 0x215   : > { %v7035_v33 = vpop.f32.mrb[19].mxu1 }
 0x21b   : > { %v5266_v39 = vpop.f32.mrb[0].mxu0 }
 0x21c   : > { %v5320_v28 = vadd.f32 %v5266_v39, %v4986_v30  ;;  %v3518_v59 = vpop.f32.mrb[1].mxu0 }
 0x21d   : > { %v5321_v43 = vadd.f32 %v3518_v59, %v1664_v5  ;;  %v5267_v18 = vpop.f32.mrb[2].mxu0 }
 0x21e   : > { %v3726_v35 = vmul.f32 %v5320_v28, %v7044_v9  ;;  %v5322_v27 = vadd.f32 %v5267_v18, %v4987_v6  ;;  %v3521_v21 = vpop.f32.mrb[3].mxu0 }
 0x21f   : > { %v3724_v40 = vmul.f32 %v5321_v43, %v7044_v9  ;;  %v5323_v29 = vadd.f32 %v3521_v21, %v1667_v44 }
 0x220   : > { %v3773_v52 = vadd.f32 %v7051_v34, %v3726_v35  ;;  %v3727_v57 = vmul.f32 %v5322_v27, %v7044_v9  ;;  %v7082_v27 = vpop.permute.xlu0 %3993 }
 0x221   : > { %v3771_v2 = vadd.f32 %v7051_v34, %v3724_v40  ;;  %v3725_v17 = vmul.f32 %v5323_v29, %v7044_v9 }
 0x222   : > { %v3813_v26 = vmax.f32 %v3773_v52, 0.0  ;;  %v3774_v50 = vadd.f32 %v7051_v34, %v3727_v57 }
 0x223   : > { %v3811_v62 = vmax.f32 %v3771_v2, 0.0  ;;  %v3772_v31 = vadd.f32 %v7051_v34, %v3725_v17  ;;  %v5270_v45 = vpop.f32.mrb[4].mxu0 }
 0x224   : > { %v4093_v25 = vmul.f32 %v3904_v41, %v3813_v26  ;;  %v3814_v24 = vmax.f32 %v3774_v50, 0.0  ;;  %v5324_v15 = vadd.f32 %v5270_v45, %v4990_v54  ;;  %v3534_v4 = vpop.f32.mrb[5].mxu0 }
 0x225   : > { %v4091_v30 = vmul.f32 %v6975_v13, %v3811_v62  ;;  %v3812_v5 = vmax.f32 %v3772_v31, 0.0  ;;  %v5325_v6 = vadd.f32 %v3534_v4, %v1680_v61  ;;  %v5271_v44 = vpop.f32.mrb[6].mxu0  ;;  %v7077_v61 = vpop.permute.xlu1 %3988 }
 0x226   : > { %4142 = vst [vmem:[%s6980_s27 + $0x30] sm:$0xff] %v4093_v25  ;;  %v4094_v39 = vmul.f32 %v3909_v49, %v3814_v24  ;;  %v3730_v28 = vmul.f32 %v5324_v15, %v7044_v9  ;;  %v5326_v59 = vadd.f32 %v5271_v44, %v4991_v51  ;;  %v3537_v43 = vpop.f32.mrb[7].mxu0 }
 0x227   : > { %4140 = vst [vmem:[%s6980_s27 + $0x20] sm:$0xff] %v4091_v30  ;;  %v4092_v18 = vmul.f32 %v6991_v32, %v3812_v5  ;;  %v3728_v41 = vmul.f32 %v5325_v6, %v7044_v9  ;;  %v5327_v54 = vadd.f32 %v3537_v43, %v6995_v3 }
 0x228   : > { %4143 = vst [vmem:[%s6980_s27 + $0x38] sm:$0xff] %v4094_v39  ;;  %v3777_v13 = vadd.f32 %v7051_v34, %v3730_v28  ;;  %v3731_v35 = vmul.f32 %v5326_v59, %v7044_v9 }
 0x229   : > { %4141 = vst [vmem:[%s6980_s27 + $0x28] sm:$0xff] %v4092_v18  ;;  %v3775_v49 = vadd.f32 %v7051_v34, %v3728_v41  ;;  %v3729_v51 = vmul.f32 %v5327_v54, %v7044_v9  ;;  %v7094_v15 = vpop.permute.xlu1 %3998 }
 0x22a   : > { %v3817_v32 = vmax.f32 %v3777_v13, 0.0  ;;  %v3778_v21 = vadd.f32 %v7051_v34, %v3731_v35 }
 0x22b   : > { %v3815_v40 = vmax.f32 %v3775_v49, 0.0  ;;  %v3776_v3 = vadd.f32 %v7051_v34, %v3729_v51  ;;  %v5274_v29 = vpop.f32.mrb[8].mxu0 }
 0x22c   : > { %v4097_v52 = vmul.f32 %v6999_v22, %v3817_v32  ;;  %v3818_v57 = vmax.f32 %v3778_v21, 0.0  ;;  %v5328_v2 = vadd.f32 %v5274_v29, %v7001_v12  ;;  %v3550_v17 = vpop.f32.mrb[9].mxu0 }
 0x22d   : > { %v4095_v26 = vmul.f32 %v6993_v48, %v3815_v40  ;;  %v3816_v50 = vmax.f32 %v3776_v3, 0.0  ;;  %v5329_v62 = vadd.f32 %v3550_v17, %v7003_v56  ;;  %v5275_v31 = vpop.f32.mrb[10].mxu0  ;;  %v7100_v56 = vpop.permute.xlu0 %4003 }
 0x22e   : > { %4146 = vst [vmem:[%s6980_s27 + $0x50] sm:$0xff] %v4097_v52  ;;  %v4098_v45 = vmul.f32 %v7007_v53, %v3818_v57  ;;  %v3734_v25 = vmul.f32 %v5328_v2, %v7044_v9  ;;  %v5330_v24 = vadd.f32 %v5275_v31, %v7005_v0  ;;  %v3553_v22 = vpop.f32.mrb[11].mxu0  ;;  %v7112_v41 = vpop.permute.xlu1 %4008 }
 0x22f   : > { %4144 = vst [vmem:[%s6980_s27 + $0x40] sm:$0xff] %v4095_v26  ;;  %v4096_v12 = vmul.f32 %v6997_v38, %v3816_v50  ;;  %v3732_v48 = vmul.f32 %v5329_v62, %v7044_v9  ;;  %v5331_v4 = vadd.f32 %v3553_v22, %v7009_v16 }
 0x230   : > { %4147 = vst [vmem:[%s6980_s27 + $0x58] sm:$0xff] %v4098_v45  ;;  %v3781_v30 = vadd.f32 %v7051_v34, %v3734_v25  ;;  %v3735_v53 = vmul.f32 %v5330_v24, %v7044_v9 }
 0x231   : > { %4145 = vst [vmem:[%s6980_s27 + $0x48] sm:$0xff] %v4096_v12  ;;  %v3779_v0 = vadd.f32 %v7051_v34, %v3732_v48  ;;  %v3733_v5 = vmul.f32 %v5331_v4, %v7044_v9  ;;  %v7116_v51 = vpop.permute.xlu0 %4013 }
 0x232   : > { %v3821_v6 = vmax.f32 %v3781_v30, 0.0  ;;  %v3782_v38 = vadd.f32 %v7051_v34, %v3735_v53  ;;  %v7133_v2 = vpop.permute.xlu1 %4018 }
 0x233   : > { %v3819_v44 = vmax.f32 %v3779_v0, 0.0  ;;  %v3780_v39 = vadd.f32 %v7051_v34, %v3733_v5  ;;  %v5278_v16 = vpop.f32.mrb[12].mxu0 }
 0x234   : > { %v4101_v28 = vmul.f32 %v7019_v19, %v3821_v6  ;;  %v3822_v59 = vmax.f32 %v3782_v38, 0.0  ;;  %v5332_v43 = vadd.f32 %v5278_v16, %v7013_v42  ;;  %v3566_v18 = vpop.f32.mrb[13].mxu0 }
 0x235   : > { %v4099_v54 = vmul.f32 %v7011_v10, %v3819_v44  ;;  %v3820_v13 = vmax.f32 %v3780_v39, 0.0  ;;  %v5333_v35 = vadd.f32 %v3566_v18, %v7017_v47  ;;  %v5279_v49 = vpop.f32.mrb[14].mxu0  ;;  %v7136_v26 = vpop.permute.xlu0 %4023 }
 0x236   : > { %4150 = vst [vmem:[%s6980_s27 + $0x70] sm:$0xff] %v4101_v28  ;;  %v4102_v32 = vmul.f32 %v7025_v55, %v3822_v59  ;;  %v3738_v19 = vmul.f32 %v5332_v43, %v7044_v9  ;;  %v5334_v42 = vadd.f32 %v5279_v49, %v7021_v23  ;;  %v3569_v21 = vpop.f32.mrb[15].mxu0  ;;  %v7153_v5 = vpop.permute.xlu1 %4028 }
 0x237   : > { %4148 = vst [vmem:[%s6980_s27 + $0x60] sm:$0xff] %v4099_v54  ;;  %v4100_v40 = vmul.f32 %v7015_v14, %v3820_v13  ;;  %v3736_v10 = vmul.f32 %v5333_v35, %v7044_v9  ;;  %v5335_v3 = vadd.f32 %v3569_v21, %v7023_v37 }
 0x238   : > { %4151 = vst [vmem:[%s6980_s27 + $0x78] sm:$0xff] %v4102_v32  ;;  %v3785_v47 = vadd.f32 %v7051_v34, %v3738_v19  ;;  %v3739_v29 = vmul.f32 %v5334_v42, %v7044_v9 }
 0x239   : > { %4149 = vst [vmem:[%s6980_s27 + $0x68] sm:$0xff] %v4100_v40  ;;  %v3783_v55 = vadd.f32 %v7051_v34, %v3736_v10  ;;  %v3737_v52 = vmul.f32 %v5335_v3, %v7044_v9  ;;  %v7158_v6 = vpop.permute.xlu0 %4033 }
 0x23a   : > { %v3825_v23 = vmax.f32 %v3785_v47, 0.0  ;;  %v3786_v57 = vadd.f32 %v7051_v34, %v3739_v29 }
 0x23b   : > { %v3823_v14 = vmax.f32 %v3783_v55, 0.0  ;;  %v3784_v17 = vadd.f32 %v7051_v34, %v3737_v52  ;;  %v5282_v37 = vpop.f32.mrb[16].mxu0  ;;  %v7173_v52 = vpop.permute.xlu1 %4038 }
 0x23c   : > { %v4105_v50 = vmul.f32 %v7039_v8, %v3825_v23  ;;  %v3826_v62 = vmax.f32 %v3786_v57, 0.0  ;;  %v5336_v31 = vadd.f32 %v5282_v37, %v7029_v20  ;;  %v3582_v45 = vpop.f32.mrb[17].mxu0 }
 0x23d   : > { %v4103_v25 = vmul.f32 %v7027_v1, %v3823_v14  ;;  %v3824_v24 = vmax.f32 %v3784_v17, 0.0  ;;  %v5337_v22 = vadd.f32 %v3582_v45, %v7031_v58  ;;  %v5283_v12 = vpop.f32.mrb[18].mxu0  ;;  %v7178_v57 = vpop.permute.xlu0 %4043 }
 0x23e   : > { %4154 = vst [vmem:[%s6980_s27 + $0x90] sm:$0xff] %v4105_v50  ;;  %v4106_v48 = vmul.f32 %v7046_v7, %v3826_v62  ;;  %v3742_v4 = vmul.f32 %v5336_v31, %v7044_v9  ;;  %v5338_v30 = vadd.f32 %v5283_v12, %v7033_v36  ;;  %v3585_v8 = vpop.f32.mrb[19].mxu0 }
 0x23f   : > { %4152 = vst [vmem:[%s6980_s27 + $0x80] sm:$0xff] %v4103_v25  ;;  %v4104_v53 = vmul.f32 %v7037_v63, %v3824_v24  ;;  %v3740_v20 = vmul.f32 %v5337_v22, %v7044_v9  ;;  %v5339_v1 = vadd.f32 %v3585_v8, %v7035_v33 }
 0x240   : > { %4155 = vst [vmem:[%s6980_s27 + $0x98] sm:$0xff] %v4106_v48  ;;  %v3789_v0 = vadd.f32 %v7051_v34, %v3742_v4  ;;  %v3743_v58 = vmul.f32 %v5338_v30, %v7044_v9 }
 0x241   : > { %4153 = vst [vmem:[%s6980_s27 + $0x88] sm:$0xff] %v4104_v53  ;;  %v3787_v7 = vadd.f32 %v7051_v34, %v3740_v20  ;;  %v3741_v36 = vmul.f32 %v5339_v1, %v7044_v9 }
 0x242   : > { %v3829_v38 = vmax.f32 %v3789_v0, 0.0  ;;  %v3790_v63 = vadd.f32 %v7051_v34, %v3743_v58  ;;  %v5062_v44 = vpop.f32.mrb[20].mxu1 }
 0x243   : > { %v3827_v33 = vmax.f32 %v3787_v7, 0.0  ;;  %v3788_v39 = vadd.f32 %v7051_v34, %v3741_v36  ;;  %v5286_v16 = vpop.f32.mrb[20].mxu0  ;;  %v2156_v28 = vpop.f32.mrb[21].mxu1 }
 0x244   : > { %v4109_v59 = vmul.f32 %v7065_v46, %v3829_v38  ;;  %v3830_v43 = vmax.f32 %v3790_v63, 0.0  ;;  %v5340_v18 = vadd.f32 %v5286_v16, %v5062_v44  ;;  %v3598_v54 = vpop.f32.mrb[21].mxu0  ;;  %v5063_v13 = vpop.f32.mrb[22].mxu1 }
 0x245   : > { %v4107_v35 = vmul.f32 %v7053_v60, %v3827_v33  ;;  %v3828_v49 = vmax.f32 %v3788_v39, 0.0  ;;  %v5341_v32 = vadd.f32 %v3598_v54, %v2156_v28  ;;  %v5287_v19 = vpop.f32.mrb[22].mxu0  ;;  %v2159_v42 = vpop.f32.mrb[23].mxu1 }
 0x246   : > { %4158 = vst [vmem:[%s6980_s27 + $0xb0] sm:$0xff] %v4109_v59  ;;  %v4110_v21 = vmul.f32 %v7077_v61, %v3830_v43  ;;  %v3746_v40 = vmul.f32 %v5340_v18, %v7044_v9  ;;  %v5342_v10 = vadd.f32 %v5287_v19, %v5063_v13  ;;  %v3601_v3 = vpop.f32.mrb[23].mxu0  ;;  %v4049_v63 = vpop.permute.xlu1 %4048 }
 0x247   : > { %4156 = vst [vmem:[%s6980_s27 + $0xa0] sm:$0xff] %v4107_v35  ;;  %v4108_v46 = vmul.f32 %v7062_v11, %v3828_v49  ;;  %v3744_v47 = vmul.f32 %v5341_v32, %v7044_v9  ;;  %v5343_v29 = vadd.f32 %v3601_v3, %v2159_v42  ;;  %v7196_v33 = vpop.permute.xlu0 %4053 }
 0x248   : > { %4159 = vst [vmem:[%s6980_s27 + $0xb8] sm:$0xff] %v4110_v21  ;;  %v3793_v60 = vadd.f32 %v7051_v34, %v3746_v40  ;;  %v3747_v55 = vmul.f32 %v5342_v10, %v7044_v9 }
 0x249   : > { %4157 = vst [vmem:[%s6980_s27 + $0xa8] sm:$0xff] %v4108_v46  ;;  %v3791_v61 = vadd.f32 %v7051_v34, %v3744_v47  ;;  %v3745_v23 = vmul.f32 %v5343_v29, %v7044_v9 }
 0x24a   : > { %v3833_v14 = vmax.f32 %v3793_v60, 0.0  ;;  %v3794_v11 = vadd.f32 %v7051_v34, %v3747_v55  ;;  %v5066_v17 = vpop.f32.mrb[24].mxu1 }
 0x24b   : > { %v3831_v37 = vmax.f32 %v3791_v61, 0.0  ;;  %v3792_v50 = vadd.f32 %v7051_v34, %v3745_v23  ;;  %v5290_v62 = vpop.f32.mrb[24].mxu0  ;;  %v2172_v31 = vpop.f32.mrb[25].mxu1 }
 0x24c   : > { %v4113_v45 = vmul.f32 %v7100_v56, %v3833_v14  ;;  %v3834_v25 = vmax.f32 %v3794_v11, 0.0  ;;  %v5344_v24 = vadd.f32 %v5290_v62, %v5066_v17  ;;  %v3614_v22 = vpop.f32.mrb[25].mxu0  ;;  %v5067_v12 = vpop.f32.mrb[26].mxu1 }
 0x24d   : > { %v4111_v48 = vmul.f32 %v7082_v27, %v3831_v37  ;;  %v3832_v4 = vmax.f32 %v3792_v50, 0.0  ;;  %v5345_v30 = vadd.f32 %v3614_v22, %v2172_v31  ;;  %v5291_v8 = vpop.f32.mrb[26].mxu0  ;;  %v2175_v53 = vpop.f32.mrb[27].mxu1 }
 0x24e   : > { %4162 = vst [vmem:[%s6980_s27 + $0xd0] sm:$0xff] %v4113_v45  ;;  %v4114_v20 = vmul.f32 %v7112_v41, %v3834_v25  ;;  %v3750_v1 = vmul.f32 %v5344_v24, %v7044_v9  ;;  %v5346_v0 = vadd.f32 %v5291_v8, %v5067_v12  ;;  %v3617_v58 = vpop.f32.mrb[27].mxu0  ;;  %v7211_v23 = vpop.permute.xlu1 %4058 }
 0x24f   : > { %4160 = vst [vmem:[%s6980_s27 + $0xc0] sm:$0xff] %v4111_v48  ;;  %v4112_v56 = vmul.f32 %v7094_v15, %v3832_v4  ;;  %v3748_v7 = vmul.f32 %v5345_v30, %v7044_v9  ;;  %v5347_v36 = vadd.f32 %v3617_v58, %v2175_v53  ;;  %v4064_v11 = vpop.permute.xlu0 %4063 }
 0x250   : > { %4163 = vst [vmem:[%s6980_s27 + $0xd8] sm:$0xff] %v4114_v20  ;;  %v3797_v27 = vadd.f32 %v7051_v34, %v3750_v1  ;;  %v3751_v38 = vmul.f32 %v5346_v0, %v7044_v9 }
 0x251   : > { %4161 = vst [vmem:[%s6980_s27 + $0xc8] sm:$0xff] %v4112_v56  ;;  %v3795_v44 = vadd.f32 %v7051_v34, %v3748_v7  ;;  %v3749_v41 = vmul.f32 %v5347_v36, %v7044_v9 }
 0x252   : > { %v3837_v39 = vmax.f32 %v3797_v27, 0.0  ;;  %v3798_v16 = vadd.f32 %v7051_v34, %v3751_v38  ;;  %v5070_v15 = vpop.f32.mrb[28].mxu1  ;;  %v4069_v38 = vpop.permute.xlu1 %4068 }
 0x253   : > { %v3835_v28 = vmax.f32 %v3795_v44, 0.0  ;;  %v3796_v59 = vadd.f32 %v7051_v34, %v3749_v41  ;;  %v5294_v43 = vpop.f32.mrb[28].mxu0  ;;  %v2188_v18 = vpop.f32.mrb[29].mxu1 }
 0x254   : > { %v4117_v54 = vmul.f32 %v7136_v26, %v3837_v39  ;;  %v3838_v13 = vmax.f32 %v3798_v16, 0.0  ;;  %v5348_v35 = vadd.f32 %v5294_v43, %v5070_v15  ;;  %v3630_v49 = vpop.f32.mrb[29].mxu0  ;;  %v5071_v32 = vpop.f32.mrb[30].mxu1 }
 0x255   : > { %v4115_v19 = vmul.f32 %v7116_v51, %v3835_v28  ;;  %v3836_v42 = vmax.f32 %v3796_v59, 0.0  ;;  %v5349_v21 = vadd.f32 %v3630_v49, %v2188_v18  ;;  %v5295_v40 = vpop.f32.mrb[30].mxu0  ;;  %v2191_v10 = vpop.f32.mrb[31].mxu1 }
 0x256   : > { %4166 = vst [vmem:[%s6980_s27 + $0xf0] sm:$0xff] %v4117_v54  ;;  %v4118_v3 = vmul.f32 %v7153_v5, %v3838_v13  ;;  %v3754_v46 = vmul.f32 %v5348_v35, %v7044_v9  ;;  %v5350_v47 = vadd.f32 %v5295_v40, %v5071_v32  ;;  %v3633_v29 = vpop.f32.mrb[31].mxu0  ;;  %v4074_v41 = vpop.permute.xlu0 %4073 }
 0x257   : > { %4164 = vst [vmem:[%s6980_s27 + $0xe0] sm:$0xff] %v4115_v19  ;;  %v4116_v26 = vmul.f32 %v7133_v2, %v3836_v42  ;;  %v3752_v60 = vmul.f32 %v5349_v21, %v7044_v9  ;;  %v5351_v55 = vadd.f32 %v3633_v29, %v2191_v10  ;;  %v4079_v29 = vpop.permute.xlu1 %4078 }
 0x258   : > { %4167 = vst [vmem:[%s6980_s27 + $0xf8] sm:$0xff] %v4118_v3  ;;  %v3801_v51 = vadd.f32 %v7051_v34, %v3754_v46  ;;  %v3755_v61 = vmul.f32 %v5350_v47, %v7044_v9 }
 0x259   : > { %4165 = vst [vmem:[%s6980_s27 + $0xe8] sm:$0xff] %v4116_v26  ;;  %v3799_v5 = vadd.f32 %v7051_v34, %v3752_v60  ;;  %v3753_v14 = vmul.f32 %v5351_v55, %v7044_v9 }
 0x25a   : > { %v3841_v17 = vmax.f32 %v3801_v51, 0.0  ;;  %v3802_v37 = vadd.f32 %v7051_v34, %v3755_v61  ;;  %v5074_v2 = vpop.f32.mrb[32].mxu1 }
 0x25b   : > { %v3839_v50 = vmax.f32 %v3799_v5, 0.0  ;;  %v3800_v62 = vadd.f32 %v7051_v34, %v3753_v14  ;;  %v5298_v31 = vpop.f32.mrb[32].mxu0  ;;  %v2204_v45 = vpop.f32.mrb[33].mxu1 }
 0x25c   : > { %v4121_v25 = vmul.f32 %v7178_v57, %v3841_v17  ;;  %v3842_v24 = vmax.f32 %v3802_v37, 0.0  ;;  %v5352_v22 = vadd.f32 %v5298_v31, %v5074_v2  ;;  %v3646_v12 = vpop.f32.mrb[33].mxu0  ;;  %v5075_v48 = vpop.f32.mrb[34].mxu1 }
 0x25d   : > { %v4119_v4 = vmul.f32 %v7158_v6, %v3839_v50  ;;  %v3840_v30 = vmax.f32 %v3800_v62, 0.0  ;;  %v5353_v8 = vadd.f32 %v3646_v12, %v2204_v45  ;;  %v5299_v53 = vpop.f32.mrb[34].mxu0  ;;  %v2207_v20 = vpop.f32.mrb[35].mxu1 }
 0x25e   : > { %4170 = vst [vmem:[%s6980_s27 + $0x110] sm:$0xff] %v4121_v25  ;;  %v4122_v1 = vmul.f32 %v4049_v63, %v3842_v24  ;;  %v3758_v0 = vmul.f32 %v5352_v22, %v7044_v9  ;;  %v5354_v58 = vadd.f32 %v5299_v53, %v5075_v48  ;;  %v3649_v56 = vpop.f32.mrb[35].mxu0  ;;  %v4089_v62 = vpop.permute.xlu1 %4088 }
 0x25f   : > { %4168 = vst [vmem:[%s6980_s27 + $0x100] sm:$0xff] %v4119_v4  ;;  %v4120_v57 = vmul.f32 %v7173_v52, %v3840_v30  ;;  %v3756_v7 = vmul.f32 %v5353_v8, %v7044_v9  ;;  %v5355_v36 = vadd.f32 %v3649_v56, %v2207_v20 }
 0x260   : > { %4171 = vst [vmem:[%s6980_s27 + $0x118] sm:$0xff] %v4122_v1  ;;  %v3805_v6 = vadd.f32 %v7051_v34, %v3758_v0  ;;  %v3759_v27 = vmul.f32 %v5354_v58, %v7044_v9 }
 0x261   : > { %4169 = vst [vmem:[%s6980_s27 + $0x108] sm:$0xff] %v4120_v57  ;;  %v3803_v44 = vadd.f32 %v7051_v34, %v3756_v7  ;;  %v3757_v63 = vmul.f32 %v5355_v36, %v7044_v9 }
 0x262   : > { %v3845_v39 = vmax.f32 %v3805_v6, 0.0  ;;  %v3806_v16 = vadd.f32 %v7051_v34, %v3759_v27  ;;  %v5078_v52 = vpop.f32.mrb[36].mxu1 }
 0x263   : > { %v3843_v15 = vmax.f32 %v3803_v44, 0.0  ;;  %v3804_v28 = vadd.f32 %v7051_v34, %v3757_v63  ;;  %v5302_v59 = vpop.f32.mrb[36].mxu0  ;;  %v2220_v43 = vpop.f32.mrb[37].mxu1 }
 0x264   : > { %v4125_v18 = vmul.f32 %v4064_v11, %v3845_v39  ;;  %v3846_v54 = vmax.f32 %v3806_v16, 0.0  ;;  %v5356_v13 = vadd.f32 %v5302_v59, %v5078_v52  ;;  %v3662_v35 = vpop.f32.mrb[37].mxu0  ;;  %v5079_v49 = vpop.f32.mrb[38].mxu1 }
 0x265   : > { %v4123_v32 = vmul.f32 %v7196_v33, %v3843_v15  ;;  %v3844_v19 = vmax.f32 %v3804_v28, 0.0  ;;  %v5357_v42 = vadd.f32 %v3662_v35, %v2220_v43  ;;  %v5303_v21 = vpop.f32.mrb[38].mxu0  ;;  %v2223_v40 = vpop.f32.mrb[39].mxu1 }
 0x266   : > { %4174 = vst [vmem:[%s6980_s27 + $0x130] sm:$0xff] %v4125_v18  ;;  %v4126_v10 = vmul.f32 %v4069_v38, %v3846_v54  ;;  %v3762_v3 = vmul.f32 %v5356_v13, %v7044_v9  ;;  %v5358_v46 = vadd.f32 %v5303_v21, %v5079_v49  ;;  %v3665_v47 = vpop.f32.mrb[39].mxu0  ;;  %v4084_v11 = vpop.permute.xlu0 %4083 }
 0x267   : > { %4172 = vst [vmem:[%s6980_s27 + $0x120] sm:$0xff] %v4123_v32  ;;  %v4124_v26 = vmul.f32 %v7211_v23, %v3844_v19  ;;  %v3760_v60 = vmul.f32 %v5357_v42, %v7044_v9  ;;  %v5359_v55 = vadd.f32 %v3665_v47, %v2223_v40 }
 0x268   : > { %4175 = vst [vmem:[%s6980_s27 + $0x138] sm:$0xff] %v4126_v10  ;;  %v3809_v33 = vadd.f32 %v7051_v34, %v3762_v3  ;;  %v3763_v51 = vmul.f32 %v5358_v46, %v7044_v9 }
 0x269   : > { %4173 = vst [vmem:[%s6980_s27 + $0x128] sm:$0xff] %v4124_v26  ;;  %v3807_v61 = vadd.f32 %v7051_v34, %v3760_v60  ;;  %v3761_v5 = vmul.f32 %v5359_v55, %v7044_v9 }
 0x26a   : > { %v3849_v14 = vmax.f32 %v3809_v33, 0.0  ;;  %v3810_v23 = vadd.f32 %v7051_v34, %v3763_v51 }
 0x26b   : > { %v3847_v17 = vmax.f32 %v3807_v61, 0.0  ;;  %v3808_v37 = vadd.f32 %v7051_v34, %v3761_v5 }
 0x26c   : > { %v4129_v2 = vmul.f32 %v4084_v11, %v3849_v14  ;;  %v3850_v50 = vmax.f32 %v3810_v23, 0.0 }
 0x26d   : > { %v4127_v31 = vmul.f32 %v4074_v41, %v3847_v17  ;;  %v3848_v45 = vmax.f32 %v3808_v37, 0.0 }
 0x26e   : > { %4178 = vst [vmem:[%s6980_s27 + $0x150] sm:$0xff] %v4129_v2  ;;  %v4130_v25 = vmul.f32 %v4089_v62, %v3850_v50 }
 0x26f   : > { %4176 = vst [vmem:[%s6980_s27 + $0x140] sm:$0xff] %v4127_v31  ;;  %v4128_v24 = vmul.f32 %v4079_v29, %v3848_v45 }
 0x270   : > { %4179 = vst [vmem:[%s6980_s27 + $0x158] sm:$0xff] %v4130_v25 }
 0x271   : > { %4177 = vst [vmem:[%s6980_s27 + $0x148] sm:$0xff] %v4128_v24 }
 0x272 PF: > { %s15_s20 = sadd.s32 1, %s5817_s20   ;;  %s7348_s18 = smov %s5813_s19 }
 0x273   : > { %p12_p5 = scmp.ge.s32.totalorder %s15_s20, 4   ;;  %s7349_s19 = smov %s7351_s21 }
 0x275   :  { %14 = sbr.rel (!%p12_p5) target bundleno = 2 (0x2), region = 87 }

</bundles_post_ra>
